<compile_context>
chip_gen: v5e
topology: v5e:2x2
jax: 0.10.0
libtpu: 0.0.40
codegen_flags: <defaults>
</compile_context>

<pallas_src>
import functools

import jax
import jax.numpy as jnp
from jax.experimental import pallas as pl
from jax.experimental.pallas import tpu as pltpu


# ----------------------------------------------------------------------------
# Decoder: fused 3-layer MLP (produces the reconstructions the loss consumes)
# ----------------------------------------------------------------------------
def decoder_kernel(x_ref, w1_ref, b1_ref, w2_ref, b2_ref, w3_ref, b3_ref, o_ref):
    # bf16 MXU matmuls with f32 accumulation; bias/ReLU/sigmoid in f32.
    x = x_ref[...].astype(jnp.bfloat16)                                  # (tb, D_in)
    h1 = jnp.dot(x, w1_ref[...], preferred_element_type=jnp.float32) + b1_ref[...]
    h1 = jnp.maximum(h1, 0.0).astype(jnp.bfloat16)                       # ReLU
    h2 = jnp.dot(h1, w2_ref[...], preferred_element_type=jnp.float32) + b2_ref[...]
    h2 = jnp.maximum(h2, 0.0).astype(jnp.bfloat16)                       # ReLU
    z = jnp.dot(h2, w3_ref[...], preferred_element_type=jnp.float32) + b3_ref[...]
    o_ref[...] = jax.nn.sigmoid(z)                                       # Sigmoid, f32


def decoder_forward(x, params, *, output_channels, image_n_pix, tb=128):
    """x: (B, num_classes, vec_len) f32 -> reconstructions (B, output_channels, image_n_pix)."""
    w1, b1, w2, b2, w3, b3 = params
    B = x.shape[0]
    flat = x.reshape(B, -1).astype(jnp.float32)                          # (B, D_in)
    d_in, h = w1.shape
    h2_dim = w2.shape[1]
    d_out = w3.shape[1]

    # Weights resident in VMEM as bf16 (halves weight bytes, feeds the MXU natively).
    w1b = w1.astype(jnp.bfloat16)
    w2b = w2.astype(jnp.bfloat16)
    w3b = w3.astype(jnp.bfloat16)

    # Batch tile: multiple of 8 sublanes, capped by (rounded-up) batch.  Pad ragged
    # batches instead of asserting divisibility.
    tb = max(8, min(int(tb), ((B + 7) // 8) * 8))
    tb -= tb % 8
    Bp = pl.cdiv(B, tb) * tb
    if Bp != B:
        flat = jnp.pad(flat, ((0, Bp - B), (0, 0)))
    grid_b = Bp // tb

    flops = 2 * Bp * (d_in * h + h * h2_dim + h2_dim * d_out)
    bytes_accessed = (Bp * d_in * 4 + Bp * d_out * 4
                      + (w1b.size + w2b.size + w3b.size) * 2
                      + (b1.size + b2.size + b3.size) * 4)
    cost = pl.CostEstimate(flops=flops,
                           transcendentals=Bp * d_out,       # sigmoid
                           bytes_accessed=bytes_accessed)

    out_flat = pl.pallas_call(
        decoder_kernel,
        out_shape=jax.ShapeDtypeStruct((Bp, d_out), jnp.float32),
        grid_spec=pltpu.PrefetchScalarGridSpec(
            num_scalar_prefetch=0,
            grid=(grid_b,),
            in_specs=[
                pl.BlockSpec((tb, d_in), lambda i: (i, 0)),      # x tile
                pl.BlockSpec((d_in, h), lambda i: (0, 0)),       # W1 (resident, bf16)
                pl.BlockSpec((1, h), lambda i: (0, 0)),          # b1 (f32)
                pl.BlockSpec((h, h2_dim), lambda i: (0, 0)),     # W2
                pl.BlockSpec((1, h2_dim), lambda i: (0, 0)),     # b2
                pl.BlockSpec((h2_dim, d_out), lambda i: (0, 0)), # W3
                pl.BlockSpec((1, d_out), lambda i: (0, 0)),      # b3
            ],
            out_specs=pl.BlockSpec((tb, d_out), lambda i: (i, 0)),
        ),
        compiler_params=pltpu.CompilerParams(
            dimension_semantics=("parallel",),
            # Explicit VMEM budget for the double-buffered resident weights + tiles
            # (review alternative to Buffered(1) on the constant-index weight specs).
            vmem_limit_bytes=32 * 1024 * 1024,
        ),
        cost_estimate=cost,
    )(flat, w1b, b1, w2b, b2, w3b, b3)

    out_flat = out_flat[:B]
    return out_flat.reshape(-1, output_channels, image_n_pix)


# ----------------------------------------------------------------------------
# CapsuleLoss kernel
# ----------------------------------------------------------------------------
def capsule_loss_kernel(clssif_ref, labels_ref, recon_ref, images_ref,
                        loss_ref, margin_ref, rloss_ref,
                        *, classifier_weight, TF_imbalance):
    clssif = clssif_ref[...]                                  # (B, NC) f32
    labels = labels_ref[...]                                  # (B, NC) f32
    recon = recon_ref[...]                                    # (B, C*P) f32
    images = images_ref[...]                                  # (B, C*P) f32

    # margin_loss_all = classifier_weight * sqrt(mean_c (labels - clssif)^2)
    d = labels - clssif
    margin = classifier_weight * jnp.sqrt(jnp.mean(d * d, axis=1, keepdims=True))   # (B, 1)

    # reconstruction_loss_all[b] = MSE(recon[b], images[b])
    rd = recon - images
    rloss = jnp.mean(rd * rd, axis=1, keepdims=True)                                 # (B, 1)

    # argmax over classes (first occurrence of the max), via iota trick.
    nc = clssif.shape[1]
    col = jax.lax.broadcasted_iota(jnp.int32, clssif.shape, 1).astype(jnp.float32)
    lmax = jnp.max(labels, axis=1, keepdims=True)
    cmax = jnp.max(clssif, axis=1, keepdims=True)
    lbl_idx = jnp.min(jnp.where(labels >= lmax, col, float(nc)), axis=1, keepdims=True)
    cls_idx = jnp.min(jnp.where(clssif >= cmax, col, float(nc)), axis=1, keepdims=True)

    match_f = jnp.where(lbl_idx == cls_idx, 1.0, 0.0)                                # (B, 1)
    num_mismatch = jnp.sum(1.0 - match_f, axis=0, keepdims=True)                     # (1, 1)
    has_mm = jnp.where(num_mismatch > 0.0, 1.0, 0.0)                                 # (1, 1)
    gate = match_f * has_mm                                                          # (B, 1)

    # if any mismatch: scale the correctly-classified samples.
    rloss_adj = jnp.where(gate > 0.5, rloss * TF_imbalance, rloss)
    margin_adj = jnp.where(gate > 0.5, margin / TF_imbalance, margin)

    margin_ref[...] = margin_adj
    rloss_ref[...] = rloss_adj
    loss_ref[...] = (jnp.mean(margin_adj, axis=0, keepdims=True)
                     + jnp.mean(rloss_adj, axis=0, keepdims=True))


def capsule_loss_forward(clssif, labels, reconstructions, images, *,
                         classifier_weight=100.0, TF_imbalance=5.0):
    """Returns (loss, margin_loss_all, reconstruction_loss_all) like CapsuleLoss.forward."""
    B = clssif.shape[0]
    recon_flat = reconstructions.reshape(B, -1).astype(jnp.float32)
    images_flat = images.reshape(B, -1).astype(jnp.float32)

    kernel = functools.partial(capsule_loss_kernel,
                               classifier_weight=float(classifier_weight),
                               TF_imbalance=float(TF_imbalance))

    loss, margin_all, rloss_all = pl.pallas_call(
        kernel,
        out_shape=(jax.ShapeDtypeStruct((1, 1), jnp.float32),
                   jax.ShapeDtypeStruct((B, 1), jnp.float32),
                   jax.ShapeDtypeStruct((B, 1), jnp.float32)),
    )(clssif.astype(jnp.float32), labels.astype(jnp.float32), recon_flat, images_flat)

    return loss[0, 0], margin_all[:, 0], rloss_all[:, 0]


# ----------------------------------------------------------------------------
# Param init + pure-JAX references
# ----------------------------------------------------------------------------
def init_params(key, d_in, hidden, d_out):
    """nn.Linear-style uniform(-1/sqrt(fan_in), 1/sqrt(fan_in)) init."""
    ks = jax.random.split(key, 6)

    def lin(kw, kb, fan_in, fan_out):
        bound = 1.0 / jnp.sqrt(fan_in)
        w = jax.random.uniform(kw, (fan_in, fan_out), jnp.float32, -bound, bound)
        b = jax.random.uniform(kb, (1, fan_out), jnp.float32, -bound, bound)
        return w, b

    w1, b1 = lin(ks[0], ks[1], d_in, hidden)
    w2, b2 = lin(ks[2], ks[3], hidden, hidden * 2)
    w3, b3 = lin(ks[4], ks[5], hidden * 2, d_out)
    return (w1, b1, w2, b2, w3, b3)


def reference_decoder(x, params, *, output_channels, image_n_pix):
    w1, b1, w2, b2, w3, b3 = params
    flat = x.reshape(x.shape[0], -1)
    h1 = jnp.maximum(flat @ w1 + b1, 0.0)
    h2 = jnp.maximum(h1 @ w2 + b2, 0.0)
    out = jax.nn.sigmoid(h2 @ w3 + b3)
    return out.reshape(-1, output_channels, image_n_pix)


def reference_capsule_loss(clssif, labels, recon, images, *,
                           classifier_weight, TF_imbalance):
    B = clssif.shape[0]
    margin_all = classifier_weight * jnp.sqrt(jnp.mean((labels - clssif) ** 2, axis=1))
    r = recon.reshape(B, -1)
    im = images.reshape(B, -1)
    recon_all = jnp.mean((r - im) ** 2, axis=1)
    lbls = jnp.argmax(labels, axis=1)
    clss = jnp.argmax(clssif, axis=1)
    match = lbls == clss
    any_mm = jnp.any(~match)
    recon_all = jnp.where(match & any_mm, recon_all * TF_imbalance, recon_all)
    margin_all = jnp.where(match & any_mm, margin_all / TF_imbalance, margin_all)
    loss = jnp.mean(margin_all) + jnp.mean(recon_all)
    return loss, margin_all, recon_all


# ----------------------------------------------------------------------------
# Self-test
# ----------------------------------------------------------------------------
if __name__ == "__main__":
    # Small shapes consistent with the capsnet module:
    #   num_classes=8 capsules of length 16 -> decoder input dim 128
    #   hidden 128 / 256, 16x16 image, 3 output channels -> d_out = 768 (6*128)
    # B=256 so the decoder grid has 2 batch tiles of 128 (fills MXU rows and gives
    # both v7x TensorCores a step) while staying tiny memory-wise.
    B = 256
    num_classes = 8
    vec_len = 16
    hidden = 128
    image_n_pix = 16 * 16
    output_channels = 3
    classifier_weight = 100.0
    TF_imbalance = 5.0

    d_in = num_classes * vec_len
    d_out = image_n_pix * output_channels

    key = jax.random.PRNGKey(0)
    k_x, k_p, k_lbl, k_img = jax.random.split(key, 4)

    # Capsule outputs feeding the decoder.
    caps = jax.random.normal(k_x, (B, num_classes, vec_len), dtype=jnp.float32)
    params = init_params(k_p, d_in, hidden, d_out)

    # Classification scores (capsule lengths squashed to [0,1)) and one-hot labels.
    norms = jnp.linalg.norm(caps, axis=-1)
    clssif = norms / (1.0 + norms)                                   # (B, num_classes)
    labels = jax.nn.one_hot(jax.random.randint(k_lbl, (B,), 0, num_classes),
                            num_classes, dtype=jnp.float32)

    # Ground-truth images (stand-in for data_gen(inds)[0]).
    images = jax.random.uniform(k_img, (B, output_channels, image_n_pix),
                                dtype=jnp.float32)

    # 1) Decoder kernel -> reconstructions.
    recon = decoder_forward(caps, params, output_channels=output_channels,
                            image_n_pix=image_n_pix, tb=128)
    recon = jax.block_until_ready(recon)
    assert recon.shape == (B, output_channels, image_n_pix)
    recon_ref = reference_decoder(caps, params, output_channels=output_channels,
                                  image_n_pix=image_n_pix)
    # bf16 matmuls with f32 accumulation -> loosened tolerance vs the f32 reference.
    assert jnp.allclose(recon, recon_ref, atol=5e-2, rtol=5e-2), "decoder mismatch"

    # 2) CapsuleLoss kernel (consumes the kernel reconstructions).
    loss, margin_all, rloss_all = capsule_loss_forward(
        clssif, labels, recon, images,
        classifier_weight=classifier_weight, TF_imbalance=TF_imbalance)
    jax.block_until_ready((loss, margin_all, rloss_all))

    l_ref, m_ref, r_ref = reference_capsule_loss(
        clssif, labels, recon, images,
        classifier_weight=classifier_weight, TF_imbalance=TF_imbalance)

    assert margin_all.shape == (B,) and rloss_all.shape == (B,)
    assert jnp.allclose(loss, l_ref, rtol=1e-4, atol=1e-5), "total loss mismatch"
    assert jnp.allclose(margin_all, m_ref, rtol=1e-4, atol=1e-5), "margin loss mismatch"
    assert jnp.allclose(rloss_all, r_ref, rtol=1e-4, atol=1e-5), "recon loss mismatch"

    print("KERNEL_OK")
</pallas_src>

<mosaic_0001>
module attributes {stable_mosaic.version = 11 : i64} {
  func.func @decoder_kernel(%arg0: i32, %arg1: memref<128x128xf32, #tpu.memory_space<vmem>>, %arg2: memref<128x128xbf16, #tpu.memory_space<vmem>>, %arg3: memref<1x128xf32, #tpu.memory_space<vmem>>, %arg4: memref<128x256xbf16, #tpu.memory_space<vmem>>, %arg5: memref<1x256xf32, #tpu.memory_space<vmem>>, %arg6: memref<256x768xbf16, #tpu.memory_space<vmem>>, %arg7: memref<1x768xf32, #tpu.memory_space<vmem>>, %arg8: memref<128x768xf32, #tpu.memory_space<vmem>>) attributes {dimension_semantics = [#tpu.dimension_semantics<parallel>], iteration_bounds = array<i64: 2>, scalar_prefetch = 0 : i64, scratch_operands = 0 : i64, tpu.core_type = #tpu.core_type<tc>, window_params = [{transform_indices = @transform_0, window_bounds = array<i64: 128, 128>}, {pipeline_mode = #tpu.pipeline_mode<synchronous>, transform_indices = @transform_1, window_bounds = array<i64: 128, 128>}, {pipeline_mode = #tpu.pipeline_mode<synchronous>, transform_indices = @transform_2, window_bounds = array<i64: 1, 128>}, {pipeline_mode = #tpu.pipeline_mode<synchronous>, transform_indices = @transform_3, window_bounds = array<i64: 128, 256>}, {pipeline_mode = #tpu.pipeline_mode<synchronous>, transform_indices = @transform_4, window_bounds = array<i64: 1, 256>}, {pipeline_mode = #tpu.pipeline_mode<synchronous>, transform_indices = @transform_5, window_bounds = array<i64: 256, 768>}, {pipeline_mode = #tpu.pipeline_mode<synchronous>, transform_indices = @transform_6, window_bounds = array<i64: 1, 768>}, {transform_indices = @transform_7, window_bounds = array<i64: 128, 768>}]} {
    %c0 = arith.constant 0 : index
    %c0_0 = arith.constant 0 : index
    %0 = vector.load %arg1[%c0, %c0_0] : memref<128x128xf32, #tpu.memory_space<vmem>>, vector<128x128xf32>
    %1 = arith.truncf %0 : vector<128x128xf32> to vector<128x128xbf16>
    %c0_1 = arith.constant 0 : index
    %c0_2 = arith.constant 0 : index
    %2 = vector.load %arg2[%c0_1, %c0_2] : memref<128x128xbf16, #tpu.memory_space<vmem>>, vector<128x128xbf16>
    %cst = arith.constant dense<0.000000e+00> : vector<128x128xf32>
    %3 = tpu.matmul %1, %2, %cst {dimension_numbers = #tpu.dot_dimension_numbers<[1], [0], [0], [1], [0, 0, 1, 1], [], []>} : vector<128x128xbf16>, vector<128x128xbf16>, vector<128x128xf32> -> vector<128x128xf32>
    %c0_3 = arith.constant 0 : index
    %c0_4 = arith.constant 0 : index
    %4 = vector.load %arg3[%c0_3, %c0_4] : memref<1x128xf32, #tpu.memory_space<vmem>>, vector<1x128xf32>
    %5 = vector.broadcast %4 : vector<1x128xf32> to vector<128x128xf32>
    %6 = arith.addf %3, %5 : vector<128x128xf32>
    %cst_5 = arith.constant 0.000000e+00 : f32
    %7 = vector.broadcast %cst_5 : f32 to vector<128x128xf32>
    %8 = arith.maximumf %6, %7 : vector<128x128xf32>
    %9 = arith.truncf %8 : vector<128x128xf32> to vector<128x128xbf16>
    %c0_6 = arith.constant 0 : index
    %c0_7 = arith.constant 0 : index
    %10 = vector.load %arg4[%c0_6, %c0_7] : memref<128x256xbf16, #tpu.memory_space<vmem>>, vector<128x256xbf16>
    %cst_8 = arith.constant dense<0.000000e+00> : vector<128x256xf32>
    %11 = tpu.matmul %9, %10, %cst_8 {dimension_numbers = #tpu.dot_dimension_numbers<[1], [0], [0], [1], [0, 0, 1, 1], [], []>} : vector<128x128xbf16>, vector<128x256xbf16>, vector<128x256xf32> -> vector<128x256xf32>
    %c0_9 = arith.constant 0 : index
    %c0_10 = arith.constant 0 : index
    %12 = vector.load %arg5[%c0_9, %c0_10] : memref<1x256xf32, #tpu.memory_space<vmem>>, vector<1x256xf32>
    %13 = vector.broadcast %12 : vector<1x256xf32> to vector<128x256xf32>
    %14 = arith.addf %11, %13 : vector<128x256xf32>
    %cst_11 = arith.constant 0.000000e+00 : f32
    %15 = vector.broadcast %cst_11 : f32 to vector<128x256xf32>
    %16 = arith.maximumf %14, %15 : vector<128x256xf32>
    %17 = arith.truncf %16 : vector<128x256xf32> to vector<128x256xbf16>
    %c0_12 = arith.constant 0 : index
    %c0_13 = arith.constant 0 : index
    %18 = vector.load %arg6[%c0_12, %c0_13] : memref<256x768xbf16, #tpu.memory_space<vmem>>, vector<256x768xbf16>
    %cst_14 = arith.constant dense<0.000000e+00> : vector<128x768xf32>
    %19 = tpu.matmul %17, %18, %cst_14 {dimension_numbers = #tpu.dot_dimension_numbers<[1], [0], [0], [1], [0, 0, 1, 1], [], []>} : vector<128x256xbf16>, vector<256x768xbf16>, vector<128x768xf32> -> vector<128x768xf32>
    %c0_15 = arith.constant 0 : index
    %c0_16 = arith.constant 0 : index
    %20 = vector.load %arg7[%c0_15, %c0_16] : memref<1x768xf32, #tpu.memory_space<vmem>>, vector<1x768xf32>
    %21 = vector.broadcast %20 : vector<1x768xf32> to vector<128x768xf32>
    %22 = arith.addf %19, %21 : vector<128x768xf32>
    %23 = arith.negf %22 : vector<128x768xf32>
    %24 = math.exp %23 : vector<128x768xf32>
    %cst_17 = arith.constant 1.000000e+00 : f32
    %25 = vector.broadcast %cst_17 : f32 to vector<128x768xf32>
    %26 = arith.addf %25, %24 : vector<128x768xf32>
    %27 = arith.divf %25, %26 : vector<128x768xf32>
    %c0_18 = arith.constant 0 : index
    %c0_19 = arith.constant 0 : index
    %28 = vector.load %arg8[%c0_18, %c0_19] : memref<128x768xf32, #tpu.memory_space<vmem>>, vector<128x768xf32>
    tpu.vector_store %arg8[%c0_18, %c0_19], %27 {strides = array<i32>} : memref<128x768xf32, #tpu.memory_space<vmem>>, vector<128x768xf32>,
    return
  }
  func.func @transform_0(%arg0: i32) -> (i32, i32) {
    %c0_i32 = arith.constant 0 : i32
    %c0_i32_0 = arith.constant 0 : i32
    return %arg0, %c0_i32 : i32, i32
  }
  func.func @transform_1(%arg0: i32) -> (i32, i32) {
    %c0_i32 = arith.constant 0 : i32
    %c0_i32_0 = arith.constant 0 : i32
    %c0_i32_1 = arith.constant 0 : i32
    return %c0_i32, %c0_i32_0 : i32, i32
  }
  func.func @transform_2(%arg0: i32) -> (i32, i32) {
    %c0_i32 = arith.constant 0 : i32
    %c0_i32_0 = arith.constant 0 : i32
    %c0_i32_1 = arith.constant 0 : i32
    return %c0_i32, %c0_i32_0 : i32, i32
  }
  func.func @transform_3(%arg0: i32) -> (i32, i32) {
    %c0_i32 = arith.constant 0 : i32
    %c0_i32_0 = arith.constant 0 : i32
    %c0_i32_1 = arith.constant 0 : i32
    return %c0_i32, %c0_i32_0 : i32, i32
  }
  func.func @transform_4(%arg0: i32) -> (i32, i32) {
    %c0_i32 = arith.constant 0 : i32
    %c0_i32_0 = arith.constant 0 : i32
    %c0_i32_1 = arith.constant 0 : i32
    return %c0_i32, %c0_i32_0 : i32, i32
  }
  func.func @transform_5(%arg0: i32) -> (i32, i32) {
    %c0_i32 = arith.constant 0 : i32
    %c0_i32_0 = arith.constant 0 : i32
    %c0_i32_1 = arith.constant 0 : i32
    return %c0_i32, %c0_i32_0 : i32, i32
  }
  func.func @transform_6(%arg0: i32) -> (i32, i32) {
    %c0_i32 = arith.constant 0 : i32
    %c0_i32_0 = arith.constant 0 : i32
    %c0_i32_1 = arith.constant 0 : i32
    return %c0_i32, %c0_i32_0 : i32, i32
  }
  func.func @transform_7(%arg0: i32) -> (i32, i32) {
    %c0_i32 = arith.constant 0 : i32
    %c0_i32_0 = arith.constant 0 : i32
    return %arg0, %c0_i32 : i32, i32
  }
}

</mosaic_0001>

<bundles_post_ra>
// kernel: tpu_custom_call.1
= control target key start
LH: loop header
LB: loop body
LE: loop exit
PB: predicated region body
PF: predicated region fallthrough
CT: control target
= control target key end

     0   :  { %s8401_s0 = inlined_call_operand.hbm [shape: f32[256,128], index: 0, kind: input, shape index: {}]   ;;  %s8402_s1 = inlined_call_operand.hbm [shape: bf16[128,128], index: 1, kind: input, shape index: {}]   ;;  %s8403_s2 = inlined_call_operand.vmem [shape: f32[1,128], index: 2, kind: input, shape index: {}]   ;;  %s8404_s3 = inlined_call_operand.hbm [shape: bf16[128,256], index: 3, kind: input, shape index: {}]   ;;  %s8405_s4 = inlined_call_operand.vmem [shape: f32[1,256], index: 4, kind: input, shape index: {}]   ;;  %s8406_s5 = inlined_call_operand.hbm [shape: bf16[256,768], index: 5, kind: input, shape index: {}]   ;;  %s8407_s6 = inlined_call_operand.hbm [shape: f32[1,768], index: 6, kind: input, shape index: {}]   ;;  %s8408_s7 = inlined_call_operand.hbm [shape: f32[256,768], index: 7, kind: output, shape index: {}]  }
   0x1   :  { %8411 = sst [smem:[#allocation16_spill]] %s8402_s1 }
   0x2   :  { %12 = vsyncpa [#allocation3], 0 }
   0x3   :  { %14 = vsyncpa [#allocation3 + $0x1], 0 }
   0x4   :  { %15 = vsyncpa [#allocation6], 0 }
   0x5   :  { %16 = vsyncpa [#allocation9], 0 }
   0x6   :  { %17 = vsyncpa [#allocation4], 0 }
   0x7   :  { %19 = vsyncpa [#allocation4 + $0x1], 0  ;;  %s5508_s24 = smov 0   ;;  %s5510_s25 = smov 0  }
   0x8   :  { %s5512_s26 = smov 0   ;;  %s5514_s27 = smov 0  }
   0x9 LB: > { %s5529_s28 = sadd.s32 4294967295, %s5454_s27   ;;  %s4004_s29 = sadd.s32 4294967294, %s5454_s27   ;;  %s5454_s27 = sphi %s5514_s27, %s8607_s27   ;;  %s5450_s26 = sphi %s5512_s26, %s8606_s26   ;;  %s5446_s25 = sphi %s5510_s25, %s8605_s25   ;;  %s5442_s24 = sphi %s5508_s24, %s8604_s24  }
   0xa   : > { %p45_p0 = scmp.ne.s32.totalorder %s5446_s25, %s5442_s24  ;;  %p46_p1 = scmp.eq.s32.totalorder %s5529_s28, 0 }
   0xb   : > { %p195_p2 = scmp.eq.s32.totalorder %s5529_s28, 1  ;;  %p201_p3 = scmp.eq.s32.totalorder %s4004_s29, 1 }
   0xc   : > { %p5538_p4 = por %p46_p1, %p45_p0  ;;  %p4005_p5 = scmp.ge.s32.totalorder %s5454_s27, 1 }
   0xd   : > { %p5543_p6 = por %p201_p3, %p45_p0  ;;  %p208_p7 = scmp.lt.s32.totalorder %s5454_s27, 3 }
   0xe   : > { %s8414_s1 = sld [smem:[#allocation16_spill]]  ;;  %s5456_s13 = smov [#allocation5]  }
   0xf   : > { %p5551_p8 = pnand %p4005_p5, %p208_p7  ;;  %s221_s14 = sshll.u32 %s5456_s13, 4  ;;  %s222_s14 = int_to_ptr.vmem [resolvable:$true] %s221_s14 }
  0x10   : > { %s253_s18 = sshll.u32 %s8406_s5, 4  ;;  %s5457_s19 = smov 64   ;;  %s254_s18 = int_to_ptr.hbm [resolvable:$true] %s253_s18 }
  0x11   : > { %p4768_p9 = pneg %p5551_p8  ;;  %s5458_s20 = smov 4  }
  0x12   : > { %s5459_s21 = smov [#allocation8]   ;;  %s5460_s23 = smov 384  }
  0x13   : > { %p5559_p10 = pnand %p4768_p9, %p46_p1  ;;  %s255_s22 = sshll.u32 %s5459_s21, 4  ;;  %s256_s22 = int_to_ptr.vmem [resolvable:$true] %s255_s22 }
  0x14   : > { %s219_s11 = sshll.u32 %s8414_s1, 4  ;;  %s5461_s29 = smov 24   ;;  %s220_s11 = int_to_ptr.hbm [resolvable:$true] %s219_s11 }
  0x15   : > { %4771 = dma.hbm_to_vmem [thread:$0]  (!%p5559_p10), %s220_s11, 1024, %s222_s14, [#allocation6], %s5457_s19, %s5457_s19, %s5458_s20  }
  0x16   : > { %4777 = dma.hbm_to_vmem [thread:$0]  (!%p5559_p10), %s254_s18, 12288, %s256_s22, [#allocation9], %s5460_s23, %s5460_s23, %s5461_s29  }
  0x17   : > { %s236_s13 = sshll.u32 %s8404_s3, 4  ;;  %s5462_s16 = smov [#allocation7]   ;;  %s237_s13 = int_to_ptr.hbm [resolvable:$true] %s236_s13 }
  0x18   : > { %s238_s11 = sshll.u32 %s5462_s16, 4  ;;  %s268_s19 = sshll.u32 %s8407_s6, 4  ;;  %s239_s11 = int_to_ptr.vmem [resolvable:$true] %s238_s11  ;;  %s269_s19 = int_to_ptr.hbm [resolvable:$true] %s268_s19 }
  0x19   : > { %s8409_s18 = smov 128   ;;  %s8410_s20 = smov 8  }
  0x1a   : > { %4774 = dma.hbm_to_vmem [thread:$0]  (!%p5559_p10), %s237_s13, 2048, %s239_s11, [#allocation6], %s8409_s18, %s8409_s18, %s8410_s20  }
  0x1b   : > { %s5465_s21 = smov [#allocation10]   ;;  %s5585_s23 = sadd.s32 1, %s5454_s27  }
  0x1c   : > { %s270_s22 = sshll.u32 %s5465_s21, 4  ;;  %s32_s29 = sadd.s32 1, %s5450_s26  ;;  %s271_s22 = int_to_ptr.vmem [resolvable:$true] %s270_s22 }
  0x1d   : > { %4780 = dma.hbm_to_vmem [thread:$0]  (!%p5559_p10), %s269_s19, 96, %s271_s22, [#allocation9]  }
  0x1e   : > { %s29_s9 = ssub.s32 %s5454_s27, %s5585_s23  ;;  %p39_p12 = scmp.ne.s32.totalorder %s5450_s26, %s5446_s25 }
  0x1f   : > { %p30_p13 = scmp.eq.s32.totalorder %s29_s9, 0  ;;  %p40_p0 = scmp.eq.s32.totalorder %s5454_s27, 0 }
  0x20   : > { %p5595_p3 = por %p195_p2, %p39_p12  ;;  %p4793_p5 = scmp.lt.s32.totalorder %s5454_s27, 2 }
  0x21   : > { %s5601_s13 = scalar_select %p30_p13, %s5450_s26, %s32_s29  }
  0x22   : > { %p41_p7 = por %p40_p0, %p39_p12  ;;  %s281_s16 = sand.u32 1, %s5450_s26  }
  0x23   : > { %s4011_s15 = sshll.u32 %s281_s16, 7  ;;  %s4601_s11 = sshll.u32 %s5454_s27, 7 }
  0x24   : > { %s290_s19 = scalar_lea.hbm %s8401_s0, %s4601_s11  ;;  %s285_s21 = scalar_lea.vmem [#allocation2], %s4011_s15 }
  0x25   : > { %s293_s22 = sshll.u32 %s285_s21, 4  ;;  %s291_s9 = sshll.u32 %s290_s19, 4  ;;  %s294_s22 = int_to_ptr.vmem [resolvable:$true] %s293_s22  ;;  %s292_s9 = int_to_ptr.hbm [resolvable:$true] %s291_s9 }
  0x26   : > { %p5608_p2 = pnand %p4793_p5, %p41_p7  ;;  %s282_s29 = scalar_lea.sflag [#allocation3], %s281_s16 }
  0x27   : > { %s5350_s20 = sshra.s32 %s292_s9, 4  ;;  %s5357_s14 = scalar_lea.hbm %s8401_s0, 256  ;;  %s5351_s20 = int_to_ptr.hbm [resolvable:$true] %s5350_s20 }
  0x28   : > { %s5352_s1 = scalar_lea.hbm %s5351_s20, 128  ;;  %p5354_p10 = pneg %p5608_p2 }
  0x29   : > { %p5353_p9 = scmp.ne.s32.totalorder %s5351_s20, %s5352_s1  ;;  %p5358_p0 = scmp.lt.s32.totalorder %s5351_s20, %s8401_s0 }
  0x2a   : > { %p5359_p5 = scmp.lt.s32.totalorder %s5357_s14, %s5352_s1 }
  0x2b   : > { %p5355_p12 = pnand %p5354_p10, %p5353_p9 }
  0x2c   : > { %p5360_p7 = por %p5359_p5, %p5358_p0 }
  0x2d   : > { %p5356_p13 = pneg %p5355_p12 }
  0x2f   : > { %p5361_p11 = pnand %p5360_p7, %p5356_p13 }
  0x31   : > { %5364 = shalt.err (!%p5361_p11)
}
  0x32   : > { %s8419_s16 = smov 8   ;;  %s8420_s21 = smov 128  }
  0x33   : > { %4784 = dma.hbm_to_vmem [thread:$0]  (!%p5608_p2), %s292_s9, 2048, %s294_s22, %s282_s29, %s8420_s21, %s8420_s21, %s8419_s16  }
  0x34   : > { %305 = sbr.rel (%p5551_p8) target bundleno = 1001 (0x3e9), region = 48  ;;  %s5628_s11 = sand.u32 (!%p5551_p8), 1, %s5446_s25  }
  0x35   : > { %s4015_s20 = sshll.u32 (!%p5551_p8), %s5628_s11, 7  ;;  %s308_s1 = scalar_lea.sflag (!%p5551_p8), [#allocation3], %s5628_s11 }
  0x36   : > { %s5632_s15 = scalar_lea.vmem (!%p5551_p8), [#allocation2], %s4015_s20 }
  0x39   : > { %5425 = dma.done.wait (%p5538_p4), %s308_s1, 2048  }
  0x3a   : > { %5427 = vsyncadd (%p5538_p4), %s308_s1, 4294965248 }
  0x3b   : > { %5429 = dma.done.wait (%p46_p1), [#allocation6], 3072  }
  0x3c   : > { %5431 = vsyncadd (%p46_p1), [#allocation6], 4294964224 }
  0x3d   : > { %5433 = dma.done.wait (%p46_p1), [#allocation9], 12384  }
  0x3e   : > { %5435 = vsyncadd (%p46_p1), [#allocation9], 4294954912  ;;  %v4609_v0 = vld [vmem:[#allocation5 + $0x38] sm:$0xff]  ;;  %v4608_v1 = vld [vmem:[#allocation5 + $0x30] sm:$0xff]  ;;  %s4746_s9 = smul.u32 768, %s5628_s11  ;;  %s5400_s18 = scalar_lea.hbm %s8408_s7, 1536 }
  0x3f   : > { %457 = vmatpush.bf16.msra.mxu0 %v4609_v0  ;;  %4722 = vmatpush.bf16.msra.mxu3 %v4609_v0  ;;  %v4607_v2 = vld [vmem:[#allocation5 + $0x28] sm:$0xff]  ;;  %v4606_v3 = vld [vmem:[#allocation5 + $0x20] sm:$0xff]  ;;  %v4605_v4 = vld [vmem:[#allocation5 + $0x18] sm:$0xff]  ;;  %s4747_s14 = smul.u32 768, %s5529_s28  ;;  %s3877_s28 = scalar_lea.sflag [#allocation4], %s5628_s11 }
  0x40   : > { %v4604_v5 = vld [vmem:[#allocation5 + $0x10] sm:$0xff]  ;;  %v4603_v6 = vld [vmem:[#allocation5 + $0x8] sm:$0xff]  ;;  %v4602_v7 = vld [vmem:[#allocation5] sm:$0xff]  ;;  %s5891_s29 = scalar_lea.vmem [#allocation11], %s4746_s9 }
  0x41   : > { %v365_v8 = vld [vmem:[%s5632_s15] sm:$0xff]  ;;  %v366_v9 = vld [vmem:[%s5632_s15 + $0x8] sm:$0xff]  ;;  %v367_v14 = vld [vmem:[%s5632_s15 + $0x10] sm:$0xff]  ;;  %s3889_s16 = scalar_lea.hbm %s8408_s7, %s4747_s14  ;;  %s3890_s21 = sshll.u32 %s5891_s29, 4  ;;  %s3891_s21 = int_to_ptr.vmem [resolvable:$true] %s3890_s21 }
  0x42   : > { %v369_v10 = vld [vmem:[%s5632_s15 + $0x20] sm:$0xff]  ;;  %v370_v11 = vld [vmem:[%s5632_s15 + $0x28] sm:$0xff]  ;;  %v381_v12 = vpack.c.bf16 %v366_v9, %v365_v8  ;;  %v368_v15 = vld [vmem:[%s5632_s15 + $0x18] sm:$0xff]  ;;  %s3892_s20 = sshll.u32 %s3889_s16, 4  ;;  %s3893_s20 = int_to_ptr.hbm [resolvable:$true] %s3892_s20 }
  0x43   : > { %458 = vmatpush.bf16.msra.mxu0 %v4608_v1  ;;  %4723 = vmatpush.bf16.msra.mxu3 %v4608_v1  ;;  %v383_v13 = vpack.c.bf16 %v370_v11, %v369_v10  ;;  %v371_v16 = vld [vmem:[%s5632_s15 + $0x30] sm:$0xff]  ;;  %v372_v17 = vld [vmem:[%s5632_s15 + $0x38] sm:$0xff]  ;;  %v382_v18 = vpack.c.bf16 %v368_v15, %v367_v14  ;;  %v373_v20 = vld [vmem:[%s5632_s15 + $0x40] sm:$0xff]  ;;  %s5394_s1 = sshra.s32 %s3893_s20, 4  ;;  %s5395_s1 = int_to_ptr.hbm [resolvable:$true] %s5394_s1 }
  0x44   : > { %v384_v19 = vpack.c.bf16 %v372_v17, %v371_v16  ;;  %v374_v21 = vld [vmem:[%s5632_s15 + $0x48] sm:$0xff]  ;;  %v375_v23 = vld [vmem:[%s5632_s15 + $0x50] sm:$0xff]  ;;  %v376_v24 = vld [vmem:[%s5632_s15 + $0x58] sm:$0xff]  ;;  %p5401_p11 = scmp.lt.s32.totalorder %s5395_s1, %s8408_s7 }
  0x45   : > { %v385_v22 = vpack.c.bf16 %v374_v21, %v373_v20  ;;  %v386_v25 = vpack.c.bf16 %v376_v24, %v375_v23  ;;  %v4110_v26 = vld [vmem:[#allocation7 + $0x70] sm:$0xf]  ;;  %v4625_v27 = vld [vmem:[#allocation7 + $0x74] sm:$0xf0]  ;;  %v4102_v28 = vld [vmem:[#allocation7 + $0x60] sm:$0xf] }
  0x46   : > { %v4111_v29 = vor.u32 %v4625_v27, %v4110_v26  ;;  %v4623_v30 = vld [vmem:[#allocation7 + $0x64] sm:$0xf0]  ;;  %v4094_v32 = vld [vmem:[#allocation7 + $0x50] sm:$0xf]  ;;  %v4621_v33 = vld [vmem:[#allocation7 + $0x54] sm:$0xf0] }
  0x47   : > { %459 = vmatpush.bf16.msra.mxu0 %v4607_v2  ;;  %4724 = vmatpush.bf16.msra.mxu3 %v4607_v2  ;;  %v4103_v31 = vor.u32 %v4623_v30, %v4102_v28  ;;  %v4095_v34 = vor.u32 %v4621_v33, %v4094_v32  ;;  %v4086_v35 = vld [vmem:[#allocation7 + $0x40] sm:$0xf]  ;;  %v4619_v36 = vld [vmem:[#allocation7 + $0x44] sm:$0xf0]  ;;  %v4078_v41 = vld [vmem:[#allocation7 + $0x30] sm:$0xf] }
  0x48   : > { %4730 = vmatpush.bf16.msra.mxu1 %v4111_v29  ;;  %v377_v37 = vld [vmem:[%s5632_s15 + $0x60] sm:$0xff]  ;;  %v378_v38 = vld [vmem:[%s5632_s15 + $0x68] sm:$0xff]  ;;  %v4087_v39 = vor.u32 %v4619_v36, %v4086_v35  ;;  %v4617_v42 = vld [vmem:[#allocation7 + $0x34] sm:$0xf0] }
  0x49   : > { %v387_v40 = vpack.c.bf16 %v378_v38, %v377_v37  ;;  %v4079_v43 = vor.u32 %v4617_v42, %v4078_v41  ;;  %v379_v44 = vld [vmem:[%s5632_s15 + $0x70] sm:$0xff]  ;;  %v380_v45 = vld [vmem:[%s5632_s15 + $0x78] sm:$0xff]  ;;  %v4070_v47 = vld [vmem:[#allocation7 + $0x20] sm:$0xf]  ;;  %s5396_s15 = scalar_lea.hbm %s5395_s1, 768 }
  0x4a   : > { %v388_v46 = vpack.c.bf16 %v380_v45, %v379_v44  ;;  %v4615_v48 = vld [vmem:[#allocation7 + $0x24] sm:$0xf0]  ;;  %v4062_v50 = vld [vmem:[#allocation7 + $0x10] sm:$0xf]  ;;  %v4613_v51 = vld [vmem:[#allocation7 + $0x14] sm:$0xf0]  ;;  %p5397_p1 = scmp.ne.s32.totalorder %s5395_s1, %s5396_s15  ;;  %p5402_p2 = scmp.lt.s32.totalorder %s5400_s18, %s5396_s15 }
  0x4b   : > { %460 = vmatpush.bf16.msra.mxu0 %v4606_v3  ;;  %4725 = vmatpush.bf16.msra.mxu3 %v4606_v3  ;;  %v4071_v49 = vor.u32 %v4615_v48, %v4070_v47  ;;  %v4063_v52 = vor.u32 %v4613_v51, %v4062_v50  ;;  %v4054_v53 = vld [vmem:[#allocation7] sm:$0xf]  ;;  %v4611_v54 = vld [vmem:[#allocation7 + $0x4] sm:$0xf0]  ;;  %v4624_v56 = vld [vmem:[#allocation7 + $0x74] sm:$0xf] }
  0x4c   : > { %4731 = vmatpush.bf16.msra.mxu1 %v4103_v31  ;;  %v4055_v55 = vor.u32 %v4611_v54, %v4054_v53  ;;  %v4112_v57 = vld [vmem:[#allocation7 + $0x78] sm:$0xf0]  ;;  %v4622_v59 = vld [vmem:[#allocation7 + $0x64] sm:$0xf]  ;;  %v4104_v60 = vld [vmem:[#allocation7 + $0x68] sm:$0xf0]  ;;  %p5398_p4 = pnand %p5397_p1, %p5595_p3  ;;  %p5403_p9 = por %p5402_p2, %p5401_p11 }
  0x4d   : > { %v4115_v58 = vor.u32 %v4624_v56, %v4112_v57  ;;  %v4107_v61 = vor.u32 %v4622_v59, %v4104_v60  ;;  %v4620_v62 = vld [vmem:[#allocation7 + $0x54] sm:$0xf]  ;;  %v4096_v63 = vld [vmem:[#allocation7 + $0x58] sm:$0xf0]  ;;  %v4618_v1 = vld [vmem:[#allocation7 + $0x44] sm:$0xf] }
  0x4e   : > { %v4099_v0 = vor.u32 %v4620_v62, %v4096_v63  ;;  %v4088_v2 = vld [vmem:[#allocation7 + $0x48] sm:$0xf0]  ;;  %v4612_v11 = vld [vmem:[#allocation7 + $0x14] sm:$0xf]  ;;  %v4610_v15 = vld [vmem:[#allocation7 + $0x4] sm:$0xf]  ;;  %p5399_p8 = pneg %p5398_p4 }
  0x4f   : > { %461 = vmatpush.bf16.msra.mxu0 %v4605_v4  ;;  %4726 = vmatpush.bf16.msra.mxu3 %v4605_v4  ;;  %v4091_v3 = vor.u32 %v4618_v1, %v4088_v2  ;;  %v4616_v4 = vld [vmem:[#allocation7 + $0x34] sm:$0xf]  ;;  %v4072_v8 = vld [vmem:[#allocation7 + $0x28] sm:$0xf0]  ;;  %v4286_v44 = vld [vmem:[#allocation8 + $0x150] sm:$0xf] }
  0x50   : > { %4732 = vmatpush.bf16.msra.mxu1 %v4095_v34  ;;  %4738 = vmatpush.bf16.msra.mxu2 %v4115_v58  ;;  %v4056_v16 = vld [vmem:[#allocation7 + $0x8] sm:$0xf0]  ;;  %v4671_v45 = vld [vmem:[#allocation8 + $0x164] sm:$0xf0]  ;;  %v4716_v47 = vld [vmem:[#allocation8 + $0x2d4] sm:$0xf]  ;;  %p5404_p10 = pnand %p5403_p9, %p5399_p8 }
  0x51   : > { %v4059_v20 = vor.u32 %v4610_v15, %v4056_v16  ;;  %v4480_v48 = vld [vmem:[#allocation8 + $0x2e8] sm:$0xf0]  ;;  %v4668_v51 = vld [vmem:[#allocation8 + $0x154] sm:$0xf]  ;;  %v4665_v56 = vld [vmem:[#allocation8 + $0x134] sm:$0xf0] }
  0x52   : > { %v4483_v50 = vor.u32 %v4716_v47, %v4480_v48  ;;  %v4456_v59 = vld [vmem:[#allocation8 + $0x2b8] sm:$0xf0]  ;;  %v4662_v2 = vld [vmem:[#allocation8 + $0x124] sm:$0xf]  ;;  %v4240_v16 = vld [vmem:[#allocation8 + $0x108] sm:$0xf0] }
  0x53   : > { %462 = vmatpush.bf16.msra.mxu0 %v4604_v5  ;;  %4727 = vmatpush.bf16.msra.mxu3 %v4604_v5  ;;  %v4080_v5 = vld [vmem:[#allocation7 + $0x38] sm:$0xf0] }
  0x54   : > { %4733 = vmatpush.bf16.msra.mxu1 %v4087_v39  ;;  %4739 = vmatpush.bf16.msra.mxu2 %v4107_v61 }
  0x57   : > { %463 = vmatpush.bf16.msra.mxu0 %v4603_v6  ;;  %4728 = vmatpush.bf16.msra.mxu3 %v4603_v6  ;;  %v4083_v6 = vor.u32 %v4616_v4, %v4080_v5 }
  0x58   : > { %4734 = vmatpush.bf16.msra.mxu1 %v4079_v43  ;;  %4740 = vmatpush.bf16.msra.mxu2 %v4099_v0 }
  0x5b   : > { %464 = vmatpush.bf16.msra.mxu0 %v4602_v7  ;;  %4729 = vmatpush.bf16.msra.mxu3 %v4602_v7  ;;  %v4614_v7 = vld [vmem:[#allocation7 + $0x24] sm:$0xf] }
  0x5c   : > { %4735 = vmatpush.bf16.msra.mxu1 %v4071_v49  ;;  %4741 = vmatpush.bf16.msra.mxu2 %v4091_v3  ;;  %v4075_v10 = vor.u32 %v4614_v7, %v4072_v8  ;;  %v4238_v7 = vld [vmem:[#allocation8 + $0xf0] sm:$0xf]  ;;  %v4659_v8 = vld [vmem:[#allocation8 + $0x104] sm:$0xf0] }
  0x5e   : > { %465 = vmatmul.bf16.vlgmr.msra.gmra.mxu0 %v381_v12  ;;  %475 = vmatmul.bf16.vlgmr.msra.gmra.mxu3 %v383_v13  ;;  %v4064_v12 = vld [vmem:[#allocation7 + $0x18] sm:$0xf0]  ;;  %v5665_v13 = vld [vmem:[%s8403_s2] ss:$0 sm:$0xff] }
  0x5f   : > { %632 = vmatpush.bf16.msrb.mxu0 %v4111_v29  ;;  %v4067_v14 = vor.u32 %v4612_v11, %v4064_v12  ;;  %v4432_v11 = vld [vmem:[#allocation8 + $0x288] sm:$0xf0]  ;;  %v4656_v12 = vld [vmem:[#allocation8 + $0xf4] sm:$0xf] }
  0x60   : > { %4736 = vmatpush.bf16.msra.mxu1 %v4063_v52  ;;  %4742 = vmatpush.bf16.msra.mxu2 %v4083_v6 }
  0x63   : > { %633 = vmatpush.bf16.msrb.mxu0 %v4103_v31 }
  0x64   : > { %4737 = vmatpush.bf16.msra.mxu1 %v4055_v55  ;;  %4743 = vmatpush.bf16.msra.mxu2 %v4075_v10 }
  0x67   : > { %634 = vmatpush.bf16.msrb.mxu0 %v4095_v34 }
  0x68   : > { %4744 = vmatpush.bf16.msra.mxu2 %v4067_v14 }
  0x6b   : > { %635 = vmatpush.bf16.msrb.mxu0 %v4087_v39 }
  0x6c   : > { %4745 = vmatpush.bf16.msra.mxu2 %v4059_v20 }
  0x6e   : > { %470 = vmatmul.bf16.gmra.mxu0 %v382_v18  ;;  %480 = vmatmul.bf16.gmra.mxu3 %v384_v19 }
  0x6f   : > { %636 = vmatpush.bf16.msrb.mxu0 %v4079_v43 }
  0x70   : > { %1515 = vmatpush.bf16.msrb.mxu2 %v4483_v50 }
  0x73   : > { %637 = vmatpush.bf16.msrb.mxu0 %v4071_v49 }
  0x77   : > { %638 = vmatpush.bf16.msrb.mxu0 %v4063_v52  ;;  %v4288_v52 = vld [vmem:[#allocation8 + $0x168] sm:$0xf0] }
  0x78   : > { %v4291_v54 = vor.u32 %v4668_v51, %v4288_v52  ;;  %v4644_v52 = vld [vmem:[#allocation8 + $0x94] sm:$0xf] }
  0x7a   : > { %1466 = vmatpush.bf16.msrb.mxu1 %v4291_v54 }
  0x7b   : > { %639 = vmatpush.bf16.msrb.mxu0 %v4055_v55  ;;  %v4262_v55 = vld [vmem:[#allocation8 + $0x120] sm:$0xf] }
  0x7c   : > { %v4263_v57 = vor.u32 %v4665_v56, %v4262_v55  ;;  %v4166_v55 = vld [vmem:[#allocation8 + $0x60] sm:$0xf]  ;;  %v4641_v56 = vld [vmem:[#allocation8 + $0x74] sm:$0xf0] }
  0x7e   : > { %485 = vmatmul.bf16.gmra.mxu3 %v385_v22 }
  0x7f   : > { %681 = vmatpush.bf16.msra.mxu0 %v4115_v58  ;;  %v4710_v58 = vld [vmem:[#allocation8 + $0x2a4] sm:$0xf] }
  0x83   : > { %682 = vmatpush.bf16.msra.mxu0 %v4107_v61  ;;  %v4459_v61 = vor.u32 %v4710_v58, %v4456_v59  ;;  %v4167_v58 = vor.u32 %v4641_v56, %v4166_v55  ;;  %v4168_v59 = vld [vmem:[#allocation8 + $0x78] sm:$0xf0] }
  0x85   : > { %1516 = vmatpush.bf16.msrb.mxu2 %v4459_v61  ;;  %v4142_v61 = vld [vmem:[#allocation8 + $0x30] sm:$0xf] }
  0x87   : > { %683 = vmatpush.bf16.msra.mxu0 %v4099_v0 }
  0x8b   : > { %684 = vmatpush.bf16.msra.mxu0 %v4091_v3  ;;  %v4264_v3 = vld [vmem:[#allocation8 + $0x138] sm:$0xf0] }
  0x8c   : > { %v4267_v4 = vor.u32 %v4662_v2, %v4264_v3  ;;  %v4118_v2 = vld [vmem:[#allocation8] sm:$0xf]  ;;  %v4629_v3 = vld [vmem:[#allocation8 + $0x14] sm:$0xf0] }
  0x8e   : > { %490 = vmatmul.bf16.gmra.mxu3 %v386_v25  ;;  %1467 = vmatpush.bf16.msrb.mxu1 %v4267_v4  ;;  %v4626_v4 = vld [vmem:[#allocation8 + $0x4] sm:$0xf] }
  0x8f   : > { %685 = vmatpush.bf16.msra.mxu0 %v4083_v6 }
  0x93   : > { %686 = vmatpush.bf16.msra.mxu0 %v4075_v10  ;;  %v4704_v10 = vld [vmem:[#allocation8 + $0x274] sm:$0xf] }
  0x94   : > { %v4435_v15 = vor.u32 %v4704_v10, %v4432_v11  ;;  %v4478_v10 = vld [vmem:[#allocation8 + $0x2d0] sm:$0xf] }
  0x96   : > { %1517 = vmatpush.bf16.msrb.mxu2 %v4435_v15  ;;  %v4454_v15 = vld [vmem:[#allocation8 + $0x2a0] sm:$0xf] }
  0x97   : > { %687 = vmatpush.bf16.msra.mxu0 %v4067_v14 }
  0x9b   : > { %688 = vmatpush.bf16.msra.mxu0 %v4059_v20 }
  0x9e   : > { %495 = vmatmul.bf16.gmra.mxu3 %v387_v40 }
  0xae   : > { %500 = vmatmul.bf16.gmra.mxu3 %v388_v46  ;;  %v4287_v46 = vor.u32 %v4671_v45, %v4286_v44 }
  0xb0   : > { %1368 = vmatpush.bf16.msrb.mxu3 %v4287_v46 }
  0xb4   : > { %1369 = vmatpush.bf16.msrb.mxu3 %v4263_v57  ;;  %v4638_v57 = vld [vmem:[#allocation8 + $0x64] sm:$0xf] }
  0xdb   : > { %v466_v9 = vpop.f32.mrf.mxu0 }
  0xdc   : > { %v467_v18 = vadd.f32 %v5665_v13, %v466_v9  ;;  %v4239_v9 = vor.u32 %v4659_v8, %v4238_v7  ;;  %v4686_v8 = vld [vmem:[#allocation8 + $0x1e4] sm:$0xf] }
  0xde   : > { %v506_v22 = vmax.f32 %v467_v18, 0.0  ;;  %1370 = vmatpush.bf16.msrb.mxu3 %v4239_v9  ;;  %v4360_v9 = vld [vmem:[#allocation8 + $0x1f8] sm:$0xf0] }
  0xdf   : > { %v4363_v11 = vor.u32 %v4686_v8, %v4360_v9  ;;  %v4270_v8 = vld [vmem:[#allocation8 + $0x128] sm:$0xf]  ;;  %v4666_v9 = vld [vmem:[#allocation8 + $0x13c] sm:$0xf0] }
  0xe1   : > { %v476_v17 = vpop.f32.mrf.mxu3 }
  0xe2   : > { %v477_v24 = vadd.f32 %v5665_v13, %v476_v17  ;;  %v4243_v17 = vor.u32 %v4656_v12, %v4240_v16  ;;  %v4719_v12 = vld [vmem:[#allocation8 + $0x2e4] sm:$0xf0]  ;;  %v4713_v16 = vld [vmem:[#allocation8 + $0x2b4] sm:$0xf0] }
  0xe3   : > { %v468_v19 = vpop.f32.mrf.mxu0 }
  0xe4   : > { %v469_v21 = vadd.f32 %v5665_v13, %v468_v19  ;;  %v510_v27 = vmax.f32 %v477_v24, 0.0  ;;  %1468 = vmatpush.bf16.msrb.mxu1 %v4243_v17  ;;  %v4455_v17 = vor.u32 %v4713_v16, %v4454_v15  ;;  %v4464_v15 = vld [vmem:[#allocation8 + $0x2c0] sm:$0xf0]  ;;  %v4663_v16 = vld [vmem:[#allocation8 + $0x12c] sm:$0xf] }
  0xe6   : > { %v507_v23 = vmax.f32 %v469_v21, 0.0 }
  0xe8   : > { %v522_v25 = vpack.c.bf16 %v507_v23, %v506_v22  ;;  %v4214_v22 = vld [vmem:[#allocation8 + $0xc0] sm:$0xf]  ;;  %v4653_v23 = vld [vmem:[#allocation8 + $0xd4] sm:$0xf0] }
  0xe9   : > { %v478_v26 = vpop.f32.mrf.mxu3  ;;  %v4215_v24 = vor.u32 %v4653_v23, %v4214_v22  ;;  %v4707_v22 = vld [vmem:[#allocation8 + $0x284] sm:$0xf0] }
  0xea   : > { %640 = vmatmul.bf16.vlgmr.msrb.gmra.mxu0 %v522_v25  ;;  %v479_v28 = vadd.f32 %v5665_v13, %v478_v26  ;;  %v4698_v26 = vld [vmem:[#allocation8 + $0x244] sm:$0xf] }
  0xeb   : > { %v471_v29 = vpop.f32.mrf.mxu0  ;;  %1371 = vmatpush.bf16.msrb.mxu3 %v4215_v24  ;;  %v4406_v24 = vld [vmem:[#allocation8 + $0x240] sm:$0xf] }
  0xec   : > { %v511_v30 = vmax.f32 %v479_v28, 0.0  ;;  %v472_v33 = vadd.f32 %v5665_v13, %v471_v29  ;;  %v4650_v28 = vld [vmem:[#allocation8 + $0xc4] sm:$0xf] }
  0xee   : > { %v524_v31 = vpack.c.bf16 %v511_v30, %v510_v27  ;;  %v508_v36 = vmax.f32 %v472_v33, 0.0  ;;  %v4408_v27 = vld [vmem:[#allocation8 + $0x258] sm:$0xf0]  ;;  %v4647_v33 = vld [vmem:[#allocation8 + $0xa4] sm:$0xf0] }
  0xef   : > { %v4411_v30 = vor.u32 %v4698_v26, %v4408_v27  ;;  %v4382_v27 = vld [vmem:[#allocation8 + $0x210] sm:$0xf] }
  0xf0   : > { %650 = vmatmul.bf16.vlgmr.msra.gmra.mxu1 %v524_v31  ;;  %699 = vmatmul.bf16.vlgmr.msra.gmra.mxu2 %v524_v31  ;;  %v4216_v31 = vld [vmem:[#allocation8 + $0xd8] sm:$0xf0] }
  0xf1   : > { %v481_v32 = vpop.f32.mrf.mxu3  ;;  %1518 = vmatpush.bf16.msrb.mxu2 %v4411_v30  ;;  %v5686_v30 = vld [vmem:[%s8405_s4] sm:$0x3] }
  0xf2   : > { %v482_v38 = vadd.f32 %v5665_v13, %v481_v32  ;;  %v4190_v32 = vld [vmem:[#allocation8 + $0x90] sm:$0xf] }
  0xf3   : > { %v473_v34 = vpop.f32.mrf.mxu0 }
  0xf4   : > { %v474_v35 = vadd.f32 %v5665_v13, %v473_v34  ;;  %v512_v41 = vmax.f32 %v482_v38, 0.0  ;;  %v4219_v34 = vor.u32 %v4650_v28, %v4216_v31  ;;  %v4695_v28 = vld [vmem:[#allocation8 + $0x224] sm:$0xf0] }
  0xf6   : > { %v509_v37 = vmax.f32 %v474_v35, 0.0  ;;  %v4191_v35 = vor.u32 %v4647_v33, %v4190_v32  ;;  %1469 = vmatpush.bf16.msrb.mxu1 %v4219_v34  ;;  %v4358_v32 = vld [vmem:[#allocation8 + $0x1e0] sm:$0xf]  ;;  %v4689_v33 = vld [vmem:[#allocation8 + $0x1f4] sm:$0xf0] }
  0xf7   : > { %v4359_v34 = vor.u32 %v4689_v33, %v4358_v32 }
  0xf8   : > { %v523_v39 = vpack.c.bf16 %v509_v37, %v508_v36  ;;  %v4692_v36 = vld [vmem:[#allocation8 + $0x214] sm:$0xf]  ;;  %v4384_v37 = vld [vmem:[#allocation8 + $0x228] sm:$0xf0]  ;;  %1372 = vmatpush.bf16.msrb.mxu3 %v4191_v35  ;;  %v5689_v35 = vperm.slane %v5686_v30, 0 }
  0xf9   : > { %v483_v40 = vpop.f32.mrf.mxu3  ;;  %v4387_v38 = vor.u32 %v4692_v36, %v4384_v37  ;;  %v4674_v36 = vld [vmem:[#allocation8 + $0x184] sm:$0xf]  ;;  %v4312_v37 = vld [vmem:[#allocation8 + $0x198] sm:$0xf0] }
  0xfa   : > { %645 = vmatmul.bf16.gmra.mxu0 %v523_v39  ;;  %v484_v42 = vadd.f32 %v5665_v13, %v483_v40 }
  0xfb   : > { %1519 = vmatpush.bf16.msrb.mxu2 %v4387_v38  ;;  %v4315_v38 = vor.u32 %v4674_v36, %v4312_v37 }
  0xfc   : > { %v513_v43 = vmax.f32 %v484_v42, 0.0  ;;  %1373 = vmatpush.bf16.msrb.mxu3 %v4167_v58  ;;  %v4488_v58 = vld [vmem:[#allocation8 + $0x2f0] sm:$0xf0] }
  0xfe   : > { %v525_v49 = vpack.c.bf16 %v513_v43, %v512_v41 }
  0xff   : > { %1520 = vmatpush.bf16.msrb.mxu2 %v4363_v11 }
 0x100   : > { %655 = vmatmul.bf16.gmra.mxu1 %v525_v49  ;;  %704 = vmatmul.bf16.gmra.mxu2 %v525_v49 }
 0x101   : > { %v486_v53 = vpop.f32.mrf.mxu3 }
 0x102   : > { %v487_v60 = vadd.f32 %v5665_v13, %v486_v53  ;;  %v4192_v53 = vld [vmem:[#allocation8 + $0xa8] sm:$0xf0] }
 0x103   : > { %v4195_v54 = vor.u32 %v4644_v52, %v4192_v53  ;;  %v4294_v52 = vld [vmem:[#allocation8 + $0x158] sm:$0xf]  ;;  %v4672_v53 = vld [vmem:[#allocation8 + $0x16c] sm:$0xf0] }
 0x104   : > { %v514_v63 = vmax.f32 %v487_v60, 0.0  ;;  %v4171_v60 = vor.u32 %v4638_v57, %v4168_v59  ;;  %v4295_v55 = vor.u32 %v4672_v53, %v4294_v52  ;;  %v4717_v57 = vld [vmem:[#allocation8 + $0x2dc] sm:$0xf]  ;;  %v4222_v52 = vld [vmem:[#allocation8 + $0xc8] sm:$0xf] }
 0x105   : > { %1470 = vmatpush.bf16.msrb.mxu1 %v4195_v54  ;;  %v4491_v59 = vor.u32 %v4717_v57, %v4488_v58  ;;  %v4654_v53 = vld [vmem:[#allocation8 + $0xdc] sm:$0xf0] }
 0x106   : > { %v4223_v57 = vor.u32 %v4654_v53, %v4222_v52 }
 0x109   : > { %v488_v62 = vpop.f32.mrf.mxu3  ;;  %1471 = vmatpush.bf16.msrb.mxu1 %v4171_v60  ;;  %v4669_v60 = vld [vmem:[#allocation8 + $0x15c] sm:$0xf] }
 0x10a   : > { %689 = vmatmul.bf16.vlgmr.msra.gmra.mxu0 %v522_v25  ;;  %v489_v0 = vadd.f32 %v5665_v13, %v488_v62  ;;  %v4635_v62 = vld [vmem:[#allocation8 + $0x44] sm:$0xf0] }
 0x10c   : > { %v515_v1 = vmax.f32 %v489_v0, 0.0  ;;  %v4144_v0 = vld [vmem:[#allocation8 + $0x48] sm:$0xf0] }
 0x10e   : > { %v526_v5 = vpack.c.bf16 %v515_v1, %v514_v63  ;;  %v4632_v63 = vld [vmem:[#allocation8 + $0x34] sm:$0xf] }
 0x10f   : > { %v4147_v1 = vor.u32 %v4632_v63, %v4144_v0  ;;  %v4486_v63 = vld [vmem:[#allocation8 + $0x2d8] sm:$0xf] }
 0x110   : > { %660 = vmatmul.bf16.gmra.mxu1 %v526_v5  ;;  %709 = vmatmul.bf16.gmra.mxu2 %v526_v5  ;;  %v4119_v5 = vor.u32 %v4629_v3, %v4118_v2 }
 0x111   : > { %v491_v6 = vpop.f32.mrf.mxu3  ;;  %1472 = vmatpush.bf16.msrb.mxu1 %v4147_v1 }
 0x112   : > { %v492_v14 = vadd.f32 %v5665_v13, %v491_v6  ;;  %v4120_v6 = vld [vmem:[#allocation8 + $0x18] sm:$0xf0] }
 0x113   : > { %v4123_v7 = vor.u32 %v4626_v4, %v4120_v6 }
 0x114   : > { %v516_v19 = vmax.f32 %v492_v14, 0.0  ;;  %v4479_v14 = vor.u32 %v4719_v12, %v4478_v10  ;;  %v4271_v10 = vor.u32 %v4666_v9, %v4270_v8  ;;  %v4651_v8 = vld [vmem:[#allocation8 + $0xcc] sm:$0xf] }
 0x115   : > { %1473 = vmatpush.bf16.msrb.mxu1 %v4123_v7 }
 0x116   : > { %1417 = vmatpush.bf16.msrb.mxu0 %v4479_v14  ;;  %v4711_v14 = vld [vmem:[#allocation8 + $0x2ac] sm:$0xf] }
 0x119   : > { %v493_v18 = vpop.f32.mrf.mxu3 }
 0x11a   : > { %694 = vmatmul.bf16.gmra.mxu0 %v523_v39  ;;  %v494_v20 = vadd.f32 %v5665_v13, %v493_v18  ;;  %v4680_v18 = vld [vmem:[#allocation8 + $0x1b4] sm:$0xf] }
 0x11b   : > { %1418 = vmatpush.bf16.msrb.mxu0 %v4455_v17  ;;  %v5706_v17 = vperm.slane %v5686_v30, 1 }
 0x11c   : > { %v517_v21 = vmax.f32 %v494_v20, 0.0 }
 0x11e   : > { %v527_v25 = vpack.c.bf16 %v517_v21, %v516_v19  ;;  %v4336_v19 = vld [vmem:[#allocation8 + $0x1c8] sm:$0xf0]  ;;  %v4430_v21 = vld [vmem:[#allocation8 + $0x270] sm:$0xf] }
 0x11f   : > { %v4339_v20 = vor.u32 %v4680_v18, %v4336_v19  ;;  %v4431_v23 = vor.u32 %v4707_v22, %v4430_v21  ;;  %v4467_v18 = vor.u32 %v4711_v14, %v4464_v15  ;;  %v4272_v19 = vld [vmem:[#allocation8 + $0x140] sm:$0xf0]  ;;  %v4714_v22 = vld [vmem:[#allocation8 + $0x2bc] sm:$0xf0] }
 0x120   : > { %665 = vmatmul.bf16.gmra.mxu1 %v527_v25  ;;  %714 = vmatmul.bf16.gmra.mxu2 %v527_v25  ;;  %v4701_v25 = vld [vmem:[#allocation8 + $0x254] sm:$0xf0]  ;;  %v4275_v21 = vor.u32 %v4663_v16, %v4272_v19  ;;  %v4702_v15 = vld [vmem:[#allocation8 + $0x25c] sm:$0xf0] }
 0x121   : > { %v496_v29 = vpop.f32.mrf.mxu3  ;;  %1521 = vmatpush.bf16.msrb.mxu2 %v4339_v20  ;;  %1419 = vmatpush.bf16.msrb.mxu0 %v4431_v23  ;;  %v4407_v26 = vor.u32 %v4701_v25, %v4406_v24  ;;  %v4462_v20 = vld [vmem:[#allocation8 + $0x2a8] sm:$0xf]  ;;  %v4246_v23 = vld [vmem:[#allocation8 + $0xf8] sm:$0xf]  ;;  %v4660_v24 = vld [vmem:[#allocation8 + $0x10c] sm:$0xf0] }
 0x122   : > { %v497_v39 = vadd.f32 %v5665_v13, %v496_v29  ;;  %v4383_v29 = vor.u32 %v4695_v28, %v4382_v27  ;;  %v4463_v27 = vor.u32 %v4714_v22, %v4462_v20  ;;  %v4247_v28 = vor.u32 %v4660_v24, %v4246_v23  ;;  %v4198_v16 = vld [vmem:[#allocation8 + $0x98] sm:$0xf] }
 0x124   : > { %v518_v41 = vmax.f32 %v497_v39, 0.0  ;;  %v4334_v39 = vld [vmem:[#allocation8 + $0x1b0] sm:$0xf] }
 0x125   : > { %1420 = vmatpush.bf16.msrb.mxu0 %v4407_v26  ;;  %1522 = vmatpush.bf16.msrb.mxu2 %v4315_v38 }
 0x129   : > { %v498_v40 = vpop.f32.mrf.mxu3  ;;  %1421 = vmatpush.bf16.msrb.mxu0 %v4383_v29  ;;  %1711 = vmatpush.bf16.msra.mxu2 %v4491_v59 }
 0x12a   : > { %v499_v42 = vadd.f32 %v5665_v13, %v498_v40  ;;  %v4683_v40 = vld [vmem:[#allocation8 + $0x1c4] sm:$0xf0] }
 0x12c   : > { %v519_v43 = vmax.f32 %v499_v42, 0.0  ;;  %v4335_v42 = vor.u32 %v4683_v40, %v4334_v39 }
 0x12d   : > { %1422 = vmatpush.bf16.msrb.mxu0 %v4359_v34  ;;  %1712 = vmatpush.bf16.msra.mxu2 %v4467_v18  ;;  %v4648_v18 = vld [vmem:[#allocation8 + $0xac] sm:$0xf0] }
 0x12e   : > { %v528_v44 = vpack.c.bf16 %v519_v43, %v518_v41  ;;  %v4199_v22 = vor.u32 %v4648_v18, %v4198_v16  ;;  %v4633_v16 = vld [vmem:[#allocation8 + $0x3c] sm:$0xf]  ;;  %v4152_v18 = vld [vmem:[#allocation8 + $0x50] sm:$0xf0] }
 0x130   : > { %670 = vmatmul.bf16.gmra.mxu1 %v528_v44  ;;  %719 = vmatmul.bf16.gmra.mxu2 %v528_v44 }
 0x131   : > { %v501_v45 = vpop.f32.mrf.mxu3  ;;  %1423 = vmatpush.bf16.msrb.mxu0 %v4335_v42 }
 0x132   : > { %v502_v46 = vadd.f32 %v5665_v13, %v501_v45 }
 0x134   : > { %v520_v48 = vmax.f32 %v502_v46, 0.0  ;;  %v4310_v46 = vld [vmem:[#allocation8 + $0x180] sm:$0xf] }
 0x139   : > { %v503_v47 = vpop.f32.mrf.mxu3 }
 0x13a   : > { %v504_v49 = vadd.f32 %v5665_v13, %v503_v47  ;;  %v4143_v13 = vor.u32 %v4635_v62, %v4142_v61  ;;  %v4677_v47 = vld [vmem:[#allocation8 + $0x194] sm:$0xf0]  ;;  %v4296_v61 = vld [vmem:[#allocation8 + $0x170] sm:$0xf0] }
 0x13b   : > { %v4299_v62 = vor.u32 %v4669_v60, %v4296_v61 }
 0x13c   : > { %v521_v50 = vmax.f32 %v504_v49, 0.0  ;;  %1374 = vmatpush.bf16.msrb.mxu3 %v4143_v13  ;;  %v4720_v13 = vld [vmem:[#allocation8 + $0x2ec] sm:$0xf0] }
 0x13d   : > { %v4487_v0 = vor.u32 %v4720_v13, %v4486_v63  ;;  %1662 = vmatpush.bf16.msra.mxu1 %v4299_v62 }
 0x13e   : > { %v529_v51 = vpack.c.bf16 %v521_v50, %v520_v48  ;;  %v4311_v48 = vor.u32 %v4677_v47, %v4310_v46  ;;  %v4248_v47 = vld [vmem:[#allocation8 + $0x110] sm:$0xf0] }
 0x140   : > { %675 = vmatmul.bf16.gmra.mxu1 %v529_v51  ;;  %724 = vmatmul.bf16.gmra.mxu2 %v529_v51 }
 0x141   : > { %1375 = vmatpush.bf16.msrb.mxu3 %v4119_v5  ;;  %1424 = vmatpush.bf16.msrb.mxu0 %v4311_v48  ;;  %v4438_v48 = vld [vmem:[#allocation8 + $0x278] sm:$0xf] }
 0x142   : > { %1663 = vmatpush.bf16.msra.mxu1 %v4275_v21 }
 0x145   : > { %1564 = vmatpush.bf16.msra.mxu3 %v4295_v55  ;;  %1613 = vmatpush.bf16.msra.mxu0 %v4487_v0 }
 0x149   : > { %1565 = vmatpush.bf16.msra.mxu3 %v4271_v10  ;;  %1614 = vmatpush.bf16.msra.mxu0 %v4463_v27  ;;  %v4224_v10 = vld [vmem:[#allocation8 + $0xe0] sm:$0xf0] }
 0x14a   : > { %v4227_v14 = vor.u32 %v4651_v8, %v4224_v10  ;;  %v4690_v8 = vld [vmem:[#allocation8 + $0x1fc] sm:$0xf0]  ;;  %v4636_v10 = vld [vmem:[#allocation8 + $0x4c] sm:$0xf0] }
 0x14d   : > { %1566 = vmatpush.bf16.msra.mxu3 %v4247_v28 }
 0x151   : > { %1567 = vmatpush.bf16.msra.mxu3 %v4223_v57 }
 0x155   : > { %1568 = vmatpush.bf16.msra.mxu3 %v4199_v22 }
 0x167   : > { %v641_v31 = vpop.f32.mrf.mxu0 }
 0x168   : > { %v642_v43 = vadd.f32 %v641_v31, %v5689_v35 }
 0x16a   : > { %v730_v49 = vmax.f32 %v642_v43, 0.0  ;;  %v4705_v43 = vld [vmem:[#allocation8 + $0x27c] sm:$0xf] }
 0x16d   : > { %v651_v41 = vpop.f32.mrf.mxu1 }
 0x16e   : > { %v652_v25 = vadd.f32 %v651_v41, %v5689_v35 }
 0x16f   : > { %v643_v44 = vpop.f32.mrf.mxu0 }
 0x170   : > { %v644_v45 = vadd.f32 %v643_v44, %v5689_v35  ;;  %v738_v30 = vmax.f32 %v652_v25, 0.0  ;;  %v4440_v44 = vld [vmem:[#allocation8 + $0x290] sm:$0xf0] }
 0x171   : > { %v4443_v46 = vor.u32 %v4705_v43, %v4440_v44  ;;  %v4696_v44 = vld [vmem:[#allocation8 + $0x22c] sm:$0xf0] }
 0x172   : > { %v732_v50 = vmax.f32 %v644_v45, 0.0  ;;  %v4657_v45 = vld [vmem:[#allocation8 + $0xfc] sm:$0xf] }
 0x173   : > { %v5710_v29 = vpop.f32.mrf.mxu2  ;;  %1713 = vmatpush.bf16.msra.mxu2 %v4443_v46  ;;  %v4642_v46 = vld [vmem:[#allocation8 + $0x7c] sm:$0xf0] }
 0x174   : > { %v5693_v51 = vpack.c.bf16 %v732_v50, %v730_v49  ;;  %v4251_v49 = vor.u32 %v4657_v45, %v4248_v47  ;;  %v4708_v50 = vld [vmem:[#allocation8 + $0x28c] sm:$0xf0]  ;;  %v701_v23 = vadd.f32 %v5710_v29, %v5706_v17  ;;  %v4693_v29 = vld [vmem:[#allocation8 + $0x21c] sm:$0xf]  ;;  %v4174_v45 = vld [vmem:[#allocation8 + $0x68] sm:$0xf] }
 0x175   : > { %v653_v54 = vpop.f32.mrf.mxu1 }
 0x176   : > { %1376 = vmatmul.bf16.vlgmr.msrb.gmra.mxu3 %v5693_v51  ;;  %1474 = vmatmul.bf16.vlgmr.msrb.gmra.mxu1 %v5693_v51  ;;  %v654_v26 = vadd.f32 %v653_v54, %v5689_v35  ;;  %v739_v28 = vmax.f32 %v701_v23, 0.0 }
 0x177   : > { %v646_v56 = vpop.f32.mrf.mxu0  ;;  %1664 = vmatpush.bf16.msra.mxu1 %v4251_v49 }
 0x178   : > { %v647_v2 = vadd.f32 %v646_v56, %v5689_v35  ;;  %v740_v32 = vmax.f32 %v654_v26, 0.0  ;;  %v4439_v56 = vor.u32 %v4708_v50, %v4438_v48  ;;  %v4175_v50 = vor.u32 %v4642_v46, %v4174_v45 }
 0x17a   : > { %v734_v5 = vmax.f32 %v647_v2, 0.0  ;;  %v5714_v38 = vpack.c.bf16 %v740_v32, %v738_v30  ;;  %1615 = vmatpush.bf16.msra.mxu0 %v4439_v56  ;;  %1569 = vmatpush.bf16.msra.mxu3 %v4175_v50  ;;  %v4342_v50 = vld [vmem:[#allocation8 + $0x1b8] sm:$0xf] }
 0x17b   : > { %v702_v41 = vpop.f32.mrf.mxu2  ;;  %1665 = vmatpush.bf16.msra.mxu1 %v4227_v14 }
 0x17c   : > { %v703_v24 = vadd.f32 %v702_v41, %v5706_v17  ;;  %v4390_v41 = vld [vmem:[#allocation8 + $0x218] sm:$0xf] }
 0x17d   : > { %v5697_v1 = vpop.f32.mrf.mxu1  ;;  %v4391_v49 = vor.u32 %v4696_v44, %v4390_v41 }
 0x17e   : > { %v657_v54 = vadd.f32 %v5697_v1, %v5689_v35  ;;  %v741_v30 = vmax.f32 %v703_v24, 0.0 }
 0x17f   : > { %v648_v3 = vpop.f32.mrf.mxu0 }
 0x180   : > { %v649_v4 = vadd.f32 %v648_v3, %v5689_v35  ;;  %v742_v59 = vmax.f32 %v657_v54, 0.0 }
 0x182   : > { %v736_v6 = vmax.f32 %v649_v4, 0.0 }
 0x183   : > { %v705_v63 = vpop.f32.mrf.mxu2 }
 0x184   : > { %v5701_v7 = vpack.c.bf16 %v736_v6, %v734_v5  ;;  %v4699_v5 = vld [vmem:[#allocation8 + $0x24c] sm:$0xf]  ;;  %v4416_v6 = vld [vmem:[#allocation8 + $0x260] sm:$0xf0]  ;;  %v706_v52 = vadd.f32 %v705_v63, %v5706_v17 }
 0x185   : > { %v658_v12 = vpop.f32.mrf.mxu1  ;;  %v4419_v9 = vor.u32 %v4699_v5, %v4416_v6  ;;  %v4687_v63 = vld [vmem:[#allocation8 + $0x1ec] sm:$0xf]  ;;  %v4366_v5 = vld [vmem:[#allocation8 + $0x1e8] sm:$0xf] }
 0x186   : > { %1381 = vmatmul.bf16.gmra.mxu3 %v5701_v7  ;;  %1479 = vmatmul.bf16.gmra.mxu1 %v5701_v7  ;;  %v659_v55 = vadd.f32 %v658_v12, %v5689_v35  ;;  %v743_v57 = vmax.f32 %v706_v52, 0.0  ;;  %v4367_v14 = vor.u32 %v4690_v8, %v4366_v5  ;;  %v4684_v52 = vld [vmem:[#allocation8 + $0x1cc] sm:$0xf0]  ;;  %v4678_v5 = vld [vmem:[#allocation8 + $0x19c] sm:$0xf0] }
 0x187   : > { %v690_v11 = vpop.f32.mrf.mxu0  ;;  %1714 = vmatpush.bf16.msra.mxu2 %v4419_v9  ;;  %v4150_v9 = vld [vmem:[#allocation8 + $0x38] sm:$0xf] }
 0x188   : > { %v691_v31 = vadd.f32 %v690_v11, %v5706_v17  ;;  %v744_v61 = vmax.f32 %v659_v55, 0.0  ;;  %v4414_v11 = vld [vmem:[#allocation8 + $0x248] sm:$0xf] }
 0x189   : > { %v4415_v21 = vor.u32 %v4702_v15, %v4414_v11  ;;  %v4151_v15 = vor.u32 %v4636_v10, %v4150_v9 }
 0x18a   : > { %v731_v37 = vmax.f32 %v691_v31, 0.0  ;;  %v5727_v2 = vpack.c.bf16 %v744_v61, %v742_v59 }
 0x18b   : > { %v707_v12 = vpop.f32.mrf.mxu2  ;;  %1616 = vmatpush.bf16.msra.mxu0 %v4415_v21  ;;  %1570 = vmatpush.bf16.msra.mxu3 %v4151_v15 }
 0x18c   : > { %v708_v53 = vadd.f32 %v707_v12, %v5706_v17 }
 0x18d   : > { %v661_v36 = vpop.f32.mrf.mxu1 }
 0x18e   : > { %v662_v19 = vadd.f32 %v661_v36, %v5689_v35  ;;  %v4645_v36 = vld [vmem:[#allocation8 + $0x9c] sm:$0xf] }
 0x18f   : > { %v692_v33 = vpop.f32.mrf.mxu0  ;;  %1617 = vmatpush.bf16.msra.mxu0 %v4391_v49 }
 0x190   : > { %v693_v34 = vadd.f32 %v692_v33, %v5706_v17  ;;  %v746_v25 = vmax.f32 %v662_v19, 0.0  ;;  %v5742_v33 = vpack.c.bf16 %v741_v30, %v739_v28  ;;  %v4155_v19 = vor.u32 %v4633_v16, %v4152_v18  ;;  %v4126_v28 = vld [vmem:[#allocation8 + $0x8] sm:$0xf]  ;;  %v4630_v30 = vld [vmem:[#allocation8 + $0x1c] sm:$0xf0] }
 0x192   : > { %v733_v39 = vmax.f32 %v693_v34, 0.0  ;;  %v4392_v34 = vld [vmem:[#allocation8 + $0x230] sm:$0xf0] }
 0x193   : > { %v710_v32 = vpop.f32.mrf.mxu2  ;;  %1618 = vmatpush.bf16.msra.mxu0 %v4367_v14 }
 0x194   : > { %v5716_v40 = vpack.c.bf16 %v733_v39, %v731_v37  ;;  %v4395_v37 = vor.u32 %v4693_v29, %v4392_v34  ;;  %v4200_v39 = vld [vmem:[#allocation8 + $0xb0] sm:$0xf0]  ;;  %v4627_v29 = vld [vmem:[#allocation8 + $0xc] sm:$0xf] }
 0x195   : > { %v663_v58 = vpop.f32.mrf.mxu1  ;;  %v4203_v43 = vor.u32 %v4645_v36, %v4200_v39  ;;  %v4127_v36 = vor.u32 %v4630_v30, %v4126_v28 }
 0x196   : > { %1386 = vmatmul.bf16.gmra.mxu3 %v5714_v38  ;;  %1425 = vmatmul.bf16.vlgmr.msrb.gmra.mxu0 %v5716_v40  ;;  %v664_v20 = vadd.f32 %v663_v58, %v5689_v35  ;;  %v745_v58 = vmax.f32 %v708_v53, 0.0  ;;  %v4343_v53 = vor.u32 %v4684_v52, %v4342_v50  ;;  %v4670_v50 = vld [vmem:[#allocation8 + $0x164] sm:$0xf]  ;;  %v4304_v52 = vld [vmem:[#allocation8 + $0x178] sm:$0xf0] }
 0x197   : > { %1484 = vmatmul.bf16.gmra.mxu1 %v5714_v38  ;;  %1523 = vmatmul.bf16.vlgmr.msrb.gmra.mxu2 %v5716_v40  ;;  %v695_v42 = vpop.f32.mrf.mxu0 }
 0x198   : > { %v696_v60 = vadd.f32 %v695_v42, %v5706_v17  ;;  %v748_v26 = vmax.f32 %v664_v20, 0.0  ;;  %1715 = vmatpush.bf16.msra.mxu2 %v4395_v37  ;;  %1666 = vmatpush.bf16.msra.mxu1 %v4203_v43  ;;  %v5754_v61 = vpack.c.bf16 %v745_v58, %v743_v57  ;;  %v711_v20 = vadd.f32 %v710_v32, %v5706_v17  ;;  %v4128_v37 = vld [vmem:[#allocation8 + $0x20] sm:$0xf0]  ;;  %v4344_v43 = vld [vmem:[#allocation8 + $0x1d0] sm:$0xf0] }
 0x199   : > { %v4131_v39 = vor.u32 %v4627_v29, %v4128_v37  ;;  %1571 = vmatpush.bf16.msra.mxu3 %v4127_v36  ;;  %1619 = vmatpush.bf16.msra.mxu0 %v4343_v53  ;;  %v4302_v29 = vld [vmem:[#allocation8 + $0x160] sm:$0xf]  ;;  %v4673_v36 = vld [vmem:[#allocation8 + $0x174] sm:$0xf0]  ;;  %v4718_v37 = vld [vmem:[#allocation8 + $0x2e4] sm:$0xf] }
 0x19a   : > { %v735_v0 = vmax.f32 %v696_v60, 0.0  ;;  %v5740_v31 = vpack.c.bf16 %v748_v26, %v746_v25  ;;  %v747_v25 = vmax.f32 %v711_v20, 0.0 }
 0x19b   : > { %v712_v54 = vpop.f32.mrf.mxu2 }
 0x19c   : > { %v713_v21 = vadd.f32 %v712_v54, %v5706_v17 }
 0x19d   : > { %v666_v4 = vpop.f32.mrf.mxu1 }
 0x19e   : > { %v667_v47 = vadd.f32 %v666_v4, %v5689_v35  ;;  %v4176_v4 = vld [vmem:[#allocation8 + $0x80] sm:$0xf0]  ;;  %v749_v26 = vmax.f32 %v713_v21, 0.0 }
 0x19f   : > { %v697_v62 = vpop.f32.mrf.mxu0 }
 0x1a0   : > { %v698_v13 = vadd.f32 %v697_v62, %v5706_v17  ;;  %v750_v55 = vmax.f32 %v667_v47, 0.0  ;;  %v5766_v32 = vpack.c.bf16 %v749_v26, %v747_v25 }
 0x1a2   : > { %v737_v1 = vmax.f32 %v698_v13, 0.0  ;;  %v4368_v13 = vld [vmem:[#allocation8 + $0x200] sm:$0xf0] }
 0x1a3   : > { %v715_v62 = vpop.f32.mrf.mxu2 }
 0x1a4   : > { %v5729_v3 = vpack.c.bf16 %v737_v1, %v735_v0  ;;  %v4639_v0 = vld [vmem:[#allocation8 + $0x6c] sm:$0xf]  ;;  %v4371_v1 = vor.u32 %v4687_v63, %v4368_v13 }
 0x1a5   : > { %v668_v27 = vpop.f32.mrf.mxu1  ;;  %v4179_v6 = vor.u32 %v4639_v0, %v4176_v4  ;;  %v4318_v4 = vld [vmem:[#allocation8 + $0x188] sm:$0xf] }
 0x1a6   : > { %1391 = vmatmul.bf16.gmra.mxu3 %v5727_v2  ;;  %1430 = vmatmul.bf16.gmra.mxu0 %v5729_v3  ;;  %v669_v48 = vadd.f32 %v668_v27, %v5689_v35 }
 0x1a7   : > { %1489 = vmatmul.bf16.gmra.mxu1 %v5727_v2  ;;  %1528 = vmatmul.bf16.gmra.mxu2 %v5729_v3 }
 0x1a8   : > { %v752_v56 = vmax.f32 %v669_v48, 0.0  ;;  %1716 = vmatpush.bf16.msra.mxu2 %v4371_v1  ;;  %1667 = vmatpush.bf16.msra.mxu1 %v4179_v6  ;;  %v716_v48 = vadd.f32 %v715_v62, %v5706_v17  ;;  %v4320_v62 = vld [vmem:[#allocation8 + $0x1a0] sm:$0xf0]  ;;  %v4319_v6 = vor.u32 %v4678_v5, %v4318_v4 }
 0x1aa   : > { %v5752_v59 = vpack.c.bf16 %v752_v56, %v750_v55  ;;  %v751_v56 = vmax.f32 %v716_v48, 0.0  ;;  %1620 = vmatpush.bf16.msra.mxu0 %v4319_v6 }
 0x1ab   : > { %v717_v27 = vpop.f32.mrf.mxu2 }
 0x1ac   : > { %1668 = vmatpush.bf16.msra.mxu1 %v4155_v19  ;;  %v718_v49 = vadd.f32 %v717_v27, %v5706_v17  ;;  %v874_v27 = vld [vmem:[#allocation10] sm:$0x3f] }
 0x1ad   : > { %v671_v42 = vpop.f32.mrf.mxu1 }
 0x1ae   : > { %v672_v11 = vadd.f32 %v671_v42, %v5689_v35  ;;  %v4681_v42 = vld [vmem:[#allocation8 + $0x1bc] sm:$0xf]  ;;  %v753_v57 = vmax.f32 %v718_v49, 0.0 }
 0x1af   : > { %v4347_v44 = vor.u32 %v4681_v42, %v4344_v43  ;;  %v4496_v42 = vld [vmem:[#allocation8 + $0x2f8] sm:$0xf0] }
 0x1b0   : > { %v754_v23 = vmax.f32 %v672_v11, 0.0  ;;  %1669 = vmatpush.bf16.msra.mxu1 %v4131_v39 }
 0x1b1   : > { %1717 = vmatpush.bf16.msra.mxu2 %v4347_v44 }
 0x1b3   : > { %v720_v47 = vpop.f32.mrf.mxu2 }
 0x1b4   : > { %v721_v0 = vadd.f32 %v720_v47, %v5706_v17 }
 0x1b5   : > { %v673_v60 = vpop.f32.mrf.mxu1 }
 0x1b6   : > { %1396 = vmatmul.bf16.gmra.mxu3 %v5740_v31  ;;  %1435 = vmatmul.bf16.gmra.mxu0 %v5742_v33  ;;  %v674_v12 = vadd.f32 %v673_v60, %v5689_v35  ;;  %v5778_v60 = vpack.c.bf16 %v753_v57, %v751_v56  ;;  %v755_v9 = vmax.f32 %v721_v0, 0.0  ;;  %v4494_v56 = vld [vmem:[#allocation8 + $0x2e0] sm:$0xf]  ;;  %v4721_v57 = vld [vmem:[#allocation8 + $0x2f4] sm:$0xf0] }
 0x1b7   : > { %1494 = vmatmul.bf16.gmra.mxu1 %v5740_v31  ;;  %1533 = vmatmul.bf16.gmra.mxu2 %v5742_v33 }
 0x1b8   : > { %v756_v24 = vmax.f32 %v674_v12, 0.0 }
 0x1ba   : > { %v5764_v34 = vpack.c.bf16 %v756_v24, %v754_v23 }
 0x1bb   : > { %v722_v63 = vpop.f32.mrf.mxu2 }
 0x1bc   : > { %v723_v1 = vadd.f32 %v722_v63, %v5706_v17 }
 0x1bd   : > { %v676_v22 = vpop.f32.mrf.mxu1 }
 0x1be   : > { %v677_v45 = vadd.f32 %v676_v22, %v5689_v35  ;;  %v757_v10 = vmax.f32 %v723_v1, 0.0 }
 0x1c0   : > { %v758_v54 = vmax.f32 %v677_v45, 0.0  ;;  %v5786_v12 = vpack.c.bf16 %v757_v10, %v755_v9  ;;  %v4499_v45 = vor.u32 %v4718_v37, %v4496_v42  ;;  %v4472_v42 = vld [vmem:[#allocation8 + $0x2c8] sm:$0xf0] }
 0x1c3   : > { %v725_v8 = vpop.f32.mrf.mxu2 }
 0x1c4   : > { %v726_v18 = vadd.f32 %v725_v8, %v5706_v17 }
 0x1c5   : > { %v678_v41 = vpop.f32.mrf.mxu1 }
 0x1c6   : > { %1401 = vmatmul.bf16.gmra.mxu3 %v5752_v59  ;;  %1440 = vmatmul.bf16.gmra.mxu0 %v5754_v61  ;;  %v679_v46 = vadd.f32 %v678_v41, %v5689_v35  ;;  %v4675_v35 = vld [vmem:[#allocation8 + $0x18c] sm:$0xf]  ;;  %v759_v20 = vmax.f32 %v726_v18, 0.0  ;;  %v4303_v41 = vor.u32 %v4673_v36, %v4302_v29 }
 0x1c7   : > { %1499 = vmatmul.bf16.gmra.mxu1 %v5752_v59  ;;  %1538 = vmatmul.bf16.gmra.mxu2 %v5754_v61  ;;  %v4323_v13 = vor.u32 %v4675_v35, %v4320_v62  ;;  %v4495_v62 = vor.u32 %v4721_v57, %v4494_v56 }
 0x1c8   : > { %v760_v55 = vmax.f32 %v679_v46, 0.0  ;;  %v5811_v46 = vperm.slane %v874_v27, 1  ;;  %1760 = vmatpush.bf16.msrb.mxu3 %v4303_v41  ;;  %v4712_v41 = vld [vmem:[#allocation8 + $0x2b4] sm:$0xf] }
 0x1c9   : > { %1718 = vmatpush.bf16.msra.mxu2 %v4323_v13  ;;  %1809 = vmatpush.bf16.msrb.mxu0 %v4495_v62  ;;  %v4475_v56 = vor.u32 %v4712_v41, %v4472_v42 }
 0x1ca   : > { %v5776_v58 = vpack.c.bf16 %v760_v55, %v758_v54  ;;  %v4307_v55 = vor.u32 %v4670_v50, %v4304_v52 }
 0x1cb   : > { %v727_v14 = vpop.f32.mrf.mxu2 }
 0x1cc   : > { %v728_v19 = vadd.f32 %v727_v14, %v5706_v17  ;;  %v5804_v17 = vperm.slane %v874_v27, 0  ;;  %1858 = vmatpush.bf16.msrb.mxu1 %v4307_v55  ;;  %v4667_v27 = vld [vmem:[#allocation8 + $0x144] sm:$0xf0] }
 0x1cd   : > { %1907 = vmatpush.bf16.msrb.mxu2 %v4499_v45 }
 0x1ce   : > { %v761_v21 = vmax.f32 %v728_v19, 0.0 }
 0x1d0   : > { %v5796_v24 = vpack.c.bf16 %v761_v21, %v759_v20 }
 0x1d1   : > { %1908 = vmatpush.bf16.msrb.mxu2 %v4475_v56 }
 0x1d6   : > { %1406 = vmatmul.bf16.gmra.mxu3 %v5764_v34  ;;  %1445 = vmatmul.bf16.gmra.mxu0 %v5766_v32 }
 0x1d7   : > { %1504 = vmatmul.bf16.gmra.mxu1 %v5764_v34  ;;  %1543 = vmatmul.bf16.gmra.mxu2 %v5766_v32 }
 0x1e6   : > { %1411 = vmatmul.bf16.gmra.mxu3 %v5776_v58  ;;  %1450 = vmatmul.bf16.gmra.mxu0 %v5778_v60 }
 0x1e7   : > { %1509 = vmatmul.bf16.gmra.mxu1 %v5776_v58  ;;  %1548 = vmatmul.bf16.gmra.mxu2 %v5778_v60 }
 0x1f3   : > { %v1475_v11 = vpop.f32.mrf.mxu1 }
 0x1f4   : > { %v1476_v48 = vadd.f32 %v1475_v11, %v5811_v46 }
 0x1f6   : > { %1455 = vmatmul.bf16.gmra.mxu0 %v5786_v12  ;;  %1572 = vmatmul.bf16.vlgmr.msra.gmra.mxu3 %v5693_v51 }
 0x1f7   : > { %1553 = vmatmul.bf16.gmra.mxu2 %v5786_v12  ;;  %1670 = vmatmul.bf16.vlgmr.msra.gmra.mxu1 %v5693_v51 }
 0x1f9   : > { %v1377_v15 = vpop.f32.mrf.mxu3 }
 0x1fa   : > { %v1378_v30 = vadd.f32 %v1377_v15, %v5804_v17 }
 0x1fb   : > { %v1477_v16 = vpop.f32.mrf.mxu1 }
 0x1fc   : > { %v1478_v8 = vadd.f32 %v1477_v16, %v5811_v46 }
 0x201   : > { %v1379_v22 = vpop.f32.mrf.mxu3 }
 0x202   : > { %v1380_v53 = vadd.f32 %v1379_v22, %v5804_v17  ;;  %v4278_v22 = vld [vmem:[#allocation8 + $0x130] sm:$0xf] }
 0x203   : > { %v5794_v23 = vpop.f32.mrf.mxu1  ;;  %v4279_v37 = vor.u32 %v4667_v27, %v4278_v22 }
 0x205   : > { %1761 = vmatpush.bf16.msrb.mxu3 %v4279_v37 }
 0x206   : > { %1460 = vmatmul.bf16.gmra.mxu0 %v5796_v24  ;;  %1577 = vmatmul.bf16.gmra.mxu3 %v5701_v7 }
 0x207   : > { %1558 = vmatmul.bf16.gmra.mxu2 %v5796_v24  ;;  %1675 = vmatmul.bf16.gmra.mxu1 %v5701_v7 }
 0x209   : > { %v1382_v25 = vpop.f32.mrf.mxu3 }
 0x20a   : > { %v1383_v10 = vadd.f32 %v1382_v25, %v5804_v17 }
 0x20b   : > { %v5802_v26 = vpop.f32.mrf.mxu1 }
 0x20c   : > { %v5838_v45 = vadd.f32 %v5802_v26, %v5811_v46 }
 0x211   : > { %v5806_v28 = vpop.f32.mrf.mxu3 }
 0x212   : > { %v1385_v50 = vadd.f32 %v5806_v28, %v5804_v17 }
 0x213   : > { %v1426_v39 = vpop.f32.mrf.mxu0 }
 0x214   : > { %v1427_v43 = vadd.f32 %v1426_v39, %v1378_v30  ;;  %v5809_v44 = vpop.f32.mrf.mxu1 }
 0x216   : > { %v4500_v47 = vmul.f32 -1.442695, %v1427_v43  ;;  %1582 = vmatmul.bf16.gmra.mxu3 %v5714_v38  ;;  %1621 = vmatmul.bf16.vlgmr.msra.gmra.mxu0 %v5716_v40  ;;  %v1481_v43 = vadd.f32 %v5794_v23, %v5811_v46 }
 0x217   : > { %1680 = vmatmul.bf16.gmra.mxu1 %v5714_v38  ;;  %1719 = vmatmul.bf16.vlgmr.msra.gmra.mxu2 %v5716_v40 }
 0x218   : > { %4844 = vpow2.f32 %v4500_v47 }
 0x219   : > { %v1387_v49 = vpop.f32.mrf.mxu3 }
 0x21a   : > { %v1524_v54 = vpop.f32.mrf.mxu2 }
 0x21b   : > { %v1525_v63 = vadd.f32 %v1524_v54, %v1476_v48  ;;  %v1428_v35 = vpop.f32.mrf.mxu0  ;;  %v5853_v54 = vadd.f32 %v1387_v49, %v5804_v17 }
 0x21c   : > { %v1429_v13 = vadd.f32 %v1428_v35, %v1380_v53  ;;  %v1487_v0 = vpop.f32.mrf.mxu1  ;;  %v5848_v53 = vadd.f32 %v5809_v44, %v5811_v46  ;;  %v4664_v44 = vld [vmem:[#allocation8 + $0x134] sm:$0xf]  ;;  %v4280_v35 = vld [vmem:[#allocation8 + $0x148] sm:$0xf0] }
 0x21d   : > { %v4501_v1 = vmul.f32 -1.442695, %v1525_v63  ;;  %v5856_v55 = vadd.f32 %v1487_v0, %v5811_v46  ;;  %v4283_v0 = vor.u32 %v4664_v44, %v4280_v35 }
 0x21e   : > { %v4845_v4 = vpop.eup %4844  ;;  %v4506_v5 = vmul.f32 -1.442695, %v1429_v13 }
 0x21f   : > { %v5819_v6 = vadd.f32 1.0, %v4845_v4  ;;  %4846 = vpow2.f32 %v4501_v1  ;;  %1859 = vmatpush.bf16.msrb.mxu1 %v4283_v0  ;;  %v4706_v1 = vld [vmem:[#allocation8 + $0x284] sm:$0xf] }
 0x220   : > { %4848 = vpow2.f32 %v4506_v5  ;;  %v4470_v5 = vld [vmem:[#allocation8 + $0x2b0] sm:$0xf] }
 0x221   : > { %4850 = vrcp.f32 %v5819_v6  ;;  %v1389_v9 = vpop.f32.mrf.mxu3  ;;  %v2349_v47 = vand.u32 2147483647, %v5819_v6  ;;  %v2351_v26 = vand.u32 2147483648, %v5819_v6  ;;  %vm2345_vm0 = vweird.f32 %v5819_v6 }
 0x222   : > { %v1526_v11 = vpop.f32.mrf.mxu2  ;;  %v5866_v49 = vadd.f32 %v1389_v9, %v5804_v17 }
 0x223   : > { %v1527_v14 = vadd.f32 %v1526_v11, %v1478_v8  ;;  %v1431_v15 = vpop.f32.mrf.mxu0  ;;  %vm5861_vm2 = vcmp.eq.f32.partialorder %v2349_v47, 8.507059e+37  ;;  %v4715_v8 = vld [vmem:[#allocation8 + $0x2c4] sm:$0xf0] }
 0x224   : > { %v1432_v18 = vadd.f32 %v1431_v15, %v1383_v10  ;;  %v1490_v19 = vpop.f32.mrf.mxu1 }
 0x225   : > { %v4847_v20 = vpop.eup %4846  ;;  %v4507_v21 = vmul.f32 -1.442695, %v1527_v14  ;;  %v5877_v22 = vadd.f32 %v1490_v19, %v5811_v46 }
 0x226   : > { %v4849_v30 = vpop.eup %4848  ;;  %v5824_v29 = vadd.f32 1.0, %v4847_v20  ;;  %v4512_v36 = vmul.f32 -1.442695, %v1432_v18  ;;  %1587 = vmatmul.bf16.gmra.mxu3 %v5727_v2  ;;  %1626 = vmatmul.bf16.gmra.mxu0 %v5729_v3  ;;  %v4471_v18 = vor.u32 %v4715_v8, %v4470_v5 }
 0x227   : > { %v4851_v16 = vpop.eup %4850  ;;  %v5828_v25 = vadd.f32 1.0, %v4849_v30  ;;  %4852 = vpow2.f32 %v4507_v21  ;;  %1685 = vmatmul.bf16.gmra.mxu1 %v5727_v2  ;;  %1724 = vmatmul.bf16.gmra.mxu2 %v5729_v3  ;;  %v2352_v21 = vor.u32 1.1754944e-38, %v2351_v26 }
 0x228   : > { %v2341_v39 = vmul.f32 %v4851_v16, %v5819_v6  ;;  %4854 = vrcp.f32 %v5824_v29  ;;  %vm2346_vm1 = vweird.f32 %v4851_v16  ;;  %vm2360_vm4 = vweird.f32 %v5824_v29  ;;  %1810 = vmatpush.bf16.msrb.mxu0 %v4471_v18 }
 0x229   : > { %4856 = vrcp.f32 %v5828_v25  ;;  %v5842_v48 = vpop.f32.mrf.mxu3  ;;  %vm2347_vm3 = vmor %vm2345_vm0, %vm2346_vm1  ;;  %v2364_v41 = vand.u32 2147483647, %v5824_v29  ;;  %v2366_v19 = vand.u32 2147483648, %v5824_v29  ;;  %vm2435_vm6 = vweird.f32 %v5828_v25 }
 0x22a   : > { %v2342_v52 = vsub.f32 1.0, %v2341_v39  ;;  %4858 = vpow2.f32 %v4512_v36  ;;  %v1529_v23 = vpop.f32.mrf.mxu2  ;;  %v5924_v5 = vadd.f32 %v5842_v48, %v5804_v17 }
 0x22b   : > { %v1433_v57 = vpop.f32.mrf.mxu0  ;;  %v1530_v28 = vadd.f32 %v1529_v23, %v1481_v43  ;;  %v2439_v43 = vand.u32 2147483647, %v5828_v25  ;;  %v2441_v23 = vand.u32 2147483648, %v5828_v25  ;;  %vm5904_vm8 = vcmp.eq.f32.partialorder %v2364_v41, 8.507059e+37 }
 0x22c   : > { %v2343_v63 = vmul.f32 %v4851_v16, %v2342_v52  ;;  %v5859_v62 = vpop.f32.mrf.mxu1  ;;  %v1434_v4 = vadd.f32 %v1433_v57, %v1385_v50  ;;  %v2367_v44 = vor.u32 1.1754944e-38, %v2366_v19 }
 0x22d   : > { %v4853_v13 = vpop.eup %4852  ;;  %v4513_v15 = vmul.f32 -1.442695, %v1530_v28  ;;  %vm5918_vm10 = vcmp.eq.f32.partialorder %v2439_v43, 8.507059e+37  ;;  %v2442_v8 = vor.u32 1.1754944e-38, %v2441_v23  ;;  %v5971_v23 = vadd.f32 %v5859_v62, %v5811_v46 }
 0x22e   : > { %v4855_v10 = vpop.eup %4854  ;;  %v2344_v11 = vadd.f32 %v4851_v16, %v2343_v63  ;;  %v5868_v14 = vadd.f32 1.0, %v4853_v13  ;;  %v4518_v27 = vmul.f32 -1.442695, %v1434_v4 }
 0x22f   : > { %v5870_v20 = vpop.eup %4856  ;;  %v2356_v9 = vmul.f32 %v4855_v10, %v5824_v29  ;;  %vm2361_vm5 = vweird.f32 %v4855_v10 }
 0x230   : > { %v4859_v30 = vpop.eup %4858  ;;  %v2348_v36 = vsel %vm2347_vm3, %v4851_v16, %v2344_v11  ;;  %v2431_v37 = vmul.f32 %v5870_v20, %v5828_v25  ;;  %4860 = vrcp.f32 %v5868_v14  ;;  %vm2436_vm7 = vweird.f32 %v5870_v20  ;;  %vm5913_vm9 = vmor %vm2360_vm4, %vm2361_vm5 }
 0x231   : > { %v2353_v6 = vsel %vm5861_vm2, %v2352_v21, %v2348_v36  ;;  %v2357_v39 = vsub.f32 1.0, %v2356_v9  ;;  %v5887_v42 = vpop.f32.mrf.mxu3  ;;  %v5895_v47 = vadd.f32 1.0, %v4859_v30  ;;  %4862 = vpow2.f32 %v4513_v15  ;;  %vm2437_vm11 = vmor %vm2435_vm6, %vm2436_vm7 }
 0x232   : > { %3780 = vst [vmem:[%s5891_s29] sm:$0xff] %v2353_v6  ;;  %v2432_v16 = vsub.f32 1.0, %v2431_v37  ;;  %v1531_v50 = vpop.f32.mrf.mxu2  ;;  %4864 = vpow2.f32 %v4518_v27  ;;  %v2454_v11 = vand.u32 2147483647, %v5868_v14  ;;  %v2456_v25 = vand.u32 2147483648, %v5868_v14 }
 0x233   : > { %v2358_v52 = vmul.f32 %v4855_v10, %v2357_v39  ;;  %v1436_v26 = vpop.f32.mrf.mxu0  ;;  %4866 = vrcp.f32 %v5895_v47  ;;  %v1532_v35 = vadd.f32 %v1531_v50, %v5838_v45  ;;  %v2529_v30 = vand.u32 2147483647, %v5895_v47 }
 0x234   : > { %v2433_v56 = vmul.f32 %v5870_v20, %v2432_v16  ;;  %v5902_v57 = vpop.f32.mrf.mxu1  ;;  %v1437_v45 = vadd.f32 %v1436_v26, %v5853_v54  ;;  %vm2450_vm13 = vweird.f32 %v5868_v14  ;;  %vm5964_vm14 = vcmp.eq.f32.partialorder %v2454_v11, 8.507059e+37  ;;  %v4254_v26 = vld [vmem:[#allocation8 + $0x100] sm:$0xf] }
 0x235   : > { %v2359_v63 = vadd.f32 %v4855_v10, %v2358_v52  ;;  %v4519_v18 = vmul.f32 -1.442695, %v1532_v35  ;;  %vm2525_vm0 = vweird.f32 %v5895_v47  ;;  %vm5983_vm1 = vcmp.eq.f32.partialorder %v2529_v30, 8.507059e+37 }
 0x236   : > { %v5909_v13 = vpop.eup %4860  ;;  %v2434_v0 = vadd.f32 %v5870_v20, %v2433_v56  ;;  %1592 = vmatmul.bf16.gmra.mxu3 %v5740_v31  ;;  %1631 = vmatmul.bf16.gmra.mxu0 %v5742_v33  ;;  %v4524_v41 = vmul.f32 -1.442695, %v1437_v45  ;;  %v4661_v56 = vld [vmem:[#allocation8 + $0x114] sm:$0xf0] }
 0x237   : > { %v2363_v29 = vsel %vm5913_vm9, %v4855_v10, %v2359_v63  ;;  %v2446_v48 = vmul.f32 %v5909_v13, %v5868_v14  ;;  %1690 = vmatmul.bf16.gmra.mxu1 %v5740_v31  ;;  %1729 = vmatmul.bf16.gmra.mxu2 %v5742_v33  ;;  %v4863_v54 = vpop.eup %4862  ;;  %4868 = vpow2.f32 %v4519_v18  ;;  %vm2451_vm12 = vweird.f32 %v5909_v13 }
 0x238   : > { %v2368_v10 = vsel %vm5904_vm8, %v2367_v44, %v2363_v29  ;;  %v2438_v15 = vsel %vm2437_vm11, %v5870_v20, %v2434_v0  ;;  %v4865_v21 = vpop.eup %4864  ;;  %v5948_v36 = vadd.f32 1.0, %v4863_v54  ;;  %v2531_v20 = vand.u32 2147483648, %v5895_v47  ;;  %v4448_v0 = vld [vmem:[#allocation8 + $0x298] sm:$0xf0]  ;;  %vm2452_vm15 = vmor %vm2450_vm13, %vm2451_vm12 }
 0x239   : > { %3781 = vst [vmem:[%s5891_s29 + $0x8] sm:$0xff] %v2368_v10  ;;  %v2443_v9 = vsel %vm5918_vm10, %v2442_v8, %v2438_v15  ;;  %v2447_v27 = vsub.f32 1.0, %v2446_v48  ;;  %v5950_v37 = vpop.f32.mrf.mxu3  ;;  %v5952_v6 = vpop.eup %4866  ;;  %v5956_v39 = vadd.f32 1.0, %v4865_v21  ;;  %v2457_v44 = vor.u32 1.1754944e-38, %v2456_v25  ;;  %v4658_v8 = vld [vmem:[#allocation8 + $0x104] sm:$0xf] }
 0x23a   : > { %3786 = vst [vmem:[%s5891_s29 + $0x30] sm:$0xff] %v2443_v9  ;;  %v1534_v19 = vpop.f32.mrf.mxu2  ;;  %v2521_v43 = vmul.f32 %v5952_v6, %v5895_v47  ;;  %4870 = vrcp.f32 %v5948_v36  ;;  %v5978_v14 = vadd.f32 %v5887_v42, %v5804_v17  ;;  %v2532_v4 = vor.u32 1.1754944e-38, %v2531_v20  ;;  %v4256_v48 = vld [vmem:[#allocation8 + $0x118] sm:$0xf0] }
 0x23b   : > { %v2448_v16 = vmul.f32 %v5909_v13, %v2447_v27  ;;  %v1438_v50 = vpop.f32.mrf.mxu0  ;;  %4872 = vrcp.f32 %v5956_v39  ;;  %vm2526_vm2 = vweird.f32 %v5952_v6  ;;  %v4255_v42 = vor.u32 %v4661_v56, %v4254_v26  ;;  %v4446_v26 = vld [vmem:[#allocation8 + $0x280] sm:$0xf]  ;;  %v4709_v56 = vld [vmem:[#allocation8 + $0x294] sm:$0xf0] }
 0x23c   : > { %v5973_v63 = vpop.f32.mrf.mxu1  ;;  %v2522_v35 = vsub.f32 1.0, %v2521_v43  ;;  %4874 = vpow2.f32 %v4524_v41  ;;  %vm2540_vm3 = vweird.f32 %v5948_v36  ;;  %v4451_v10 = vor.u32 %v4706_v1, %v4448_v0  ;;  %vm6009_vm4 = vmor %vm2525_vm0, %vm2526_vm2 }
 0x23d   : > { %v2449_v28 = vadd.f32 %v5909_v13, %v2448_v16  ;;  %v4869_v11 = vpop.eup %4868  ;;  %v1535_v15 = vadd.f32 %v1534_v19, %v5848_v53  ;;  %v2544_v18 = vand.u32 2147483647, %v5948_v36  ;;  %1762 = vmatpush.bf16.msrb.mxu3 %v4255_v42  ;;  %v4259_v9 = vor.u32 %v4658_v8, %v4256_v48 }
 0x23e   : > { %v2523_v29 = vmul.f32 %v5952_v6, %v2522_v35  ;;  %v5999_v21 = vadd.f32 1.0, %v4869_v11  ;;  %v2546_v41 = vand.u32 2147483648, %v5948_v36  ;;  %1909 = vmatpush.bf16.msrb.mxu2 %v4451_v10  ;;  %v1439_v16 = vadd.f32 %v1438_v50, %v5866_v49 }
 0x23f   : > { %v2453_v45 = vsel %vm2452_vm15, %v5909_v13, %v2449_v28  ;;  %v4525_v19 = vmul.f32 -1.442695, %v1535_v15  ;;  %vm2615_vm5 = vweird.f32 %v5956_v39  ;;  %1860 = vmatpush.bf16.msrb.mxu1 %v4259_v9  ;;  %v2619_v35 = vand.u32 2147483647, %v5956_v39 }
 0x240   : > { %v2458_v54 = vsel %vm5964_vm14, %v2457_v44, %v2453_v45  ;;  %v5994_v25 = vpop.eup %4870  ;;  %v2524_v13 = vadd.f32 %v5952_v6, %v2523_v29  ;;  %4876 = vrcp.f32 %v5999_v21  ;;  %v4530_v62 = vmul.f32 -1.442695, %v1439_v16 }
 0x241   : > { %3787 = vst [vmem:[%s5891_s29 + $0x38] sm:$0xff] %v2458_v54  ;;  %v6001_v27 = vpop.f32.mrf.mxu3  ;;  %v6003_v30 = vpop.eup %4872  ;;  %v2536_v20 = vmul.f32 %v5994_v25, %v5948_v36  ;;  %vm2541_vm6 = vweird.f32 %v5994_v25  ;;  %4878 = vpow2.f32 %v4525_v19  ;;  %vm6038_vm8 = vcmp.eq.f32.partialorder %v2544_v18, 8.507059e+37 }
 0x242   : > { %v1536_v43 = vpop.f32.mrf.mxu2  ;;  %v2528_v52 = vsel %vm6009_vm4, %v5952_v6, %v2524_v13  ;;  %v2611_v47 = vmul.f32 %v6003_v30, %v5956_v39  ;;  %v4875_v44 = vpop.eup %4874  ;;  %v2621_v6 = vand.u32 2147483648, %v5956_v39  ;;  %vm2616_vm7 = vweird.f32 %v6003_v30  ;;  %vm6051_vm9 = vmor %vm2540_vm3, %vm2541_vm6 }
 0x243   : > { %v1441_v28 = vpop.f32.mrf.mxu0  ;;  %v2533_v49 = vsel %vm5983_vm1, %v2532_v4, %v2528_v52  ;;  %v2537_v50 = vsub.f32 1.0, %v2536_v20  ;;  %v6032_v45 = vadd.f32 1.0, %v4875_v44  ;;  %v4447_v4 = vor.u32 %v4709_v56, %v4446_v26  ;;  %vm6066_vm11 = vmor %vm2615_vm5, %vm2616_vm7 }
 0x244   : > { %v6028_v1 = vpop.f32.mrf.mxu1  ;;  %3792 = vst [vmem:[%s5891_s29 + $0x60] sm:$0xff] %v2533_v49  ;;  %v2612_v0 = vsub.f32 1.0, %v2611_v47  ;;  %v2547_v8 = vor.u32 1.1754944e-38, %v2546_v41  ;;  %vm6055_vm10 = vcmp.eq.f32.partialorder %v2619_v35, 8.507059e+37  ;;  %v2622_v15 = vor.u32 1.1754944e-38, %v2621_v6 }
 0x245   : > { %v2538_v29 = vmul.f32 %v5994_v25, %v2537_v50  ;;  %4880 = vrcp.f32 %v6032_v45  ;;  %1811 = vmatpush.bf16.msrb.mxu0 %v4447_v4  ;;  %v2634_v9 = vand.u32 2147483647, %v5999_v21  ;;  %v1537_v53 = vadd.f32 %v1536_v43, %v5856_v55  ;;  %v4230_v41 = vld [vmem:[#allocation8 + $0xd0] sm:$0xf]  ;;  %v4700_v43 = vld [vmem:[#allocation8 + $0x254] sm:$0xf] }
 0x246   : > { %1597 = vmatmul.bf16.gmra.mxu3 %v5752_v59  ;;  %1636 = vmatmul.bf16.gmra.mxu0 %v5754_v61  ;;  %v2613_v48 = vmul.f32 %v6003_v30, %v2612_v0  ;;  %4882 = vpow2.f32 %v4530_v62  ;;  %v6059_v13 = vpop.eup %4876  ;;  %v1442_v20 = vadd.f32 %v1441_v28, %v5924_v5  ;;  %v6082_v52 = vadd.f32 %v5902_v57, %v5811_v46  ;;  %v4655_v5 = vld [vmem:[#allocation8 + $0xe4] sm:$0xf0]  ;;  %v4424_v47 = vld [vmem:[#allocation8 + $0x268] sm:$0xf0] }
 0x247   : > { %1695 = vmatmul.bf16.gmra.mxu1 %v5752_v59  ;;  %1734 = vmatmul.bf16.gmra.mxu2 %v5754_v61  ;;  %v2539_v11 = vadd.f32 %v5994_v25, %v2538_v29  ;;  %v2626_v39 = vmul.f32 %v6059_v13, %v5999_v21  ;;  %v6086_v55 = vadd.f32 %v5950_v37, %v5804_v17  ;;  %v4879_v56 = vpop.eup %4878  ;;  %v2636_v57 = vand.u32 2147483648, %v5999_v21 }
 0x248   : > { %v2614_v18 = vadd.f32 %v6003_v30, %v2613_v48  ;;  %v4531_v44 = vmul.f32 -1.442695, %v1537_v53  ;;  %v6097_v35 = vadd.f32 1.0, %v4879_v56  ;;  %v4536_v6 = vmul.f32 -1.442695, %v1442_v20 }
 0x249   : > { %v6073_v19 = vpop.f32.mrf.mxu3  ;;  %v2543_v16 = vsel %vm6051_vm9, %v5994_v25, %v2539_v11  ;;  %v2627_v50 = vsub.f32 1.0, %v2626_v39  ;;  %v2709_v62 = vand.u32 2147483647, %v6032_v45  ;;  %v4427_v4 = vor.u32 %v4700_v43, %v4424_v47  ;;  %v4652_v53 = vld [vmem:[#allocation8 + $0xd4] sm:$0xf] }
 0x24a   : > { %v1539_v26 = vpop.f32.mrf.mxu2  ;;  %v2548_v25 = vsel %vm6038_vm8, %v2547_v8, %v2543_v16  ;;  %v2618_v28 = vsel %vm6066_vm11, %v6003_v30, %v2614_v18  ;;  %4884 = vpow2.f32 %v4531_v44  ;;  %v4231_v30 = vor.u32 %v4655_v5, %v4230_v41 }
 0x24b   : > { %v1443_v49 = vpop.f32.mrf.mxu0  ;;  %3793 = vst [vmem:[%s5891_s29 + $0x68] sm:$0xff] %v2548_v25  ;;  %v2623_v37 = vsel %vm6055_vm10, %v2622_v15, %v2618_v28  ;;  %v6101_v29 = vpop.eup %4880  ;;  %v2628_v8 = vmul.f32 %v6059_v13, %v2627_v50  ;;  %vm2631_vm12 = vweird.f32 %v6059_v13  ;;  %4886 = vrcp.f32 %v6097_v35  ;;  %1910 = vmatpush.bf16.msrb.mxu2 %v4427_v4 }
 0x24c   : > { %v6099_v0 = vpop.f32.mrf.mxu1  ;;  %3798 = vst [vmem:[%s5891_s29 + $0x90] sm:$0xff] %v2623_v37  ;;  %v4883_v42 = vpop.eup %4882  ;;  %v2701_v48 = vmul.f32 %v6101_v29, %v6032_v45  ;;  %vm2630_vm13 = vweird.f32 %v5999_v21  ;;  %vm6111_vm14 = vcmp.eq.f32.partialorder %v2634_v9, 8.507059e+37  ;;  %v6119_v10 = vadd.f32 %v5973_v63, %v5811_v46  ;;  %1763 = vmatpush.bf16.msrb.mxu3 %v4231_v30  ;;  %v4232_v21 = vld [vmem:[#allocation8 + $0xe8] sm:$0xf0] }
 0x24d   : > { %v6115_v54 = vadd.f32 1.0, %v4883_v42  ;;  %v2629_v15 = vadd.f32 %v6059_v13, %v2628_v8  ;;  %v2711_v36 = vand.u32 2147483648, %v6032_v45  ;;  %4888 = vpow2.f32 %v4536_v6  ;;  %vm2632_vm15 = vmor %vm2630_vm13, %vm2631_vm12 }
 0x24e   : > { %v2702_v18 = vsub.f32 1.0, %v2701_v48  ;;  %v2637_v9 = vor.u32 1.1754944e-38, %v2636_v57  ;;  %vm2705_vm0 = vweird.f32 %v6032_v45  ;;  %v6129_v63 = vadd.f32 %v6001_v27, %v5804_v17 }
 0x24f   : > { %4890 = vrcp.f32 %v6115_v54  ;;  %v2633_v41 = vsel %vm2632_vm15, %v6059_v13, %v2629_v15  ;;  %vm2706_vm1 = vweird.f32 %v6101_v29  ;;  %vm6136_vm2 = vcmp.eq.f32.partialorder %v2709_v62, 8.507059e+37 }
 0x250   : > { %v2703_v16 = vmul.f32 %v6101_v29, %v2702_v18  ;;  %v4885_v43 = vpop.eup %4884  ;;  %v2638_v47 = vsel %vm6111_vm14, %v2637_v9, %v2633_v41  ;;  %v1540_v27 = vadd.f32 %v1539_v26, %v5877_v22  ;;  %v4235_v56 = vor.u32 %v4652_v53, %v4232_v21  ;;  %vm2707_vm3 = vmor %vm2705_vm0, %vm2706_vm1  ;;  %v4422_v18 = vld [vmem:[#allocation8 + $0x250] sm:$0xf]  ;;  %v4694_v21 = vld [vmem:[#allocation8 + $0x224] sm:$0xf] }
 0x251   : > { %v6131_v20 = vpop.f32.mrf.mxu3  ;;  %v1444_v25 = vadd.f32 %v1443_v49, %v5978_v14  ;;  %v6146_v13 = vpop.eup %4886  ;;  %3799 = vst [vmem:[%s5891_s29 + $0x98] sm:$0xff] %v2638_v47  ;;  %v2712_v44 = vor.u32 1.1754944e-38, %v2711_v36  ;;  %v6150_v37 = vadd.f32 1.0, %v4885_v43  ;;  %v6154_v50 = vadd.f32 %v6028_v1, %v5811_v46  ;;  %v4703_v36 = vld [vmem:[#allocation8 + $0x264] sm:$0xf0] }
 0x252   : > { %v1541_v5 = vpop.f32.mrf.mxu2  ;;  %v2704_v57 = vadd.f32 %v6101_v29, %v2703_v16  ;;  %v2716_v22 = vmul.f32 %v6146_v13, %v6097_v35  ;;  %v2724_v14 = vand.u32 2147483647, %v6097_v35  ;;  %v2726_v26 = vand.u32 2147483648, %v6097_v35  ;;  %1861 = vmatpush.bf16.msrb.mxu1 %v4235_v56 }
 0x253   : > { %v6144_v28 = vpop.f32.mrf.mxu0  ;;  %v4537_v49 = vmul.f32 -1.442695, %v1540_v27  ;;  %v4889_v62 = vpop.eup %4888  ;;  %v2799_v30 = vand.u32 2147483647, %v6115_v54  ;;  %4892 = vrcp.f32 %v6150_v37  ;;  %v4542_v4 = vmul.f32 -1.442695, %v1444_v25 }
 0x254   : > { %v6156_v6 = vpop.f32.mrf.mxu1  ;;  %v2708_v1 = vsel %vm2707_vm3, %v6101_v29, %v2704_v57  ;;  %v2717_v8 = vsub.f32 1.0, %v2716_v22  ;;  %v2801_v48 = vand.u32 2147483648, %v6115_v54  ;;  %v6176_v11 = vadd.f32 1.0, %v4889_v62  ;;  %v4206_v22 = vld [vmem:[#allocation8 + $0xa0] sm:$0xf] }
 0x255   : > { %v6171_v45 = vpop.eup %4890  ;;  %v2713_v42 = vsel %vm6136_vm2, %v2712_v44, %v2708_v1  ;;  %vm2720_vm4 = vweird.f32 %v6097_v35  ;;  %v6186_v15 = vadd.f32 %v6073_v19, %v5804_v17  ;;  %4894 = vpow2.f32 %v4537_v49 }
 0x256   : > { %1602 = vmatmul.bf16.gmra.mxu3 %v5764_v34  ;;  %1641 = vmatmul.bf16.gmra.mxu0 %v5766_v32  ;;  %3804 = vst [vmem:[%s5891_s29 + $0xc0] sm:$0xff] %v2713_v42  ;;  %v2791_v29 = vmul.f32 %v6171_v45, %v6115_v54  ;;  %v2718_v53 = vmul.f32 %v6146_v13, %v2717_v8  ;;  %vm2721_vm5 = vweird.f32 %v6146_v13  ;;  %vm6190_vm6 = vcmp.eq.f32.partialorder %v2724_v14, 8.507059e+37  ;;  %v4649_v14 = vld [vmem:[#allocation8 + $0xb4] sm:$0xf0] }
 0x257   : > { %1700 = vmatmul.bf16.gmra.mxu1 %v5764_v34  ;;  %1739 = vmatmul.bf16.gmra.mxu2 %v5766_v32  ;;  %4896 = vrcp.f32 %v6176_v11  ;;  %v2727_v41 = vor.u32 1.1754944e-38, %v2726_v26  ;;  %vm2795_vm7 = vweird.f32 %v6115_v54  ;;  %vm6201_vm8 = vcmp.eq.f32.partialorder %v2799_v30, 8.507059e+37  ;;  %vm2722_vm9 = vmor %vm2720_vm4, %vm2721_vm5 }
 0x258   : > { %v2792_v16 = vsub.f32 1.0, %v2791_v29  ;;  %4898 = vpow2.f32 %v4542_v4  ;;  %v2719_v39 = vadd.f32 %v6146_v13, %v2718_v53  ;;  %v2802_v47 = vor.u32 1.1754944e-38, %v2801_v48 }
 0x259   : > { %v6195_v9 = vpop.f32.mrf.mxu3  ;;  %v4423_v27 = vor.u32 %v4703_v36, %v4422_v18  ;;  %v6207_v25 = vpop.eup %4892  ;;  %vm2796_vm10 = vweird.f32 %v6171_v45  ;;  %vm2810_vm11 = vweird.f32 %v6150_v37  ;;  %v1542_v44 = vadd.f32 %v1541_v5, %v5971_v23 }
 0x25a   : > { %v6198_v19 = vpop.f32.mrf.mxu2  ;;  %v2793_v57 = vmul.f32 %v6171_v45, %v2792_v16  ;;  %v2723_v49 = vsel %vm2722_vm9, %v6146_v13, %v2719_v39  ;;  %v2806_v62 = vmul.f32 %v6207_v25, %v6150_v37  ;;  %v2814_v35 = vand.u32 2147483647, %v6150_v37  ;;  %vm2797_vm12 = vmor %vm2795_vm7, %vm2796_vm10 }
 0x25b   : > { %v6205_v56 = vpop.f32.mrf.mxu0  ;;  %1812 = vmatpush.bf16.msrb.mxu0 %v4423_v27  ;;  %v1447_v1 = vadd.f32 %v6144_v28, %v6086_v55  ;;  %v4895_v30 = vpop.eup %4894  ;;  %v2728_v4 = vsel %vm6190_vm6, %v2727_v41, %v2723_v49  ;;  %v2816_v5 = vand.u32 2147483648, %v6150_v37  ;;  %v4543_v42 = vmul.f32 -1.442695, %v1542_v44  ;;  %v4400_v41 = vld [vmem:[#allocation8 + $0x238] sm:$0xf0] }
 0x25c   : > { %v6217_v26 = vpop.f32.mrf.mxu1  ;;  %v2794_v23 = vadd.f32 %v6171_v45, %v2793_v57  ;;  %3805 = vst [vmem:[%s5891_s29 + $0xc8] sm:$0xff] %v2728_v4  ;;  %v2807_v13 = vsub.f32 1.0, %v2806_v62  ;;  %v6236_v48 = vadd.f32 1.0, %v4895_v30  ;;  %v4207_v28 = vor.u32 %v4649_v14, %v4206_v22  ;;  %v4646_v49 = vld [vmem:[#allocation8 + $0xa4] sm:$0xf] }
 0x25d   : > { %v6229_v8 = vpop.eup %4896  ;;  %v4548_v55 = vmul.f32 -1.442695, %v1447_v1  ;;  %v2889_v53 = vand.u32 2147483647, %v6176_v11  ;;  %4900 = vpow2.f32 %v4543_v42  ;;  %vm2811_vm13 = vweird.f32 %v6207_v25  ;;  %v4208_v62 = vld [vmem:[#allocation8 + $0xb8] sm:$0xf0] }
 0x25e   : > { %v4899_v29 = vpop.eup %4898  ;;  %v2798_v18 = vsel %vm2797_vm12, %v6171_v45, %v2794_v23  ;;  %v2881_v36 = vmul.f32 %v6229_v8, %v6176_v11  ;;  %v2808_v16 = vmul.f32 %v6207_v25, %v2807_v13  ;;  %4902 = vrcp.f32 %v6236_v48  ;;  %1764 = vmatpush.bf16.msrb.mxu3 %v4207_v28  ;;  %vm2812_vm15 = vmor %vm2810_vm11, %vm2811_vm13 }
 0x25f   : > { %v2803_v54 = vsel %vm6201_vm8, %v2802_v47, %v2798_v18  ;;  %vm6250_vm14 = vcmp.eq.f32.partialorder %v2814_v35, 8.507059e+37  ;;  %v2817_v27 = vor.u32 1.1754944e-38, %v2816_v5  ;;  %v6254_v44 = vadd.f32 1.0, %v4899_v29 }
 0x260   : > { %3810 = vst [vmem:[%s5891_s29 + $0xf0] sm:$0xff] %v2803_v54  ;;  %v2882_v57 = vsub.f32 1.0, %v2881_v36  ;;  %v2809_v47 = vadd.f32 %v6207_v25, %v2808_v16  ;;  %v2891_v22 = vand.u32 2147483648, %v6176_v11  ;;  %4904 = vpow2.f32 %v4548_v55 }
 0x261   : > { %v6247_v39 = vpop.f32.mrf.mxu3  ;;  %v4403_v14 = vor.u32 %v4694_v21, %v4400_v41  ;;  %vm2885_vm0 = vweird.f32 %v6176_v11  ;;  %vm2886_vm1 = vweird.f32 %v6229_v8  ;;  %4906 = vrcp.f32 %v6254_v44 }
 0x262   : > { %v6256_v43 = vpop.f32.mrf.mxu2  ;;  %v2883_v35 = vmul.f32 %v6229_v8, %v2882_v57  ;;  %v2813_v4 = vsel %vm2812_vm15, %v6207_v25, %v2809_v47  ;;  %vm6273_vm2 = vcmp.eq.f32.partialorder %v2889_v53, 8.507059e+37  ;;  %v6279_v37 = vadd.f32 %v6099_v0, %v5811_v46  ;;  %vm2887_vm3 = vmor %vm2885_vm0, %vm2886_vm1 }
 0x263   : > { %v6260_v1 = vpop.f32.mrf.mxu0  ;;  %v6283_v5 = vadd.f32 %v6131_v20, %v5804_v17  ;;  %1911 = vmatpush.bf16.msrb.mxu2 %v4403_v14  ;;  %v4901_v42 = vpop.eup %4900  ;;  %v2818_v13 = vsel %vm6250_vm14, %v2817_v27, %v2813_v4  ;;  %v1545_v25 = vadd.f32 %v6198_v19, %v6082_v52  ;;  %v4211_v28 = vor.u32 %v4646_v49, %v4208_v62  ;;  %v4398_v14 = vld [vmem:[#allocation8 + $0x220] sm:$0xf]  ;;  %v4697_v49 = vld [vmem:[#allocation8 + $0x234] sm:$0xf0] }
 0x264   : > { %v6270_v30 = vpop.f32.mrf.mxu1  ;;  %v2884_v55 = vadd.f32 %v6229_v8, %v2883_v35  ;;  %v6291_v29 = vpop.eup %4902  ;;  %3811 = vst [vmem:[%s5891_s29 + $0xf8] sm:$0xff] %v2818_v13  ;;  %v2892_v0 = vor.u32 1.1754944e-38, %v2891_v22  ;;  %v6298_v20 = vadd.f32 1.0, %v4901_v42  ;;  %v6302_v18 = vadd.f32 %v6156_v6, %v5811_v46 }
 0x265   : > { %v1449_v52 = vadd.f32 %v6205_v56, %v6129_v63  ;;  %v2896_v11 = vmul.f32 %v6291_v29, %v6236_v48  ;;  %v2904_v36 = vand.u32 2147483647, %v6236_v48  ;;  %v4549_v53 = vmul.f32 -1.442695, %v1545_v25  ;;  %1862 = vmatpush.bf16.msrb.mxu1 %v4211_v28 }
 0x266   : > { %1607 = vmatmul.bf16.gmra.mxu3 %v5776_v58  ;;  %1646 = vmatmul.bf16.gmra.mxu0 %v5778_v60  ;;  %v2888_v19 = vsel %vm2887_vm3, %v6229_v8, %v2884_v55  ;;  %v4905_v6 = vpop.eup %4904  ;;  %v2906_v56 = vand.u32 2147483648, %v6236_v48  ;;  %v2979_v21 = vand.u32 2147483647, %v6254_v44  ;;  %4908 = vrcp.f32 %v6298_v20 }
 0x267   : > { %1705 = vmatmul.bf16.gmra.mxu1 %v5776_v58  ;;  %1744 = vmatmul.bf16.gmra.mxu2 %v5778_v60  ;;  %v2893_v63 = vsel %vm6273_vm2, %v2892_v0, %v2888_v19  ;;  %v6320_v41 = vpop.eup %4906  ;;  %v2897_v54 = vsub.f32 1.0, %v2896_v11  ;;  %v2981_v16 = vand.u32 2147483648, %v6254_v44  ;;  %v6324_v45 = vadd.f32 1.0, %v4905_v6  ;;  %v4182_v11 = vld [vmem:[#allocation8 + $0x70] sm:$0xf] }
 0x268   : > { %3816 = vst [vmem:[%s5891_s29 + $0x120] sm:$0xff] %v2893_v63  ;;  %4910 = vpow2.f32 %v4549_v53  ;;  %vm2900_vm4 = vweird.f32 %v6236_v48  ;;  %v2971_v57 = vmul.f32 %v6320_v41, %v6254_v44  ;;  %v6333_v47 = vadd.f32 %v6195_v9, %v5804_v17 }
 0x269   : > { %v6318_v8 = vpop.f32.mrf.mxu3  ;;  %v4554_v22 = vmul.f32 -1.442695, %v1449_v52  ;;  %v2898_v35 = vmul.f32 %v6291_v29, %v2897_v54  ;;  %vm2901_vm5 = vweird.f32 %v6291_v29  ;;  %vm6339_vm6 = vcmp.eq.f32.partialorder %v2904_v36, 8.507059e+37  ;;  %v4643_v36 = vld [vmem:[#allocation8 + $0x84] sm:$0xf0] }
 0x26a   : > { %v6326_v27 = vpop.f32.mrf.mxu2  ;;  %4912 = vrcp.f32 %v6324_v45  ;;  %v2907_v42 = vor.u32 1.1754944e-38, %v2906_v56  ;;  %v2972_v9 = vsub.f32 1.0, %v2971_v57  ;;  %vm2975_vm7 = vweird.f32 %v6254_v44  ;;  %vm2902_vm9 = vmor %vm2900_vm4, %vm2901_vm5  ;;  %v4688_v44 = vld [vmem:[#allocation8 + $0x1f4] sm:$0xf] }
 0x26b   : > { %v6335_v62 = vpop.f32.mrf.mxu0  ;;  %4914 = vpow2.f32 %v4554_v22  ;;  %v2899_v13 = vadd.f32 %v6291_v29, %v2898_v35  ;;  %vm6348_vm8 = vcmp.eq.f32.partialorder %v2979_v21, 8.507059e+37  ;;  %v2982_v25 = vor.u32 1.1754944e-38, %v2981_v16 }
 0x26c   : > { %v6344_v23 = vpop.f32.mrf.mxu1  ;;  %v4399_v28 = vor.u32 %v4697_v49, %v4398_v14  ;;  %v6352_v0 = vpop.eup %4908  ;;  %v2973_v52 = vmul.f32 %v6320_v41, %v2972_v9  ;;  %vm2976_vm10 = vweird.f32 %v6320_v41  ;;  %vm2990_vm11 = vweird.f32 %v6298_v20  ;;  %v4376_v9 = vld [vmem:[#allocation8 + $0x208] sm:$0xf0] }
 0x26d   : > { %v1547_v19 = vadd.f32 %v6256_v43, %v6119_v10  ;;  %v2903_v6 = vsel %vm2902_vm9, %v6291_v29, %v2899_v13  ;;  %v2986_v63 = vmul.f32 %v6352_v0, %v6298_v20  ;;  %v2994_v48 = vand.u32 2147483647, %v6298_v20  ;;  %vm2977_vm12 = vmor %vm2975_vm7, %vm2976_vm10 }
 0x26e   : > { %v4911_v53 = vpop.eup %4910  ;;  %1813 = vmatpush.bf16.msrb.mxu0 %v4399_v28  ;;  %v1452_v56 = vadd.f32 %v6260_v1, %v6186_v15  ;;  %v2908_v21 = vsel %vm6339_vm6, %v2907_v42, %v2903_v6  ;;  %v2974_v54 = vadd.f32 %v6320_v41, %v2973_v52  ;;  %v2996_v15 = vand.u32 2147483648, %v6298_v20 }
 0x26f   : > { %v6370_v10 = vadd.f32 1.0, %v4911_v53  ;;  %v4555_v43 = vmul.f32 -1.442695, %v1547_v19  ;;  %3817 = vst [vmem:[%s5891_s29 + $0x128] sm:$0xff] %v2908_v21  ;;  %v2987_v57 = vsub.f32 1.0, %v2986_v63  ;;  %v4183_v22 = vor.u32 %v4643_v36, %v4182_v11 }
 0x270   : > { %v6374_v29 = vpop.eup %4912  ;;  %v4560_v1 = vmul.f32 -1.442695, %v1452_v56  ;;  %v2978_v35 = vsel %vm2977_vm12, %v6320_v41, %v2974_v54  ;;  %v3069_v42 = vand.u32 2147483647, %v6324_v45  ;;  %vm2991_vm13 = vweird.f32 %v6352_v0  ;;  %v4640_v63 = vld [vmem:[#allocation8 + $0x74] sm:$0xf] }
 0x271   : > { %v6372_v16 = vpop.f32.mrf.mxu3  ;;  %v4915_v49 = vpop.eup %4914  ;;  %v3061_v4 = vmul.f32 %v6374_v29, %v6324_v45  ;;  %4916 = vrcp.f32 %v6370_v10  ;;  %v2983_v28 = vsel %vm6348_vm8, %v2982_v25, %v2978_v35  ;;  %v2988_v52 = vmul.f32 %v6352_v0, %v2987_v57  ;;  %1765 = vmatpush.bf16.msrb.mxu3 %v4183_v22  ;;  %v4184_v56 = vld [vmem:[#allocation8 + $0x88] sm:$0xf0]  ;;  %vm2992_vm15 = vmor %vm2990_vm11, %vm2991_vm13  ;;  %v4637_v35 = vld [vmem:[#allocation8 + $0x54] sm:$0xf0] }
 0x272   : > { %v6382_v14 = vpop.f32.mrf.mxu2  ;;  %v3071_v41 = vand.u32 2147483648, %v6324_v45  ;;  %3822 = vst [vmem:[%s5891_s29 + $0x150] sm:$0xff] %v2983_v28  ;;  %vm6399_vm14 = vcmp.eq.f32.partialorder %v2994_v48, 8.507059e+37  ;;  %v6403_v53 = vadd.f32 1.0, %v4915_v49  ;;  %4918 = vpow2.f32 %v4555_v43  ;;  %v4158_v49 = vld [vmem:[#allocation8 + $0x40] sm:$0xf] }
 0x273   : > { %v6389_v13 = vpop.f32.mrf.mxu0  ;;  %v3062_v36 = vsub.f32 1.0, %v3061_v4  ;;  %v2989_v55 = vadd.f32 %v6352_v0, %v2988_v52  ;;  %v2997_v25 = vor.u32 1.1754944e-38, %v2996_v15  ;;  %4920 = vpow2.f32 %v4560_v1 }
 0x274   : > { %v6396_v19 = vpop.f32.mrf.mxu1  ;;  %v4379_v6 = vor.u32 %v4688_v44, %v4376_v9  ;;  %vm3065_vm0 = vweird.f32 %v6324_v45  ;;  %vm3066_vm1 = vweird.f32 %v6374_v29  ;;  %4922 = vrcp.f32 %v6403_v53 }
 0x275   : > { %v3063_v48 = vmul.f32 %v6374_v29, %v3062_v36  ;;  %v2993_v21 = vsel %vm2992_vm15, %v6352_v0, %v2989_v55  ;;  %vm6416_vm2 = vcmp.eq.f32.partialorder %v3069_v42, 8.507059e+37  ;;  %v3072_v43 = vor.u32 1.1754944e-38, %v3071_v41  ;;  %vm6439_vm3 = vmor %vm3065_vm0, %vm3066_vm1  ;;  %v4374_v36 = vld [vmem:[#allocation8 + $0x1f0] sm:$0xf]  ;;  %v4691_v55 = vld [vmem:[#allocation8 + $0x204] sm:$0xf0] }
 0x276   : > { %1651 = vmatmul.bf16.gmra.mxu0 %v5786_v12  ;;  %v6422_v20 = vadd.f32 %v6217_v26, %v5811_v46  ;;  %1912 = vmatpush.bf16.msrb.mxu2 %v4379_v6  ;;  %v2998_v15 = vsel %vm6399_vm14, %v2997_v25, %v2993_v21  ;;  %v1550_v0 = vadd.f32 %v6326_v27, %v6154_v50  ;;  %v3084_v50 = vand.u32 2147483647, %v6370_v10 }
 0x277   : > { %v6424_v57 = vpop.eup %4916  ;;  %v3064_v1 = vadd.f32 %v6374_v29, %v3063_v48  ;;  %v4187_v22 = vor.u32 %v4640_v63, %v4184_v56  ;;  %1749 = vmatmul.bf16.gmra.mxu2 %v5786_v12  ;;  %3823 = vst [vmem:[%s5891_s29 + $0x158] sm:$0xff] %v2998_v15  ;;  %v3086_v27 = vand.u32 2147483648, %v6370_v10  ;;  %v3159_v44 = vand.u32 2147483647, %v6403_v53 }
 0x278   : > { %v3076_v42 = vmul.f32 %v6424_v57, %v6370_v10  ;;  %v4919_v28 = vpop.eup %4918  ;;  %v6455_v52 = vadd.f32 %v6247_v39, %v5804_v17  ;;  %v4561_v41 = vmul.f32 -1.442695, %v1550_v0  ;;  %v1454_v11 = vadd.f32 %v6335_v62, %v6283_v5 }
 0x279   : > { %v6432_v4 = vpop.f32.mrf.mxu3  ;;  %v3068_v45 = vsel %vm6439_vm3, %v6374_v29, %v3064_v1  ;;  %1863 = vmatpush.bf16.msrb.mxu1 %v4187_v22  ;;  %v4921_v6 = vpop.eup %4920  ;;  %v6463_v48 = vadd.f32 1.0, %v4919_v28  ;;  %v4375_v29 = vor.u32 %v4691_v55, %v4374_v36  ;;  %v4159_v62 = vor.u32 %v4637_v35, %v4158_v49  ;;  %v4634_v22 = vld [vmem:[#allocation8 + $0x44] sm:$0xf]  ;;  %v4160_v49 = vld [vmem:[#allocation8 + $0x58] sm:$0xf0] }
 0x27a   : > { %v6448_v9 = vpop.f32.mrf.mxu2  ;;  %v3073_v63 = vsel %vm6416_vm2, %v3072_v43, %v3068_v45  ;;  %v3077_v56 = vsub.f32 1.0, %v3076_v42  ;;  %v4923_v39 = vpop.eup %4922  ;;  %v6468_v15 = vadd.f32 1.0, %v4921_v6  ;;  %4924 = vpow2.f32 %v4561_v41  ;;  %v4631_v36 = vld [vmem:[#allocation8 + $0x24] sm:$0xf0] }
 0x27b   : > { %v6459_v25 = vpop.f32.mrf.mxu0  ;;  %3828 = vst [vmem:[%s5891_s29 + $0x180] sm:$0xff] %v3073_v63  ;;  %v4566_v5 = vmul.f32 -1.442695, %v1454_v11  ;;  %vm3081_vm4 = vweird.f32 %v6424_v57  ;;  %v3151_v54 = vmul.f32 %v4923_v39, %v6403_v53  ;;  %4926 = vrcp.f32 %v6463_v48  ;;  %1814 = vmatpush.bf16.msrb.mxu0 %v4375_v29  ;;  %1766 = vmatpush.bf16.msrb.mxu3 %v4159_v62  ;;  %v4134_v11 = vld [vmem:[#allocation8 + $0x10] sm:$0xf] }
 0x27c   : > { %v6465_v21 = vpop.f32.mrf.mxu1  ;;  %v3078_v1 = vmul.f32 %v6424_v57, %v3077_v56  ;;  %vm3080_vm5 = vweird.f32 %v6370_v10  ;;  %v3161_v43 = vand.u32 2147483648, %v6403_v53  ;;  %4928 = vrcp.f32 %v6468_v15  ;;  %v4136_v10 = vld [vmem:[#allocation8 + $0x28] sm:$0xf0] }
 0x27d   : > { %v6479_v0 = vadd.f32 %v6270_v30, %v5811_v46  ;;  %vm6482_vm6 = vcmp.eq.f32.partialorder %v3084_v50, 8.507059e+37  ;;  %v3087_v42 = vor.u32 1.1754944e-38, %v3086_v27  ;;  %v3152_v28 = vsub.f32 1.0, %v3151_v54  ;;  %vm3082_vm7 = vmor %vm3080_vm5, %vm3081_vm4 }
 0x27e   : > { %v3079_v35 = vadd.f32 %v6424_v57, %v3078_v1  ;;  %vm3155_vm8 = vweird.f32 %v6403_v53  ;;  %vm6489_vm9 = vcmp.eq.f32.partialorder %v3159_v44, 8.507059e+37  ;;  %v6495_v30 = vadd.f32 %v6318_v8, %v5804_v17 }
 0x27f   : > { %4930 = vpow2.f32 %v4566_v5  ;;  %v3153_v45 = vmul.f32 %v4923_v39, %v3152_v28  ;;  %vm3156_vm10 = vweird.f32 %v4923_v39  ;;  %v4163_v41 = vor.u32 %v4634_v22, %v4160_v49 }
 0x280   : > { %v3083_v27 = vsel %vm3082_vm7, %v6424_v57, %v3079_v35  ;;  %v4925_v44 = vpop.eup %4924  ;;  %v3162_v63 = vor.u32 1.1754944e-38, %v3161_v43  ;;  %v6506_v8 = vadd.f32 %v6344_v23, %v5811_v46  ;;  %v1552_v56 = vadd.f32 %v6382_v14, %v6279_v37  ;;  %vm3157_vm12 = vmor %vm3155_vm8, %vm3156_vm10 }
 0x281   : > { %v6497_v50 = vpop.f32.mrf.mxu3  ;;  %v3088_v6 = vsel %vm6482_vm6, %v3087_v42, %v3083_v27  ;;  %v6512_v29 = vpop.eup %4926  ;;  %v3154_v5 = vadd.f32 %v4923_v39, %v3153_v45  ;;  %vm3170_vm11 = vweird.f32 %v6463_v48  ;;  %v3174_v62 = vand.u32 2147483647, %v6463_v48  ;;  %1864 = vmatpush.bf16.msrb.mxu1 %v4163_v41 }
 0x282   : > { %v6500_v55 = vpop.f32.mrf.mxu2  ;;  %3829 = vst [vmem:[%s5891_s29 + $0x188] sm:$0xff] %v3088_v6  ;;  %v6517_v1 = vadd.f32 1.0, %v4925_v44  ;;  %v6521_v46 = vpop.eup %4928  ;;  %v3166_v37 = vmul.f32 %v6512_v29, %v6463_v48  ;;  %v4567_v23 = vmul.f32 -1.442695, %v1552_v56  ;;  %v1457_v14 = vadd.f32 %v6389_v13, %v6333_v47  ;;  %v4628_v47 = vld [vmem:[#allocation8 + $0x14] sm:$0xf] }
 0x283   : > { %v6510_v57 = vpop.f32.mrf.mxu0  ;;  %v4135_v43 = vor.u32 %v4631_v36, %v4134_v11  ;;  %v3158_v22 = vsel %vm3157_vm12, %v4923_v39, %v3154_v5  ;;  %v3176_v49 = vand.u32 2147483648, %v6463_v48  ;;  %v3241_v35 = vmul.f32 %v6521_v46, %v6468_v15  ;;  %v4682_v36 = vld [vmem:[#allocation8 + $0x1c4] sm:$0xf]  ;;  %v4352_v44 = vld [vmem:[#allocation8 + $0x1d8] sm:$0xf0] }
 0x284   : > { %v6519_v54 = vpop.f32.mrf.mxu1  ;;  %4932 = vrcp.f32 %v6517_v1  ;;  %v3163_v53 = vsel %vm6489_vm9, %v3162_v63, %v3158_v22  ;;  %v3167_v42 = vsub.f32 1.0, %v3166_v37  ;;  %v3249_v28 = vand.u32 2147483647, %v6468_v15 }
 0x285   : > { %v4931_v26 = vpop.eup %4930  ;;  %v3251_v27 = vand.u32 2147483648, %v6468_v15  ;;  %1767 = vmatpush.bf16.msrb.mxu3 %v4135_v43  ;;  %3834 = vst [vmem:[%s5891_s29 + $0x1b0] sm:$0xff] %v3163_v53  ;;  %vm6540_vm13 = vcmp.eq.f32.partialorder %v3174_v62, 8.507059e+37  ;;  %v3242_v39 = vsub.f32 1.0, %v3241_v35  ;;  %4934 = vpow2.f32 %v4567_v23 }
 0x286   : > { %1656 = vmatmul.bf16.gmra.mxu0 %v5796_v24  ;;  %v6544_v45 = vadd.f32 1.0, %v4931_v26  ;;  %v3168_v41 = vmul.f32 %v6512_v29, %v3167_v42  ;;  %vm3171_vm14 = vweird.f32 %v6512_v29  ;;  %vm3245_vm15 = vweird.f32 %v6468_v15 }
 0x287   : > { %v4572_v11 = vmul.f32 -1.442695, %v1457_v14  ;;  %1754 = vmatmul.bf16.gmra.mxu2 %v5796_v24  ;;  %v3177_v63 = vor.u32 1.1754944e-38, %v3176_v49  ;;  %v3243_v56 = vmul.f32 %v6521_v46, %v3242_v39  ;;  %vm3246_vm0 = vweird.f32 %v6521_v46  ;;  %vm6571_vm2 = vmor %vm3170_vm11, %vm3171_vm14  ;;  %v4685_v39 = vld [vmem:[#allocation8 + $0x1d4] sm:$0xf0] }
 0x288   : > { %4936 = vrcp.f32 %v6544_v45  ;;  %1768 = vmatmul.bf16.vlgmr.msrb.gmra.mxu3 %v5693_v51  ;;  %v3169_v62 = vadd.f32 %v6512_v29, %v3168_v41  ;;  %vm6559_vm1 = vcmp.eq.f32.partialorder %v3249_v28, 8.507059e+37  ;;  %v3252_v23 = vor.u32 1.1754944e-38, %v3251_v27  ;;  %vm6587_vm3 = vmor %vm3245_vm15, %vm3246_vm0 }
 0x289   : > { %v6550_v6 = vpop.f32.mrf.mxu3  ;;  %4938 = vpow2.f32 %v4572_v11  ;;  %v3244_v49 = vadd.f32 %v6521_v46, %v3243_v56  ;;  %v4139_v35 = vor.u32 %v4628_v47, %v4136_v10  ;;  %v4355_v26 = vor.u32 %v4682_v36, %v4352_v44 }
 0x28a   : > { %v6556_v5 = vpop.f32.mrf.mxu2  ;;  %v6565_v43 = vpop.eup %4932  ;;  %v1555_v53 = vadd.f32 %v6448_v9, %v6302_v18  ;;  %v3173_v28 = vsel %vm6571_vm2, %v6512_v29, %v3169_v62  ;;  %v6595_v18 = vadd.f32 %v6372_v16, %v5804_v17  ;;  %v5228_v9 = vld [vmem:[#allocation10] sm:$0x3f]  ;;  %v3264_v11 = vand.u32 2147483647, %v6517_v1 }
 0x28b   : > { %v6563_v14 = vpop.f32.mrf.mxu0  ;;  %v3256_v27 = vmul.f32 %v6565_v43, %v6517_v1  ;;  %v6597_v47 = vperm.slane %v5228_v9, 3  ;;  %v4350_v29 = vld [vmem:[#allocation8 + $0x1c0] sm:$0xf]  ;;  %v4935_v10 = vpop.eup %4934  ;;  %v3178_v15 = vsel %vm6540_vm13, %v3177_v63, %v3173_v28  ;;  %v3248_v41 = vsel %vm6587_vm3, %v6521_v46, %v3244_v49  ;;  %1865 = vmatpush.bf16.msrb.mxu1 %v4139_v35  ;;  %1913 = vmatpush.bf16.msrb.mxu2 %v4355_v26 }
 0x28c   : > { %v6578_v42 = vpop.f32.mrf.mxu1  ;;  %v4573_v17 = vmul.f32 -1.442695, %v1555_v53  ;;  %3835 = vst [vmem:[%s5891_s29 + $0x1b8] sm:$0xff] %v3178_v15  ;;  %v3253_v16 = vsel %vm6559_vm1, %v3252_v23, %v3248_v41  ;;  %v3266_v44 = vand.u32 2147483648, %v6517_v1  ;;  %v6609_v56 = vadd.f32 1.0, %v4935_v10 }
 0x28d   : > { %v3257_v36 = vsub.f32 1.0, %v3256_v27  ;;  %3840 = vst [vmem:[%s5891_s29 + $0x1e0] sm:$0xff] %v3253_v16  ;;  %v3339_v63 = vand.u32 2147483647, %v6544_v45  ;;  %v1459_v46 = vadd.f32 %v6459_v25, %v6455_v52  ;;  %v4351_v62 = vor.u32 %v4685_v39, %v4350_v29 }
 0x28e   : > { %v4937_v13 = vpop.eup %4936  ;;  %4940 = vpow2.f32 %v4573_v17  ;;  %vm3261_vm4 = vweird.f32 %v6565_v43  ;;  %1866 = vmatmul.bf16.vlgmr.msrb.gmra.mxu1 %v5693_v51  ;;  %vm3260_vm5 = vweird.f32 %v6517_v1  ;;  %vm6623_vm6 = vcmp.eq.f32.partialorder %v3264_v11, 8.507059e+37 }
 0x28f   : > { %v4939_v22 = vpop.eup %4938  ;;  %v3258_v49 = vmul.f32 %v6565_v43, %v3257_v36  ;;  %v3331_v37 = vmul.f32 %v4937_v13, %v6544_v45  ;;  %4942 = vrcp.f32 %v6609_v56  ;;  %v6631_v25 = vadd.f32 %v6396_v19, %v6597_v47  ;;  %1815 = vmatpush.bf16.msrb.mxu0 %v4351_v62  ;;  %vm3262_vm7 = vmor %vm3260_vm5, %vm3261_vm4 }
 0x290   : > { %v6627_v52 = vadd.f32 1.0, %v4939_v22  ;;  %v3341_v28 = vand.u32 2147483648, %v6544_v45  ;;  %v4578_v48 = vmul.f32 -1.442695, %v1459_v46  ;;  %v3267_v27 = vor.u32 1.1754944e-38, %v3266_v44 }
 0x291   : > { %v6620_v23 = vpop.f32.mrf.mxu3  ;;  %v3259_v53 = vadd.f32 %v6565_v43, %v3258_v49  ;;  %v3332_v51 = vsub.f32 1.0, %v3331_v37  ;;  %vm3335_vm8 = vweird.f32 %v6544_v45  ;;  %vm6642_vm9 = vcmp.eq.f32.partialorder %v3339_v63, 8.507059e+37  ;;  %v4676_v49 = vld [vmem:[#allocation8 + $0x194] sm:$0xf]  ;;  %v4328_v37 = vld [vmem:[#allocation8 + $0x1a8] sm:$0xf0] }
 0x292   : > { %v6633_v26 = vpop.f32.mrf.mxu2  ;;  %4944 = vrcp.f32 %v6627_v52  ;;  %vm3336_vm10 = vweird.f32 %v4937_v13  ;;  %v6648_v10 = vperm.slane %v5228_v9, 2  ;;  %v3354_v11 = vand.u32 2147483647, %v6609_v56 }
 0x293   : > { %v6637_v1 = vpop.f32.mrf.mxu0  ;;  %v3263_v29 = vsel %vm3262_vm7, %v6565_v43, %v3259_v53  ;;  %v3333_v39 = vmul.f32 %v4937_v13, %v3332_v51  ;;  %4946 = vpow2.f32 %v4578_v48  ;;  %v1557_v17 = vadd.f32 %v6500_v55, %v6422_v20  ;;  %vm3337_vm11 = vmor %vm3335_vm8, %vm3336_vm10 }
 0x294   : > { %v4941_v15 = vpop.eup %4940  ;;  %v3268_v41 = vsel %vm6623_vm6, %v3267_v27, %v3263_v29  ;;  %v6655_v16 = vpop.f32.mrf.mxu1  ;;  %v3342_v43 = vor.u32 1.1754944e-38, %v3341_v28  ;;  %v3356_v63 = vand.u32 2147483648, %v6609_v56  ;;  %v6666_v62 = vadd.f32 %v6465_v21, %v6597_v47 }
 0x295   : > { %v4943_v36 = vpop.eup %4942  ;;  %3841 = vst [vmem:[%s5891_s29 + $0x1e8] sm:$0xff] %v3268_v41  ;;  %v3334_v44 = vadd.f32 %v4937_v13, %v3333_v39  ;;  %v6659_v9 = vadd.f32 1.0, %v4941_v15  ;;  %v4579_v20 = vmul.f32 -1.442695, %v1557_v17  ;;  %v1462_v55 = vadd.f32 %v6510_v57, %v6495_v30 }
 0x296   : > { %v3346_v46 = vmul.f32 %v4943_v36, %v6609_v56  ;;  %vm3350_vm12 = vweird.f32 %v6609_v56  ;;  %v6674_v45 = vadd.f32 %v6432_v4, %v6648_v10  ;;  %vm6682_vm13 = vcmp.eq.f32.partialorder %v3354_v11, 8.507059e+37 }
 0x297   : > { %v3338_v22 = vsel %vm3337_vm11, %v4937_v13, %v3334_v44  ;;  %4948 = vrcp.f32 %v6659_v9  ;;  %v3357_v4 = vor.u32 1.1754944e-38, %v3356_v63  ;;  %v3429_v28 = vand.u32 2147483647, %v6627_v52 }
 0x298   : > { %v6678_v21 = vpop.eup %4944  ;;  %v3343_v53 = vsel %vm6642_vm9, %v3342_v43, %v3338_v22  ;;  %v3347_v51 = vsub.f32 1.0, %v3346_v46  ;;  %4950 = vpow2.f32 %v4579_v20  ;;  %1773 = vmatmul.bf16.gmra.mxu3 %v5701_v7  ;;  %v4584_v48 = vmul.f32 -1.442695, %v1462_v55  ;;  %v4326_v22 = vld [vmem:[#allocation8 + $0x190] sm:$0xf] }
 0x299   : > { %v6676_v35 = vpop.f32.mrf.mxu3  ;;  %3846 = vst [vmem:[%s5891_s29 + $0x210] sm:$0xff] %v3343_v53  ;;  %v3421_v13 = vmul.f32 %v6678_v21, %v6627_v52  ;;  %v4947_v19 = vpop.eup %4946  ;;  %vm3351_vm14 = vweird.f32 %v4943_v36  ;;  %v3431_v39 = vand.u32 2147483648, %v6627_v52  ;;  %v4331_v15 = vor.u32 %v4676_v49, %v4328_v37 }
 0x29a   : > { %v6687_v57 = vpop.f32.mrf.mxu2  ;;  %v3348_v29 = vmul.f32 %v4943_v36, %v3347_v51  ;;  %vm3425_vm15 = vweird.f32 %v6627_v52  ;;  %v6697_v11 = vadd.f32 1.0, %v4947_v19  ;;  %4952 = vpow2.f32 %v4584_v48  ;;  %vm3352_vm0 = vmor %vm3350_vm12, %vm3351_vm14 }
 0x29b   : > { %v6693_v27 = vpop.f32.mrf.mxu0  ;;  %v3422_v41 = vsub.f32 1.0, %v3421_v13  ;;  %v3444_v44 = vand.u32 2147483647, %v6659_v9  ;;  %v6702_v43 = vadd.f32 %v6497_v50, %v6648_v10  ;;  %1914 = vmatpush.bf16.msrb.mxu2 %v4331_v15  ;;  %v1560_v63 = vadd.f32 %v6556_v5, %v6479_v0  ;;  %v4679_v50 = vld [vmem:[#allocation8 + $0x1a4] sm:$0xf0] }
 0x29c   : > { %v3349_v17 = vadd.f32 %v4943_v36, %v3348_v29  ;;  %vm3426_vm1 = vweird.f32 %v6678_v21  ;;  %v3446_v55 = vand.u32 2147483648, %v6659_v9  ;;  %4954 = vrcp.f32 %v6697_v11  ;;  %v6717_v56 = vpop.f32.mrf.mxu1 }
 0x29d   : > { %v4949_v46 = vpop.eup %4948  ;;  %v3423_v20 = vmul.f32 %v6678_v21, %v3422_v41  ;;  %vm6712_vm2 = vcmp.eq.f32.partialorder %v3429_v28, 8.507059e+37  ;;  %v3432_v0 = vor.u32 1.1754944e-38, %v3431_v39  ;;  %vm3427_vm3 = vmor %vm3425_vm15, %vm3426_vm1  ;;  %vm3440_vm4 = vweird.f32 %v6659_v9 }
 0x29e   : > { %v4951_v49 = vpop.eup %4950  ;;  %v3353_v37 = vsel %vm3352_vm0, %v4943_v36, %v3349_v17  ;;  %v3436_v5 = vmul.f32 %v4949_v46, %v6659_v9  ;;  %1871 = vmatmul.bf16.gmra.mxu1 %v5701_v7  ;;  %v1464_v36 = vadd.f32 %v6563_v14, %v6595_v18  ;;  %1915 = vmatmul.bf16.vlgmr.msrb.gmra.mxu2 %v5716_v40  ;;  %vm6739_vm5 = vcmp.eq.f32.partialorder %v3444_v44, 8.507059e+37 }
 0x29f   : > { %v3358_v51 = vsel %vm6682_vm13, %v3357_v4, %v3353_v37  ;;  %v3424_v13 = vadd.f32 %v6678_v21, %v3423_v20  ;;  %v6722_v48 = vadd.f32 1.0, %v4951_v49  ;;  %v4585_v4 = vmul.f32 -1.442695, %v1560_v63 }
 0x2a0   : > { %3847 = vst [vmem:[%s5891_s29 + $0x218] sm:$0xff] %v3358_v51  ;;  %v3437_v30 = vsub.f32 1.0, %v3436_v5  ;;  %v4327_v19 = vor.u32 %v4679_v50, %v4326_v22  ;;  %v4953_v29 = vpop.eup %4952  ;;  %v3447_v39 = vor.u32 1.1754944e-38, %v3446_v55  ;;  %vm3441_vm6 = vweird.f32 %v4949_v46 }
 0x2a1   : > { %v6728_v28 = vpop.f32.mrf.mxu3  ;;  %v3428_v14 = vsel %vm3427_vm3, %v6678_v21, %v3424_v13  ;;  %4956 = vrcp.f32 %v6722_v48  ;;  %v6748_v17 = vadd.f32 1.0, %v4953_v29  ;;  %v3519_v21 = vand.u32 2147483647, %v6697_v11  ;;  %vm3442_vm7 = vmor %vm3440_vm4, %vm3441_vm6 }
 0x2a2   : > { %v6736_v7 = vpop.f32.mrf.mxu2  ;;  %v3433_v15 = vsel %vm6712_vm2, %v3432_v0, %v3428_v14  ;;  %v3438_v41 = vmul.f32 %v4949_v46, %v3437_v30  ;;  %1816 = vmatpush.bf16.msrb.mxu0 %v4327_v19  ;;  %v4955_v63 = vpop.eup %4954  ;;  %4958 = vpow2.f32 %v4585_v4  ;;  %v4590_v44 = vmul.f32 -1.442695, %v1464_v36 }
 0x2a3   : > { %v6744_v52 = vpop.f32.mrf.mxu0  ;;  %3852 = vst [vmem:[%s5891_s29 + $0x240] sm:$0xff] %v3433_v15  ;;  %v1562_v20 = vadd.f32 %v6633_v26, %v6506_v8  ;;  %v3511_v22 = vmul.f32 %v4955_v63, %v6697_v11  ;;  %v6757_v50 = vadd.f32 %v6519_v54, %v6597_v47  ;;  %v6761_v49 = vadd.f32 %v6550_v6, %v6648_v10 }
 0x2a4   : > { %v3439_v55 = vadd.f32 %v4949_v46, %v3438_v41  ;;  %v3521_v37 = vand.u32 2147483648, %v6697_v11  ;;  %v3534_v53 = vand.u32 2147483647, %v6722_v48  ;;  %4960 = vrcp.f32 %v6748_v17  ;;  %v6786_v13 = vpop.f32.mrf.mxu1 }
 0x2a5   : > { %v6770_v8 = vadd.f32 %v6578_v42, %v6597_v47  ;;  %1817 = vmatmul.bf16.vlgmr.msrb.gmra.mxu0 %v5716_v40  ;;  %v3512_v26 = vsub.f32 1.0, %v3511_v22  ;;  %4962 = vpow2.f32 %v4590_v44  ;;  %v4591_v6 = vmul.f32 -1.442695, %v1562_v20 }
 0x2a6   : > { %v3443_v54 = vsel %vm3442_vm7, %v4949_v46, %v3439_v55  ;;  %vm3515_vm8 = vweird.f32 %v6697_v11  ;;  %vm6776_vm9 = vcmp.eq.f32.partialorder %v3519_v21, 8.507059e+37  ;;  %v3536_v51 = vand.u32 2147483648, %v6722_v48 }
 0x2a7   : > { %v4957_v0 = vpop.eup %4956  ;;  %v3448_v9 = vsel %vm6739_vm5, %v3447_v39, %v3443_v54  ;;  %v3513_v40 = vmul.f32 %v4955_v63, %v3512_v26  ;;  %vm3516_vm10 = vweird.f32 %v4955_v63  ;;  %4964 = vpow2.f32 %v4591_v6 }
 0x2a8   : > { %3853 = vst [vmem:[%s5891_s29 + $0x248] sm:$0xff] %v3448_v9  ;;  %v3526_v46 = vmul.f32 %v4957_v0, %v6722_v48  ;;  %1778 = vmatmul.bf16.gmra.mxu3 %v5714_v38  ;;  %v4959_v30 = vpop.eup %4958  ;;  %v3522_v4 = vor.u32 1.1754944e-38, %v3521_v37  ;;  %vm3530_vm11 = vweird.f32 %v6722_v48  ;;  %vm6791_vm12 = vcmp.eq.f32.partialorder %v3534_v53, 8.507059e+37  ;;  %vm3517_vm13 = vmor %vm3515_vm8, %vm3516_vm10 }
 0x2a9   : > { %v6781_v42 = vpop.f32.mrf.mxu3  ;;  %v1623_v29 = vadd.f32 %v6637_v1, %v6674_v45  ;;  %v3514_v18 = vadd.f32 %v4955_v63, %v3513_v40  ;;  %v3609_v15 = vand.u32 2147483647, %v6748_v17  ;;  %v6800_v41 = vadd.f32 1.0, %v4959_v30 }
 0x2aa   : > { %v6788_v36 = vpop.f32.mrf.mxu2  ;;  %v3527_v39 = vsub.f32 1.0, %v3526_v46  ;;  %v4961_v21 = vpop.eup %4960  ;;  %v3537_v44 = vor.u32 1.1754944e-38, %v3536_v51  ;;  %vm3605_vm14 = vweird.f32 %v6748_v17  ;;  %v1721_v1 = vadd.f32 %v6687_v57, %v6631_v25 }
 0x2ab   : > { %v6797_v14 = vpop.f32.mrf.mxu0  ;;  %v4502_v20 = vmul.f32 -1.442695, %v1623_v29  ;;  %v4963_v45 = vpop.eup %4962  ;;  %v3518_v55 = vsel %vm3517_vm13, %v4955_v63, %v3514_v18  ;;  %vm3531_vm15 = vweird.f32 %v4957_v0  ;;  %v3601_v37 = vmul.f32 %v4961_v21, %v6748_v17 }
 0x2ac   : > { %v3528_v22 = vmul.f32 %v4957_v0, %v3527_v39  ;;  %v3523_v53 = vsel %vm6776_vm9, %v3522_v4, %v3518_v55  ;;  %v3611_v11 = vand.u32 2147483648, %v6748_v17  ;;  %4966 = vrcp.f32 %v6800_v41  ;;  %vm3532_vm1 = vmor %vm3530_vm11, %vm3531_vm15  ;;  %v6849_v39 = vpop.f32.mrf.mxu1 }
 0x2ad   : > { %v1625_v54 = vadd.f32 %v6693_v27, %v6702_v43  ;;  %v4965_v26 = vpop.eup %4964  ;;  %3858 = vst [vmem:[%s5891_s29 + $0x270] sm:$0xff] %v3523_v53  ;;  %v3602_v25 = vsub.f32 1.0, %v3601_v37  ;;  %vm6816_vm0 = vcmp.eq.f32.partialorder %v3609_v15, 8.507059e+37  ;;  %v6820_v63 = vadd.f32 1.0, %v4963_v45 }
 0x2ae   : > { %v3529_v6 = vadd.f32 %v4957_v0, %v3528_v22  ;;  %vm3606_vm2 = vweird.f32 %v4961_v21  ;;  %v6824_v9 = vadd.f32 1.0, %v4965_v26  ;;  %4968 = vpow2.f32 %v4502_v20  ;;  %1876 = vmatmul.bf16.gmra.mxu1 %v5714_v38  ;;  %1920 = vmatmul.bf16.gmra.mxu2 %v5729_v3 }
 0x2af   : > { %v4503_v27 = vmul.f32 -1.442695, %v1721_v1  ;;  %v3603_v5 = vmul.f32 %v4961_v21, %v3602_v25  ;;  %v3624_v51 = vand.u32 2147483647, %v6800_v41  ;;  %4970 = vrcp.f32 %v6820_v63  ;;  %vm3607_vm3 = vmor %vm3605_vm14, %vm3606_vm2 }
 0x2b0   : > { %v3533_v43 = vsel %vm3532_vm1, %v4957_v0, %v3529_v6  ;;  %v3612_v46 = vor.u32 1.1754944e-38, %v3611_v11  ;;  %v6836_v30 = vadd.f32 %v6620_v23, %v6648_v10  ;;  %v4508_v38 = vmul.f32 -1.442695, %v1625_v54 }
 0x2b1   : > { %v3538_v48 = vsel %vm6791_vm12, %v3537_v44, %v3533_v43  ;;  %v6838_v4 = vpop.f32.mrf.mxu3  ;;  %v3604_v0 = vadd.f32 %v4961_v21, %v3603_v5  ;;  %v3626_v18 = vand.u32 2147483648, %v6800_v41  ;;  %4972 = vrcp.f32 %v6824_v9 }
 0x2b2   : > { %v6830_v40 = vpop.f32.mrf.mxu2  ;;  %3859 = vst [vmem:[%s5891_s29 + $0x278] sm:$0xff] %v3538_v48  ;;  %v6847_v19 = vadd.f32 %v6655_v16, %v6597_v47  ;;  %v4967_v15 = vpop.eup %4966  ;;  %v6856_v23 = vadd.f32 %v6676_v35, %v6648_v10  ;;  %4974 = vpow2.f32 %v4503_v27  ;;  %v6860_v44 = vadd.f32 %v6717_v56, %v6597_v47 }
 0x2b3   : > { %v6840_v29 = vpop.f32.mrf.mxu0  ;;  %v6864_v16 = vadd.f32 %v6728_v28, %v6648_v10  ;;  %v3608_v20 = vsel %vm3607_vm3, %v4961_v21, %v3604_v0  ;;  %v3616_v1 = vmul.f32 %v4967_v15, %v6800_v41  ;;  %vm3620_vm4 = vweird.f32 %v6800_v41 }
 0x2b4   : > { %vm6868_vm5 = vcmp.eq.f32.partialorder %v3624_v51, 8.507059e+37  ;;  %v4969_v35 = vpop.eup %4968  ;;  %v3613_v45 = vsel %vm6816_vm0, %v3612_v46, %v3608_v20  ;;  %v3699_v56 = vand.u32 2147483647, %v6820_v63  ;;  %4976 = vpow2.f32 %v4508_v38 }
 0x2b5   : > { %v1723_v28 = vadd.f32 %v6736_v7, %v6666_v62  ;;  %1822 = vmatmul.bf16.gmra.mxu0 %v5729_v3  ;;  %v4971_v21 = vpop.eup %4970  ;;  %3864 = vst [vmem:[%s5891_s29 + $0x2a0] sm:$0xff] %v3613_v45  ;;  %v3617_v55 = vsub.f32 1.0, %v3616_v1  ;;  %v3627_v22 = vor.u32 1.1754944e-38, %v3626_v18  ;;  %vm3695_vm6 = vweird.f32 %v6820_v63  ;;  %v6912_v45 = vpop.f32.mrf.mxu1 }
 0x2b6   : > { %v6880_v37 = vadd.f32 1.0, %v4969_v35  ;;  %v3691_v53 = vmul.f32 %v4971_v21, %v6820_v63  ;;  %v3701_v11 = vand.u32 2147483648, %v6820_v63  ;;  %v1628_v26 = vadd.f32 %v6744_v52, %v6761_v49 }
 0x2b7   : > { %v4509_v54 = vmul.f32 -1.442695, %v1723_v28  ;;  %v4973_v6 = vpop.eup %4972  ;;  %v3618_v62 = vmul.f32 %v4967_v15, %v3617_v55  ;;  %vm3621_vm7 = vweird.f32 %v4967_v15  ;;  %v3714_v3 = vand.u32 2147483647, %v6824_v9 }
 0x2b8   : > { %4978 = vrcp.f32 %v6880_v37  ;;  %1783 = vmatmul.bf16.gmra.mxu3 %v5727_v2  ;;  %v4975_v25 = vpop.eup %4974  ;;  %v3692_v57 = vsub.f32 1.0, %v3691_v53  ;;  %vm6891_vm8 = vcmp.eq.f32.partialorder %v3699_v56, 8.507059e+37  ;;  %v3706_v43 = vmul.f32 %v4973_v6, %v6824_v9  ;;  %vm3622_vm10 = vmor %vm3620_vm4, %vm3621_vm7 }
 0x2b9   : > { %vm3710_vm9 = vweird.f32 %v6824_v9  ;;  %v3619_v49 = vadd.f32 %v4967_v15, %v3618_v62  ;;  %v3716_v5 = vand.u32 2147483648, %v6824_v9  ;;  %v6900_v51 = vadd.f32 1.0, %v4975_v25  ;;  %v6905_v18 = vpop.f32.mrf.mxu3 }
 0x2ba   : > { %v6889_v7 = vpop.f32.mrf.mxu2  ;;  %4980 = vpow2.f32 %v4509_v54  ;;  %v4977_v48 = vpop.eup %4976  ;;  %v3693_v46 = vmul.f32 %v4971_v21, %v3692_v57  ;;  %vm3696_vm11 = vweird.f32 %v4971_v21  ;;  %v3707_v38 = vsub.f32 1.0, %v3706_v43 }
 0x2bb   : > { %v6897_v52 = vpop.f32.mrf.mxu0  ;;  %v4514_v0 = vmul.f32 -1.442695, %v1628_v26  ;;  %v3623_v20 = vsel %vm3622_vm10, %v4967_v15, %v3619_v49  ;;  %v3702_v1 = vor.u32 1.1754944e-38, %v3701_v11  ;;  %vm6907_vm12 = vcmp.eq.f32.partialorder %v3714_v3, 8.507059e+37  ;;  %vm3697_vm14 = vmor %vm3695_vm6, %vm3696_vm11 }
 0x2bc   : > { %4982 = vrcp.f32 %v6900_v51  ;;  %v3628_v41 = vsel %vm6868_vm5, %v3627_v22, %v3623_v20  ;;  %v3694_v56 = vadd.f32 %v4971_v21, %v3693_v46  ;;  %v3708_v28 = vmul.f32 %v4973_v6, %v3707_v38 }
 0x2bd   : > { %vm3711_vm13 = vweird.f32 %v4973_v6  ;;  %3865 = vst [vmem:[%s5891_s29 + $0x2a8] sm:$0xff] %v3628_v41  ;;  %v6920_v15 = vadd.f32 1.0, %v4977_v48  ;;  %4984 = vpow2.f32 %v4514_v0  ;;  %v6924_v53 = vadd.f32 %v6786_v13, %v6597_v47 }
 0x2be   : > { %v4979_v55 = vpop.eup %4978  ;;  %v1726_v17 = vadd.f32 %v6788_v36, %v6757_v50  ;;  %v3698_v22 = vsel %vm3697_vm14, %v4971_v21, %v3694_v56  ;;  %v3709_v11 = vadd.f32 %v4973_v6, %v3708_v28  ;;  %v3717_v54 = vor.u32 1.1754944e-38, %v3716_v5  ;;  %1881 = vmatmul.bf16.gmra.mxu1 %v5727_v2  ;;  %1925 = vmatmul.bf16.gmra.mxu2 %v5742_v33  ;;  %vm3712_vm15 = vmor %vm3710_vm9, %vm3711_vm13 }
 0x2bf   : > { %v2371_v26 = vmul.f32 %v4979_v55, %v6880_v37  ;;  %v3703_v62 = vsel %vm6891_vm8, %v3702_v1, %v3698_v22  ;;  %v2379_v50 = vand.u32 2147483647, %v6880_v37  ;;  %v2381_v13 = vand.u32 2147483648, %v6880_v37 }
 0x2c0   : > { %v4981_v63 = vpop.eup %4980  ;;  %4986 = vrcp.f32 %v6920_v15  ;;  %3870 = vst [vmem:[%s5891_s29 + $0x2d0] sm:$0xff] %v3703_v62  ;;  %v3713_v2 = vsel %vm3712_vm15, %v4973_v6, %v3709_v11  ;;  %v2394_v3 = vand.u32 2147483647, %v6900_v51  ;;  %v6945_v25 = vadd.f32 %v6781_v42, %v6648_v10 }
 0x2c1   : > { %v2372_v21 = vsub.f32 1.0, %v2371_v26  ;;  %v3718_v27 = vsel %vm6907_vm12, %v3717_v54, %v3713_v2  ;;  %v6951_v43 = vadd.f32 1.0, %v4981_v63  ;;  %v4515_v49 = vmul.f32 -1.442695, %v1726_v17  ;;  %v6968_v35 = vpop.f32.mrf.mxu3  ;;  %v6977_v17 = vpop.f32.mrf.mxu1 }
 0x2c2   : > { %v6939_v36 = vpop.f32.mrf.mxu2  ;;  %v4983_v57 = vpop.eup %4982  ;;  %v1630_v5 = vadd.f32 %v6797_v14, %v6836_v30  ;;  %3871 = vst [vmem:[%s5891_s29 + $0x2d8] sm:$0xff] %v3718_v27  ;;  %vm2375_vm0 = vweird.f32 %v6880_v37  ;;  %vm2376_vm1 = vweird.f32 %v4979_v55  ;;  %vm6958_vm2 = vcmp.eq.f32.partialorder %v2379_v50, 8.507059e+37 }
 0x2c3   : > { %v6947_v9 = vpop.f32.mrf.mxu0  ;;  %v2373_v6 = vmul.f32 %v4979_v55, %v2372_v21  ;;  %v2386_v42 = vmul.f32 %v4983_v57, %v6900_v51  ;;  %v4985_v48 = vpop.eup %4984  ;;  %v2382_v38 = vor.u32 1.1754944e-38, %v2381_v13  ;;  %v2396_v0 = vand.u32 2147483648, %v6900_v51  ;;  %vm2377_vm3 = vmor %vm2375_vm0, %vm2376_vm1 }
 0x2c4   : > { %4988 = vrcp.f32 %v6951_v43  ;;  %v2469_v14 = vand.u32 2147483647, %v6920_v15  ;;  %v6965_v30 = vadd.f32 1.0, %v4985_v48  ;;  %vm2390_vm4 = vweird.f32 %v6900_v51 }
 0x2c5   : > { %v2374_v20 = vadd.f32 %v4979_v55, %v2373_v6  ;;  %v2387_v1 = vsub.f32 1.0, %v2386_v42  ;;  %1827 = vmatmul.bf16.gmra.mxu0 %v5742_v33  ;;  %vm6973_vm5 = vcmp.eq.f32.partialorder %v2394_v3, 8.507059e+37  ;;  %4990 = vpow2.f32 %v4515_v49 }
 0x2c6   : > { %v4987_v41 = vpop.eup %4986  ;;  %v4520_v28 = vmul.f32 -1.442695, %v1630_v5  ;;  %vm2391_vm6 = vweird.f32 %v4983_v57  ;;  %v2397_v54 = vor.u32 1.1754944e-38, %v2396_v0  ;;  %v2471_v26 = vand.u32 2147483648, %v6920_v15 }
 0x2c7   : > { %v2378_v22 = vsel %vm2377_vm3, %v4979_v55, %v2374_v20  ;;  %v2388_v11 = vmul.f32 %v4983_v57, %v2387_v1  ;;  %v2461_v33 = vmul.f32 %v4987_v41, %v6920_v15  ;;  %4992 = vrcp.f32 %v6965_v30  ;;  %vm2392_vm9 = vmor %vm2390_vm4, %vm2391_vm6 }
 0x2c8   : > { %v2383_v37 = vsel %vm6958_vm2, %v2382_v38, %v2378_v22  ;;  %1788 = vmatmul.bf16.gmra.mxu3 %v5740_v31  ;;  %vm2465_vm7 = vweird.f32 %v6920_v15  ;;  %vm6989_vm8 = vcmp.eq.f32.partialorder %v2469_v14, 8.507059e+37  ;;  %v2484_v21 = vand.u32 2147483647, %v6951_v43 }
 0x2c9   : > { %3782 = vst [vmem:[%s5891_s29 + $0x10] sm:$0xff] %v2383_v37  ;;  %v2389_v62 = vadd.f32 %v4983_v57, %v2388_v11  ;;  %v2462_v50 = vsub.f32 1.0, %v2461_v33  ;;  %4994 = vpow2.f32 %v4520_v28  ;;  %v1728_v3 = vadd.f32 %v6830_v40, %v6770_v8  ;;  %v7022_v15 = vpop.f32.mrf.mxu3 }
 0x2ca   : > { %v6985_v63 = vpop.f32.mrf.mxu2  ;;  %v4989_v2 = vpop.eup %4988  ;;  %v1633_v27 = vadd.f32 %v6840_v29, %v6856_v23  ;;  %vm2466_vm10 = vweird.f32 %v4987_v41  ;;  %v2472_v51 = vor.u32 1.1754944e-38, %v2471_v26  ;;  %vm2480_vm11 = vweird.f32 %v6951_v43 }
 0x2cb   : > { %v6993_v13 = vpop.f32.mrf.mxu0  ;;  %v2393_v49 = vsel %vm2392_vm9, %v4983_v57, %v2389_v62  ;;  %v2463_v5 = vmul.f32 %v4987_v41, %v2462_v50  ;;  %v2476_v6 = vmul.f32 %v4989_v2, %v6951_v43  ;;  %v4991_v42 = vpop.eup %4990  ;;  %v4521_v46 = vmul.f32 -1.442695, %v1728_v3  ;;  %vm2467_vm12 = vmor %vm2465_vm7, %vm2466_vm10 }
 0x2cc   : > { %v2398_v48 = vsel %vm6973_vm5, %v2397_v54, %v2393_v49  ;;  %v2486_v8 = vand.u32 2147483648, %v6951_v43  ;;  %v7009_v40 = vadd.f32 1.0, %v4991_v42  ;;  %vm7013_vm13 = vcmp.eq.f32.partialorder %v2484_v21, 8.507059e+37 }
 0x2cd   : > { %3783 = vst [vmem:[%s5891_s29 + $0x18] sm:$0xff] %v2398_v48  ;;  %v2464_v38 = vadd.f32 %v4987_v41, %v2463_v5  ;;  %v2477_v0 = vsub.f32 1.0, %v2476_v6  ;;  %v4993_v29 = vpop.eup %4992  ;;  %4996 = vpow2.f32 %v4521_v46  ;;  %v4526_v57 = vmul.f32 -1.442695, %v1633_v27 }
 0x2ce   : > { %v1731_v20 = vadd.f32 %v6889_v7, %v6847_v19  ;;  %vm2481_vm14 = vweird.f32 %v4989_v2  ;;  %v2551_v56 = vmul.f32 %v4993_v29, %v6965_v30  ;;  %1886 = vmatmul.bf16.gmra.mxu1 %v5740_v31  ;;  %1930 = vmatmul.bf16.gmra.mxu2 %v5754_v61  ;;  %v2559_v11 = vand.u32 2147483647, %v6965_v30  ;;  %v7032_v7 = vpop.f32.mrf.mxu1 }
 0x2cf   : > { %v2468_v1 = vsel %vm2467_vm12, %v4987_v41, %v2464_v38  ;;  %v2478_v14 = vmul.f32 %v4989_v2, %v2477_v0  ;;  %v4995_v28 = vpop.eup %4994  ;;  %4998 = vrcp.f32 %v7009_v40  ;;  %v7030_v19 = vadd.f32 %v6849_v39, %v6597_v47  ;;  %vm2482_vm15 = vmor %vm2480_vm11, %vm2481_vm14 }
 0x2d0   : > { %v2473_v22 = vsel %vm6989_vm8, %v2472_v51, %v2468_v1  ;;  %v2487_v33 = vor.u32 1.1754944e-38, %v2486_v8  ;;  %v2552_v37 = vsub.f32 1.0, %v2551_v56  ;;  %v7037_v54 = vadd.f32 1.0, %v4995_v28 }
 0x2d1   : > { %3788 = vst [vmem:[%s5891_s29 + $0x40] sm:$0xff] %v2473_v22  ;;  %v2479_v31 = vadd.f32 %v4989_v2, %v2478_v14  ;;  %v2561_v26 = vand.u32 2147483648, %v6965_v30  ;;  %5000 = vpow2.f32 %v4526_v57  ;;  %v4527_v39 = vmul.f32 -1.442695, %v1731_v20  ;;  %v7088_v1 = vpop.f32.mrf.mxu3 }
 0x2d2   : > { %v7034_v41 = vpop.f32.mrf.mxu2  ;;  %v1635_v62 = vadd.f32 %v6897_v52, %v6864_v16  ;;  %v2553_v21 = vmul.f32 %v4993_v29, %v2552_v37  ;;  %vm2556_vm0 = vweird.f32 %v4993_v29  ;;  %5002 = vrcp.f32 %v7037_v54 }
 0x2d3   : > { %v7045_v50 = vpop.f32.mrf.mxu0  ;;  %v2483_v55 = vsel %vm2482_vm15, %v4989_v2, %v2479_v31  ;;  %v4997_v3 = vpop.eup %4996  ;;  %vm2555_vm1 = vweird.f32 %v6965_v30  ;;  %vm7051_vm2 = vcmp.eq.f32.partialorder %v2559_v11, 8.507059e+37  ;;  %v7057_v16 = vadd.f32 %v6838_v4, %v6648_v10 }
 0x2d4   : > { %v2488_v43 = vsel %vm7013_vm13, %v2487_v33, %v2483_v55  ;;  %v2554_v52 = vadd.f32 %v4993_v29, %v2553_v21  ;;  %v7060_v2 = vadd.f32 1.0, %v4997_v3  ;;  %5004 = vpow2.f32 %v4527_v39  ;;  %vm2557_vm3 = vmor %vm2555_vm1, %vm2556_vm0 }
 0x2d5   : > { %3789 = vst [vmem:[%s5891_s29 + $0x48] sm:$0xff] %v2488_v43  ;;  %v4532_v49 = vmul.f32 -1.442695, %v1635_v62  ;;  %1832 = vmatmul.bf16.gmra.mxu0 %v5754_v61  ;;  %v4999_v5 = vpop.eup %4998  ;;  %v2562_v6 = vor.u32 1.1754944e-38, %v2561_v26  ;;  %v2574_v30 = vand.u32 2147483647, %v7009_v40  ;;  %v7067_v4 = vadd.f32 %v6912_v45, %v6597_v47 }
 0x2d6   : > { %v2576_v42 = vand.u32 2147483648, %v7009_v40  ;;  %v2558_v48 = vsel %vm2557_vm3, %v4993_v29, %v2554_v52  ;;  %v2566_v51 = vmul.f32 %v4999_v5, %v7009_v40  ;;  %v2649_v46 = vand.u32 2147483647, %v7037_v54  ;;  %v7096_v28 = vpop.f32.mrf.mxu1 }
 0x2d7   : > { %5006 = vrcp.f32 %v7060_v2  ;;  %v5001_v61 = vpop.eup %5000  ;;  %v2563_v38 = vsel %vm7051_vm2, %v2562_v6, %v2558_v48  ;;  %vm2570_vm4 = vweird.f32 %v7009_v40  ;;  %v2651_v0 = vand.u32 2147483648, %v7037_v54 }
 0x2d8   : > { %v7078_v8 = vadd.f32 %v6905_v18, %v6648_v10  ;;  %1793 = vmatmul.bf16.gmra.mxu3 %v5752_v59  ;;  %v5003_v29 = vpop.eup %5002  ;;  %3794 = vst [vmem:[%s5891_s29 + $0x70] sm:$0xff] %v2563_v38  ;;  %v2567_v23 = vsub.f32 1.0, %v2566_v51  ;;  %v7084_v57 = vadd.f32 1.0, %v5001_v61  ;;  %5008 = vpow2.f32 %v4532_v49 }
 0x2d9   : > { %v1733_v20 = vadd.f32 %v6939_v36, %v6860_v44  ;;  %vm7090_vm5 = vcmp.eq.f32.partialorder %v2574_v30, 8.507059e+37  ;;  %v2577_v18 = vor.u32 1.1754944e-38, %v2576_v42  ;;  %v2641_v56 = vmul.f32 %v5003_v29, %v7037_v54 }
 0x2da   : > { %v7081_v45 = vpop.f32.mrf.mxu2  ;;  %vm2645_vm6 = vweird.f32 %v7037_v54  ;;  %v5005_v22 = vpop.eup %5004  ;;  %v2568_v11 = vmul.f32 %v4999_v5, %v2567_v23  ;;  %vm2571_vm7 = vweird.f32 %v4999_v5  ;;  %vm7098_vm8 = vcmp.eq.f32.partialorder %v2649_v46, 8.507059e+37 }
 0x2db   : > { %5010 = vrcp.f32 %v7084_v57  ;;  %v2642_v44 = vsub.f32 1.0, %v2641_v56  ;;  %v2652_v36 = vor.u32 1.1754944e-38, %v2651_v0  ;;  %v7103_v33 = vadd.f32 1.0, %v5005_v22  ;;  %v7109_v26 = vpop.f32.mrf.mxu0  ;;  %vm2572_vm9 = vmor %vm2570_vm4, %vm2571_vm7  ;;  %v7146_v23 = vpop.f32.mrf.mxu3 }
 0x2dc   : > { %v7107_v37 = vadd.f32 %v6977_v17, %v6597_v47  ;;  %v2569_v62 = vadd.f32 %v4999_v5, %v2568_v11  ;;  %v2664_v55 = vand.u32 2147483647, %v7060_v2  ;;  %v4533_v21 = vmul.f32 -1.442695, %v1733_v20 }
 0x2dd   : > { %v5007_v39 = vpop.eup %5006  ;;  %v1638_v3 = vadd.f32 %v6947_v9, %v6945_v25  ;;  %v2643_v43 = vmul.f32 %v5003_v29, %v2642_v44  ;;  %vm2646_vm10 = vweird.f32 %v5003_v29  ;;  %v7119_v17 = vadd.f32 %v6968_v35, %v6648_v10 }
 0x2de   : > { %v2656_v27 = vmul.f32 %v5007_v39, %v7060_v2  ;;  %v5009_v52 = vpop.eup %5008  ;;  %v2573_v49 = vsel %vm2572_vm9, %v4999_v5, %v2569_v62  ;;  %vm2660_vm11 = vweird.f32 %v7060_v2  ;;  %v2666_v6 = vand.u32 2147483648, %v7060_v2  ;;  %1891 = vmatmul.bf16.gmra.mxu1 %v5752_v59  ;;  %1935 = vmatmul.bf16.gmra.mxu2 %v5766_v32  ;;  %vm2647_vm12 = vmor %vm2645_vm6, %vm2646_vm10 }
 0x2df   : > { %5012 = vrcp.f32 %v7103_v33  ;;  %v2578_v25 = vsel %vm7090_vm5, %v2577_v18, %v2573_v49  ;;  %v2644_v9 = vadd.f32 %v5003_v29, %v2643_v43  ;;  %v2739_v35 = vand.u32 2147483647, %v7084_v57  ;;  %v7154_v18 = vpop.f32.mrf.mxu1 }
 0x2e0   : > { %v2657_v40 = vsub.f32 1.0, %v2656_v27  ;;  %3795 = vst [vmem:[%s5891_s29 + $0x78] sm:$0xff] %v2578_v25  ;;  %vm7133_vm13 = vcmp.eq.f32.partialorder %v2664_v55, 8.507059e+37  ;;  %v7137_v59 = vadd.f32 1.0, %v5009_v52  ;;  %5014 = vpow2.f32 %v4533_v21 }
 0x2e1   : > { %v5011_v30 = vpop.eup %5010  ;;  %v4538_v42 = vmul.f32 -1.442695, %v1638_v3  ;;  %v2648_v48 = vsel %vm2647_vm12, %v5003_v29, %v2644_v9  ;;  %vm2661_vm14 = vweird.f32 %v5007_v39  ;;  %v2667_v38 = vor.u32 1.1754944e-38, %v2666_v6 }
 0x2e2   : > { %v2658_v51 = vmul.f32 %v5007_v39, %v2657_v40  ;;  %v2731_v46 = vmul.f32 %v5011_v30, %v7084_v57  ;;  %v7140_v61 = vpop.f32.mrf.mxu2  ;;  %v2653_v54 = vsel %vm7098_vm8, %v2652_v36, %v2648_v48  ;;  %v2741_v0 = vand.u32 2147483648, %v7084_v57  ;;  %vm2662_vm1 = vmor %vm2660_vm11, %vm2661_vm14 }
 0x2e3   : > { %5016 = vrcp.f32 %v7137_v59  ;;  %3800 = vst [vmem:[%s5891_s29 + $0xa0] sm:$0xff] %v2653_v54  ;;  %vm2735_vm15 = vweird.f32 %v7084_v57  ;;  %vm7150_vm0 = vcmp.eq.f32.partialorder %v2739_v35, 8.507059e+37  ;;  %v7161_v22 = vadd.f32 %v7032_v7, %v6597_v47  ;;  %v7169_v62 = vpop.f32.mrf.mxu0 }
 0x2e4   : > { %v2659_v20 = vadd.f32 %v5007_v39, %v2658_v51  ;;  %v2732_v14 = vsub.f32 1.0, %v2731_v46  ;;  %5018 = vpow2.f32 %v4538_v42  ;;  %v1736_v11 = vadd.f32 %v6985_v63, %v6924_v53  ;;  %v7204_v46 = vpop.f32.mrf.mxu3 }
 0x2e5   : > { %v5013_v56 = vpop.eup %5012  ;;  %v1640_v31 = vadd.f32 %v6993_v13, %v7057_v16  ;;  %1837 = vmatmul.bf16.gmra.mxu0 %v5766_v32  ;;  %vm2736_vm2 = vweird.f32 %v5011_v30  ;;  %v2742_v21 = vor.u32 1.1754944e-38, %v2741_v0  ;;  %v2754_v3 = vand.u32 2147483647, %v7103_v33 }
 0x2e6   : > { %v2663_v44 = vsel %vm2662_vm1, %v5007_v39, %v2659_v20  ;;  %v2733_v36 = vmul.f32 %v5011_v30, %v2732_v14  ;;  %v2746_v2 = vmul.f32 %v5013_v56, %v7103_v33  ;;  %v5015_v55 = vpop.eup %5014  ;;  %v4539_v53 = vmul.f32 -1.442695, %v1736_v11  ;;  %vm2737_vm3 = vmor %vm2735_vm15, %vm2736_vm2 }
 0x2e7   : > { %v2668_v7 = vsel %vm7133_vm13, %v2667_v38, %v2663_v44  ;;  %v2756_v32 = vand.u32 2147483648, %v7103_v33  ;;  %v7176_v16 = vadd.f32 1.0, %v5015_v55  ;;  %vm2750_vm4 = vweird.f32 %v7103_v33  ;;  %v7207_v0 = vpop.f32.mrf.mxu1 }
 0x2e8   : > { %3801 = vst [vmem:[%s5891_s29 + $0xa8] sm:$0xff] %v2668_v7  ;;  %v2734_v63 = vadd.f32 %v5011_v30, %v2733_v36  ;;  %v2747_v13 = vsub.f32 1.0, %v2746_v2  ;;  %1798 = vmatmul.bf16.gmra.mxu3 %v5764_v34  ;;  %5020 = vpow2.f32 %v4539_v53  ;;  %v4544_v43 = vmul.f32 -1.442695, %v1640_v31 }
 0x2e9   : > { %v5017_v39 = vpop.eup %5016  ;;  %v1738_v27 = vadd.f32 %v7034_v41, %v7030_v19  ;;  %vm2751_vm5 = vweird.f32 %v5013_v56  ;;  %vm7188_vm6 = vcmp.eq.f32.partialorder %v2754_v3, 8.507059e+37  ;;  %v2829_v57 = vand.u32 2147483647, %v7137_v59 }
 0x2ea   : > { %v2738_v52 = vsel %vm2737_vm3, %v5011_v30, %v2734_v63  ;;  %v2748_v49 = vmul.f32 %v5013_v56, %v2747_v13  ;;  %v2821_v6 = vmul.f32 %v5017_v39, %v7137_v59  ;;  %v5019_v25 = vpop.eup %5018  ;;  %5022 = vrcp.f32 %v7176_v16  ;;  %v7197_v5 = vpop.f32.mrf.mxu2  ;;  %vm2752_vm7 = vmor %vm2750_vm4, %vm2751_vm5 }
 0x2eb   : > { %v2743_v9 = vsel %vm7150_vm0, %v2742_v21, %v2738_v52  ;;  %v2757_v19 = vor.u32 1.1754944e-38, %v2756_v32  ;;  %v7195_v30 = vadd.f32 1.0, %v5019_v25  ;;  %v2831_v42 = vand.u32 2147483648, %v7137_v59  ;;  %v7225_v11 = vpop.f32.mrf.mxu0 }
 0x2ec   : > { %3806 = vst [vmem:[%s5891_s29 + $0xd0] sm:$0xff] %v2743_v9  ;;  %v2749_v35 = vadd.f32 %v5013_v56, %v2748_v49  ;;  %v2822_v41 = vsub.f32 1.0, %v2821_v6  ;;  %5024 = vpow2.f32 %v4544_v43  ;;  %v4545_v48 = vmul.f32 -1.442695, %v1738_v27 }
 0x2ed   : > { %v1643_v51 = vadd.f32 %v7045_v50, %v7078_v8  ;;  %vm2826_vm8 = vweird.f32 %v5017_v39  ;;  %5026 = vrcp.f32 %v7195_v30  ;;  %vm2825_vm9 = vweird.f32 %v7137_v59 }
 0x2ee   : > { %v2753_v54 = vsel %vm2752_vm7, %v5013_v56, %v2749_v35  ;;  %v2823_v38 = vmul.f32 %v5017_v39, %v2822_v41  ;;  %v5021_v20 = vpop.eup %5020  ;;  %vm7212_vm10 = vcmp.eq.f32.partialorder %v2829_v57, 8.507059e+37  ;;  %v7218_v50 = vadd.f32 %v7022_v15, %v6648_v10  ;;  %1896 = vmatmul.bf16.gmra.mxu1 %v5764_v34  ;;  %1940 = vmatmul.bf16.gmra.mxu2 %v5778_v60  ;;  %vm2827_vm11 = vmor %vm2825_vm9, %vm2826_vm8 }
 0x2ef   : > { %v2758_v33 = vsel %vm7188_vm6, %v2757_v19, %v2753_v54  ;;  %v7223_v29 = vadd.f32 1.0, %v5021_v20  ;;  %5028 = vpow2.f32 %v4545_v48  ;;  %v4550_v56 = vmul.f32 -1.442695, %v1643_v51 }
 0x2f0   : > { %3807 = vst [vmem:[%s5891_s29 + $0xd8] sm:$0xff] %v2758_v33  ;;  %v2824_v8 = vadd.f32 %v5017_v39, %v2823_v38  ;;  %v5023_v59 = vpop.eup %5022  ;;  %v2832_v31 = vor.u32 1.1754944e-38, %v2831_v42  ;;  %v2844_v15 = vand.u32 2147483647, %v7176_v16  ;;  %v2846_v44 = vand.u32 2147483648, %v7176_v16  ;;  %v7275_v42 = vpop.f32.mrf.mxu1 }
 0x2f1   : > { %v7232_v34 = vadd.f32 %v7096_v28, %v6597_v47  ;;  %v2836_v2 = vmul.f32 %v5023_v59, %v7176_v16  ;;  %v2919_v55 = vand.u32 2147483647, %v7195_v30  ;;  %5030 = vrcp.f32 %v7223_v29 }
 0x2f2   : > { %v2828_v36 = vsel %vm2827_vm11, %v5017_v39, %v2824_v8  ;;  %v5025_v7 = vpop.eup %5024  ;;  %vm2840_vm12 = vweird.f32 %v7176_v16  ;;  %v2921_v3 = vand.u32 2147483648, %v7195_v30  ;;  %v7243_v53 = vadd.f32 %v7088_v1, %v6648_v10 }
 0x2f3   : > { %v2833_v21 = vsel %vm7212_vm10, %v2832_v31, %v2828_v36  ;;  %v5027_v28 = vpop.eup %5026  ;;  %v2837_v63 = vsub.f32 1.0, %v2836_v2  ;;  %v7246_v13 = vadd.f32 1.0, %v5025_v7  ;;  %5032 = vpow2.f32 %v4550_v56 }
 0x2f4   : > { %3812 = vst [vmem:[%s5891_s29 + $0x100] sm:$0xff] %v2833_v21  ;;  %v1741_v32 = vadd.f32 %v7081_v45, %v7067_v4  ;;  %vm7250_vm13 = vcmp.eq.f32.partialorder %v2844_v15, 8.507059e+37  ;;  %v2847_v43 = vor.u32 1.1754944e-38, %v2846_v44  ;;  %v2911_v27 = vmul.f32 %v5027_v28, %v7195_v30  ;;  %v7262_v4 = vpop.f32.mrf.mxu2 }
 0x2f5   : > { %vm2915_vm14 = vweird.f32 %v7195_v30  ;;  %1842 = vmatmul.bf16.gmra.mxu0 %v5778_v60  ;;  %v5029_v1 = vpop.eup %5028  ;;  %v2838_v52 = vmul.f32 %v5023_v59, %v2837_v63  ;;  %vm2841_vm15 = vweird.f32 %v5023_v59  ;;  %vm7257_vm0 = vcmp.eq.f32.partialorder %v2919_v55, 8.507059e+37  ;;  %v7270_v60 = vpop.f32.mrf.mxu3 }
 0x2f6   : > { %5034 = vrcp.f32 %v7246_v13  ;;  %v2912_v45 = vsub.f32 1.0, %v2911_v27  ;;  %v2922_v6 = vor.u32 1.1754944e-38, %v2921_v3  ;;  %v7264_v25 = vadd.f32 1.0, %v5029_v1  ;;  %vm2842_vm1 = vmor %vm2840_vm12, %vm2841_vm15 }
 0x2f7   : > { %v7268_v9 = vadd.f32 %v7154_v18, %v6597_v47  ;;  %v5031_v40 = vpop.eup %5030  ;;  %v2839_v57 = vadd.f32 %v5023_v59, %v2838_v52  ;;  %v2934_v35 = vand.u32 2147483647, %v7223_v29  ;;  %v4551_v19 = vmul.f32 -1.442695, %v1741_v32 }
 0x2f8   : > { %v1645_v41 = vadd.f32 %v7109_v26, %v7119_v17  ;;  %1803 = vmatmul.bf16.gmra.mxu3 %v5776_v58  ;;  %v2913_v18 = vmul.f32 %v5027_v28, %v2912_v45  ;;  %vm2916_vm2 = vweird.f32 %v5027_v28  ;;  %v2926_v48 = vmul.f32 %v5031_v40, %v7223_v29  ;;  %v7289_v17 = vpop.f32.mrf.mxu0 }
 0x2f9   : > { %v7284_v51 = vadd.f32 %v7146_v23, %v6648_v10  ;;  %v5033_v54 = vpop.eup %5032  ;;  %v2843_v38 = vsel %vm2842_vm1, %v5023_v59, %v2839_v57  ;;  %vm2930_vm3 = vweird.f32 %v7223_v29  ;;  %v2936_v26 = vand.u32 2147483648, %v7223_v29  ;;  %vm2917_vm4 = vmor %vm2915_vm14, %vm2916_vm2 }
 0x2fa   : > { %5036 = vrcp.f32 %v7264_v25  ;;  %v2848_v16 = vsel %vm7250_vm13, %v2847_v43, %v2843_v38  ;;  %v2914_v20 = vadd.f32 %v5027_v28, %v2913_v18  ;;  %v2927_v33 = vsub.f32 1.0, %v2926_v48 }
 0x2fb   : > { %v3009_v14 = vand.u32 2147483647, %v7246_v13  ;;  %3813 = vst [vmem:[%s5891_s29 + $0x108] sm:$0xff] %v2848_v16  ;;  %vm7298_vm5 = vcmp.eq.f32.partialorder %v2934_v35, 8.507059e+37  ;;  %v7302_v56 = vadd.f32 1.0, %v5033_v54  ;;  %5038 = vpow2.f32 %v4551_v19 }
 0x2fc   : > { %v5035_v23 = vpop.eup %5034  ;;  %v4556_v59 = vmul.f32 -1.442695, %v1645_v41  ;;  %v2918_v31 = vsel %vm2917_vm4, %v5027_v28, %v2914_v20  ;;  %v2928_v15 = vmul.f32 %v5031_v40, %v2927_v33  ;;  %vm2931_vm6 = vweird.f32 %v5031_v40  ;;  %v7327_v39 = vpop.f32.mrf.mxu2 }
 0x2fd   : > { %v3001_v44 = vmul.f32 %v5035_v23, %v7246_v13  ;;  %v2923_v36 = vsel %vm7257_vm0, %v2922_v6, %v2918_v31  ;;  %v2937_v2 = vor.u32 1.1754944e-38, %v2936_v26  ;;  %v3011_v30 = vand.u32 2147483648, %v7246_v13  ;;  %vm2932_vm9 = vmor %vm2930_vm3, %vm2931_vm6  ;;  %v7330_v27 = vpop.f32.mrf.mxu3 }
 0x2fe   : > { %5040 = vrcp.f32 %v7302_v56  ;;  %3818 = vst [vmem:[%s5891_s29 + $0x130] sm:$0xff] %v2923_v36  ;;  %v2929_v55 = vadd.f32 %v5031_v40, %v2928_v15  ;;  %vm3005_vm7 = vweird.f32 %v7246_v13  ;;  %vm7311_vm8 = vcmp.eq.f32.partialorder %v3009_v14, 8.507059e+37  ;;  %1901 = vmatmul.bf16.gmra.mxu1 %v5776_v58  ;;  %1945 = vmatmul.bf16.gmra.mxu2 %v5786_v12 }
 0x2ff   : > { %v3002_v7 = vsub.f32 1.0, %v3001_v44  ;;  %5042 = vpow2.f32 %v4556_v59  ;;  %v7321_v28 = vadd.f32 %v7207_v0, %v6597_v47  ;;  %v1743_v63 = vadd.f32 %v7140_v61, %v7107_v37  ;;  %v7335_v61 = vpop.f32.mrf.mxu1 }
 0x300   : > { %v5037_v3 = vpop.eup %5036  ;;  %v1648_v32 = vadd.f32 %v7169_v62, %v7218_v50  ;;  %v2933_v58 = vsel %vm2932_vm9, %v5031_v40, %v2929_v55  ;;  %vm3006_vm10 = vweird.f32 %v5035_v23  ;;  %v3012_v52 = vor.u32 1.1754944e-38, %v3011_v30  ;;  %v7347_v19 = vpop.f32.mrf.mxu0 }
 0x301   : > { %v3003_v43 = vmul.f32 %v5035_v23, %v3002_v7  ;;  %v3016_v29 = vmul.f32 %v5037_v3, %v7264_v25  ;;  %v5039_v1 = vpop.eup %5038  ;;  %v2938_v0 = vsel %vm7298_vm5, %v2937_v2, %v2933_v58  ;;  %v3024_v49 = vand.u32 2147483647, %v7264_v25  ;;  %vm3007_vm11 = vmor %vm3005_vm7, %vm3006_vm10 }
 0x302   : > { %v4557_v37 = vmul.f32 -1.442695, %v1743_v63  ;;  %3819 = vst [vmem:[%s5891_s29 + $0x138] sm:$0xff] %v2938_v0  ;;  %v3026_v45 = vand.u32 2147483648, %v7264_v25  ;;  %v7339_v6 = vadd.f32 1.0, %v5039_v1  ;;  %vm3020_vm12 = vweird.f32 %v7264_v25 }
 0x303   : > { %v3004_v62 = vadd.f32 %v5035_v23, %v3003_v43  ;;  %v3017_v50 = vsub.f32 1.0, %v3016_v29  ;;  %v4562_v57 = vmul.f32 -1.442695, %v1648_v32  ;;  %v1746_v35 = vadd.f32 %v7197_v5, %v7161_v22 }
 0x304   : > { %v5041_v40 = vpop.eup %5040  ;;  %5044 = vpow2.f32 %v4557_v37  ;;  %vm3021_vm13 = vweird.f32 %v5037_v3  ;;  %vm7353_vm14 = vcmp.eq.f32.partialorder %v3024_v49, 8.507059e+37  ;;  %v3099_v26 = vand.u32 2147483647, %v7302_v56 }
 0x305   : > { %v3008_v41 = vsel %vm3007_vm11, %v5035_v23, %v3004_v62  ;;  %v3018_v18 = vmul.f32 %v5037_v3, %v3017_v50  ;;  %v3091_v48 = vmul.f32 %v5041_v40, %v7302_v56  ;;  %1847 = vmatmul.bf16.gmra.mxu0 %v5786_v12  ;;  %v5043_v54 = vpop.eup %5042  ;;  %5046 = vrcp.f32 %v7339_v6  ;;  %vm3022_vm15 = vmor %vm3020_vm12, %vm3021_vm13  ;;  %v7367_v23 = vpop.f32.mrf.mxu2 }
 0x306   : > { %v3013_v13 = vsel %vm7311_vm8, %v3012_v52, %v3008_v41  ;;  %v3027_v5 = vor.u32 1.1754944e-38, %v3026_v45  ;;  %v7360_v20 = vadd.f32 1.0, %v5043_v54  ;;  %v3101_v12 = vand.u32 2147483648, %v7302_v56 }
 0x307   : > { %3824 = vst [vmem:[%s5891_s29 + $0x160] sm:$0xff] %v3013_v13  ;;  %v3019_v22 = vadd.f32 %v5037_v3, %v3018_v18  ;;  %v3092_v16 = vsub.f32 1.0, %v3091_v48  ;;  %5048 = vpow2.f32 %v4562_v57  ;;  %v4563_v33 = vmul.f32 -1.442695, %v1746_v35 }
 0x308   : > { %v1650_v14 = vadd.f32 %v7225_v11, %v7243_v53  ;;  %vm3096_vm0 = vweird.f32 %v5041_v40  ;;  %5050 = vrcp.f32 %v7360_v20  ;;  %vm3095_vm1 = vweird.f32 %v7302_v56  ;;  %v7405_v1 = vpop.f32.mrf.mxu0 }
 0x309   : > { %v3023_v8 = vsel %vm3022_vm15, %v5037_v3, %v3019_v22  ;;  %v3093_v59 = vmul.f32 %v5041_v40, %v3092_v16  ;;  %vm7373_vm2 = vcmp.eq.f32.partialorder %v3099_v26, 8.507059e+37  ;;  %v7379_v11 = vadd.f32 %v7204_v46, %v6648_v10  ;;  %vm3097_vm3 = vmor %vm3095_vm1, %vm3096_vm0 }
 0x30a   : > { %v5045_v31 = vpop.eup %5044  ;;  %v3028_v25 = vsel %vm7353_vm14, %v3027_v5, %v3023_v8  ;;  %5052 = vpow2.f32 %v4563_v33  ;;  %v4568_v36 = vmul.f32 -1.442695, %v1650_v14  ;;  %v3102_v55 = vor.u32 1.1754944e-38, %v3101_v12 }
 0x30b   : > { %3825 = vst [vmem:[%s5891_s29 + $0x168] sm:$0xff] %v3028_v25  ;;  %v3094_v53 = vadd.f32 %v5041_v40, %v3093_v59  ;;  %v7382_v44 = vadd.f32 1.0, %v5045_v31  ;;  %v7384_v2 = vpop.f32.mrf.mxu3  ;;  %v5047_v30 = vpop.eup %5046  ;;  %v3114_v56 = vand.u32 2147483647, %v7339_v6  ;;  %v3116_v7 = vand.u32 2147483648, %v7339_v6 }
 0x30c   : > { %v7390_v46 = vadd.f32 %v7275_v42, %v6597_v47  ;;  %v7392_v21 = vpop.f32.mrf.mxu1  ;;  %v3106_v63 = vmul.f32 %v5047_v30, %v7339_v6  ;;  %v3189_v32 = vand.u32 2147483647, %v7360_v20  ;;  %vm3110_vm4 = vweird.f32 %v7339_v6 }
 0x30d   : > { %v3098_v3 = vsel %vm3097_vm3, %v5041_v40, %v3094_v53  ;;  %5054 = vrcp.f32 %v7382_v44  ;;  %v5049_v58 = vpop.eup %5048  ;;  %v3191_v29 = vand.u32 2147483648, %v7360_v20  ;;  %v7403_v42 = vadd.f32 %v7270_v60, %v6648_v10 }
 0x30e   : > { %v3103_v43 = vsel %vm7373_vm2, %v3102_v55, %v3098_v3  ;;  %v5051_v0 = vpop.eup %5050  ;;  %v3107_v52 = vsub.f32 1.0, %v3106_v63  ;;  %v7408_v49 = vadd.f32 1.0, %v5049_v58  ;;  %5056 = vpow2.f32 %v4568_v36  ;;  %1950 = vmatmul.bf16.gmra.mxu2 %v5796_v24 }
 0x30f   : > { %3830 = vst [vmem:[%s5891_s29 + $0x190] sm:$0xff] %v3103_v43  ;;  %v1748_v37 = vadd.f32 %v7262_v4, %v7232_v34  ;;  %vm7413_vm5 = vcmp.eq.f32.partialorder %v3114_v56, 8.507059e+37  ;;  %v3117_v50 = vor.u32 1.1754944e-38, %v3116_v7  ;;  %v3181_v60 = vmul.f32 %v5051_v0, %v7360_v20  ;;  %v7424_v34 = vpop.f32.mrf.mxu2 }
 0x310   : > { %vm3185_vm6 = vweird.f32 %v7360_v20  ;;  %v5053_v45 = vpop.eup %5052  ;;  %v3108_v40 = vmul.f32 %v5047_v30, %v3107_v52  ;;  %vm3111_vm7 = vweird.f32 %v5047_v30  ;;  %vm7419_vm8 = vcmp.eq.f32.partialorder %v3189_v32, 8.507059e+37  ;;  %v7464_v53 = vpop.f32.mrf.mxu0  ;;  %v5229_v32 = vld [vmem:[#allocation10] sm:$0x3f] }
 0x311   : > { %5058 = vrcp.f32 %v7408_v49  ;;  %v3182_v4 = vsub.f32 1.0, %v3181_v60  ;;  %v3192_v35 = vor.u32 1.1754944e-38, %v3191_v29  ;;  %v7426_v41 = vadd.f32 1.0, %v5053_v45  ;;  %vm3112_vm9 = vmor %vm3110_vm4, %vm3111_vm7 }
 0x312   : > { %v7430_v18 = vadd.f32 %v7335_v61, %v6597_v47  ;;  %v3109_v54 = vadd.f32 %v5047_v30, %v3108_v40  ;;  %v3204_v13 = vand.u32 2147483647, %v7382_v44  ;;  %v4569_v38 = vmul.f32 -1.442695, %v1748_v37 }
 0x313   : > { %v5055_v48 = vpop.eup %5054  ;;  %v1653_v26 = vadd.f32 %v7289_v17, %v7284_v51  ;;  %v7435_v22 = vpop.f32.mrf.mxu3  ;;  %v3183_v5 = vmul.f32 %v5051_v0, %v3182_v4  ;;  %vm3186_vm10 = vweird.f32 %v5051_v0  ;;  %v7442_v47 = vadd.f32 %v7330_v27, %v6648_v10 }
 0x314   : > { %v3196_v16 = vmul.f32 %v5055_v48, %v7382_v44  ;;  %v7444_v61 = vpop.f32.mrf.mxu1  ;;  %v5057_v12 = vpop.eup %5056  ;;  %v3113_v33 = vsel %vm3112_vm9, %v5047_v30, %v3109_v54  ;;  %vm3200_vm11 = vweird.f32 %v7382_v44  ;;  %v3206_v51 = vand.u32 2147483648, %v7382_v44  ;;  %vm3187_vm12 = vmor %vm3185_vm6, %vm3186_vm10 }
 0x315   : > { %5060 = vrcp.f32 %v7426_v41  ;;  %1852 = vmatmul.bf16.gmra.mxu0 %v5796_v24  ;;  %v3118_v17 = vsel %vm7413_vm5, %v3117_v50, %v3113_v33  ;;  %v3184_v6 = vadd.f32 %v5051_v0, %v3183_v5  ;;  %v3279_v10 = vand.u32 2147483647, %v7408_v49 }
 0x316   : > { %v3197_v14 = vsub.f32 1.0, %v3196_v16  ;;  %3831 = vst [vmem:[%s5891_s29 + $0x198] sm:$0xff] %v3118_v17  ;;  %vm7457_vm13 = vcmp.eq.f32.partialorder %v3204_v13, 8.507059e+37  ;;  %v7461_v59 = vadd.f32 1.0, %v5057_v12  ;;  %5062 = vpow2.f32 %v4569_v38 }
 0x317   : > { %v5059_v27 = vpop.eup %5058  ;;  %v4574_v24 = vmul.f32 -1.442695, %v1653_v26  ;;  %v3188_v31 = vsel %vm3187_vm12, %v5051_v0, %v3184_v6  ;;  %vm3201_vm14 = vweird.f32 %v5055_v48  ;;  %v3207_v20 = vor.u32 1.1754944e-38, %v3206_v51  ;;  %v7485_v0 = vpop.f32.mrf.mxu2 }
 0x318   : > { %v3198_v25 = vmul.f32 %v5055_v48, %v3197_v14  ;;  %v3271_v15 = vmul.f32 %v5059_v27, %v7408_v49  ;;  %v3193_v36 = vsel %vm7419_vm8, %v3192_v35, %v3188_v31  ;;  %v3281_v30 = vand.u32 2147483648, %v7408_v49  ;;  %vm3202_vm1 = vmor %vm3200_vm11, %vm3201_vm14 }
 0x319   : > { %5064 = vrcp.f32 %v7461_v59  ;;  %3836 = vst [vmem:[%s5891_s29 + $0x1c0] sm:$0xff] %v3193_v36  ;;  %vm3275_vm15 = vweird.f32 %v7408_v49  ;;  %vm7472_vm0 = vcmp.eq.f32.partialorder %v3279_v10, 8.507059e+37  ;;  %v3294_v63 = vand.u32 2147483647, %v7426_v41 }
 0x31a   : > { %v3199_v55 = vadd.f32 %v5055_v48, %v3198_v25  ;;  %v3272_v56 = vsub.f32 1.0, %v3271_v15  ;;  %5066 = vpow2.f32 %v4574_v24  ;;  %v7479_v58 = vperm.slane %v5229_v32, 5 }
 0x31b   : > { %v5061_v3 = vpop.eup %5060  ;;  %v1751_v43 = vadd.f32 %v7327_v39, %v7268_v9  ;;  %v7483_v29 = vpop.f32.mrf.mxu3  ;;  %vm3276_vm2 = vweird.f32 %v5059_v27  ;;  %v3282_v45 = vor.u32 1.1754944e-38, %v3281_v30  ;;  %v3296_v40 = vand.u32 2147483648, %v7426_v41 }
 0x31c   : > { %v3203_v52 = vsel %vm3202_vm1, %v5055_v48, %v3199_v55  ;;  %v3273_v37 = vmul.f32 %v5059_v27, %v3272_v56  ;;  %v3286_v44 = vmul.f32 %v5061_v3, %v7426_v41  ;;  %v7488_v62 = vpop.f32.mrf.mxu1  ;;  %v5063_v50 = vpop.eup %5062  ;;  %vm3290_vm3 = vweird.f32 %v7426_v41  ;;  %vm3277_vm4 = vmor %vm3275_vm15, %vm3276_vm2 }
 0x31d   : > { %v3208_v60 = vsel %vm7457_vm13, %v3207_v20, %v3203_v52  ;;  %v4575_v57 = vmul.f32 -1.442695, %v1751_v43  ;;  %v7495_v4 = vadd.f32 1.0, %v5063_v50  ;;  %vm7499_vm5 = vcmp.eq.f32.partialorder %v3294_v63, 8.507059e+37 }
 0x31e   : > { %3837 = vst [vmem:[%s5891_s29 + $0x1c8] sm:$0xff] %v3208_v60  ;;  %v3274_v9 = vadd.f32 %v5059_v27, %v3273_v37  ;;  %v3287_v39 = vsub.f32 1.0, %v3286_v44  ;;  %v1655_v54 = vadd.f32 %v7347_v19, %v7379_v11  ;;  %v1753_v13 = vadd.f32 %v7367_v23, %v7321_v28 }
 0x31f   : > { %v5065_v35 = vpop.eup %5064  ;;  %5068 = vpow2.f32 %v4575_v57  ;;  %vm3291_vm6 = vweird.f32 %v5061_v3  ;;  %v3297_v12 = vor.u32 1.1754944e-38, %v3296_v40  ;;  %v3369_v33 = vand.u32 2147483647, %v7461_v59 }
 0x320   : > { %v3278_v38 = vsel %vm3277_vm4, %v5059_v27, %v3274_v9  ;;  %v3288_v26 = vmul.f32 %v5061_v3, %v3287_v39  ;;  %v3361_v5 = vmul.f32 %v5065_v35, %v7461_v59  ;;  %v5067_v16 = vpop.eup %5066  ;;  %5070 = vrcp.f32 %v7495_v4  ;;  %vm3292_vm8 = vmor %vm3290_vm3, %vm3291_vm6 }
 0x321   : > { %v3283_v49 = vsel %vm7472_vm0, %v3282_v45, %v3278_v38  ;;  %vm3365_vm7 = vweird.f32 %v7461_v59  ;;  %v7514_v28 = vadd.f32 1.0, %v5067_v16  ;;  %v3371_v11 = vand.u32 2147483648, %v7461_v59  ;;  %v7539_v20 = vpop.f32.mrf.mxu2 }
 0x322   : > { %3842 = vst [vmem:[%s5891_s29 + $0x1f0] sm:$0xff] %v3283_v49  ;;  %v3289_v51 = vadd.f32 %v5061_v3, %v3288_v26  ;;  %v3362_v19 = vsub.f32 1.0, %v3361_v5  ;;  %v7516_v23 = vpop.f32.mrf.mxu0  ;;  %v7521_v17 = vperm.slane %v5229_v32, 4  ;;  %v4580_v6 = vmul.f32 -1.442695, %v1655_v54 }
 0x323   : > { %v4581_v14 = vmul.f32 -1.442695, %v1753_v13  ;;  %v7523_v10 = vpop.f32.mrf.mxu3  ;;  %vm3366_vm9 = vweird.f32 %v5065_v35  ;;  %5072 = vrcp.f32 %v7514_v28  ;;  %vm7528_vm10 = vcmp.eq.f32.partialorder %v3369_v33, 8.507059e+37 }
 0x324   : > { %v3293_v27 = vsel %vm3292_vm8, %v5061_v3, %v3289_v51  ;;  %v3363_v8 = vmul.f32 %v5065_v35, %v3362_v19  ;;  %v3384_v25 = vand.u32 2147483647, %v7495_v4  ;;  %v7535_v15 = vadd.f32 %v7392_v21, %v7479_v58  ;;  %v7537_v36 = vpop.f32.mrf.mxu1  ;;  %vm3367_vm11 = vmor %vm3365_vm7, %vm3366_vm9 }
 0x325   : > { %v5069_v24 = vpop.eup %5068  ;;  %v3298_v31 = vsel %vm7499_vm5, %v3297_v12, %v3293_v27  ;;  %5074 = vpow2.f32 %v4580_v6  ;;  %v1658_v56 = vadd.f32 %v7405_v1, %v7403_v42  ;;  %v3372_v21 = vor.u32 1.1754944e-38, %v3371_v11 }
 0x326   : > { %3843 = vst [vmem:[%s5891_s29 + $0x1f8] sm:$0xff] %v3298_v31  ;;  %v3364_v30 = vadd.f32 %v5065_v35, %v3363_v8  ;;  %v7542_v55 = vadd.f32 1.0, %v5069_v24  ;;  %v5071_v7 = vpop.eup %5070  ;;  %v3386_v3 = vand.u32 2147483648, %v7495_v4  ;;  %v7552_v63 = vadd.f32 %v7384_v2, %v7521_v17 }
 0x327   : > { %5076 = vpow2.f32 %v4581_v14  ;;  %v3376_v43 = vmul.f32 %v5071_v7, %v7495_v4  ;;  %v7558_v42 = vadd.f32 %v7444_v61, %v7479_v58  ;;  %vm3380_vm12 = vweird.f32 %v7495_v4 }
 0x328   : > { %v3368_v32 = vsel %vm3367_vm11, %v5065_v35, %v3364_v30  ;;  %5078 = vrcp.f32 %v7542_v55  ;;  %vm7563_vm13 = vcmp.eq.f32.partialorder %v3384_v25, 8.507059e+37  ;;  %v3459_v2 = vand.u32 2147483647, %v7514_v28 }
 0x329   : > { %v3373_v1 = vsel %vm7528_vm10, %v3372_v21, %v3368_v32  ;;  %v5073_v52 = vpop.eup %5072  ;;  %v3377_v37 = vsub.f32 1.0, %v3376_v43  ;;  %v3461_v44 = vand.u32 2147483648, %v7514_v28  ;;  %v4586_v50 = vmul.f32 -1.442695, %v1658_v56 }
 0x32a   : > { %3848 = vst [vmem:[%s5891_s29 + $0x220] sm:$0xff] %v3373_v1  ;;  %v1756_v61 = vadd.f32 %v7424_v34, %v7390_v46  ;;  %v7572_v60 = vpop.f32.mrf.mxu0  ;;  %vm3381_vm14 = vweird.f32 %v5071_v7  ;;  %v3387_v45 = vor.u32 1.1754944e-38, %v3386_v3  ;;  %v3451_v40 = vmul.f32 %v5073_v52, %v7514_v28 }
 0x32b   : > { %v7577_v57 = vadd.f32 %v7435_v22, %v7521_v17  ;;  %v7579_v9 = vpop.f32.mrf.mxu3  ;;  %v5075_v39 = vpop.eup %5074  ;;  %v3378_v35 = vmul.f32 %v5071_v7, %v3377_v37  ;;  %5080 = vpow2.f32 %v4586_v50  ;;  %v1660_v54 = vadd.f32 %v7464_v53, %v7442_v47  ;;  %vm3382_vm1 = vmor %vm3380_vm12, %vm3381_vm14 }
 0x32c   : > { %v4587_v48 = vmul.f32 -1.442695, %v1756_v61  ;;  %v3452_v34 = vsub.f32 1.0, %v3451_v40  ;;  %vm3455_vm15 = vweird.f32 %v7514_v28  ;;  %vm7584_vm0 = vcmp.eq.f32.partialorder %v3459_v2, 8.507059e+37  ;;  %v7590_v22 = vpop.f32.mrf.mxu2  ;;  %v7599_v12 = vpop.f32.mrf.mxu1 }
 0x32d   : > { %v5077_v46 = vpop.eup %5076  ;;  %v7588_v38 = vadd.f32 1.0, %v5075_v39  ;;  %v3379_v5 = vadd.f32 %v5071_v7, %v3378_v35  ;;  %v3462_v16 = vor.u32 1.1754944e-38, %v3461_v44  ;;  %vm3456_vm2 = vweird.f32 %v5073_v52 }
 0x32e   : > { %v5079_v26 = vpop.eup %5078  ;;  %v7592_v49 = vadd.f32 1.0, %v5077_v46  ;;  %5082 = vpow2.f32 %v4587_v48  ;;  %v3453_v47 = vmul.f32 %v5073_v52, %v3452_v34  ;;  %v3474_v51 = vand.u32 2147483647, %v7542_v55  ;;  %vm3457_vm3 = vmor %vm3455_vm15, %vm3456_vm2 }
 0x32f   : > { %v3466_v53 = vmul.f32 %v5079_v26, %v7542_v55  ;;  %5084 = vrcp.f32 %v7588_v38  ;;  %v3383_v33 = vsel %vm3382_vm1, %v5071_v7, %v3379_v5  ;;  %v4592_v19 = vmul.f32 -1.442695, %v1660_v54 }
 0x330   : > { %v1758_v11 = vadd.f32 %v7485_v0, %v7430_v18  ;;  %v3388_v4 = vsel %vm7563_vm13, %v3387_v45, %v3383_v33  ;;  %v3454_v6 = vadd.f32 %v5073_v52, %v3453_v47  ;;  %5086 = vrcp.f32 %v7592_v49 }
 0x331   : > { %v3467_v14 = vsub.f32 1.0, %v3466_v53  ;;  %v5081_v27 = vpop.eup %5080  ;;  %3849 = vst [vmem:[%s5891_s29 + $0x228] sm:$0xff] %v3388_v4  ;;  %vm3470_vm4 = vweird.f32 %v7542_v55  ;;  %v3476_v8 = vand.u32 2147483648, %v7542_v55  ;;  %v7614_v18 = vadd.f32 %v7488_v62, %v7479_v58 }
 0x332   : > { %v7618_v0 = vadd.f32 %v7483_v29, %v7521_v17  ;;  %v7620_v24 = vpop.f32.mrf.mxu0  ;;  %v3458_v31 = vsel %vm3457_vm3, %v5073_v52, %v3454_v6  ;;  %vm3471_vm5 = vweird.f32 %v5079_v26  ;;  %v7622_v28 = vadd.f32 1.0, %v5081_v27 }
 0x333   : > { %v3468_v41 = vmul.f32 %v5079_v26, %v3467_v14  ;;  %v7624_v25 = vpop.f32.mrf.mxu3  ;;  %v3463_v56 = vsel %vm7584_vm0, %v3462_v16, %v3458_v31  ;;  %v3549_v62 = vand.u32 2147483647, %v7588_v38  ;;  %5088 = vpow2.f32 %v4592_v19  ;;  %vm3472_vm7 = vmor %vm3470_vm4, %vm3471_vm5 }
 0x334   : > { %v5083_v30 = vpop.eup %5082  ;;  %v4593_v7 = vmul.f32 -1.442695, %v1758_v11  ;;  %3854 = vst [vmem:[%s5891_s29 + $0x250] sm:$0xff] %v3463_v56  ;;  %vm3475_vm6 = vcmp.eq.f32.partialorder %v3474_v51, 8.507059e+37  ;;  %v3551_v3 = vand.u32 2147483648, %v7588_v38  ;;  %5090 = vrcp.f32 %v7622_v28  ;;  %v7632_v32 = vpop.f32.mrf.mxu2 }
 0x335   : > { %v5085_v21 = vpop.eup %5084  ;;  %v3469_v29 = vadd.f32 %v5079_v26, %v3468_v41  ;;  %v3477_v43 = vor.u32 1.1754944e-38, %v3476_v8  ;;  %vm3545_vm8 = vweird.f32 %v7588_v38  ;;  %v3564_v59 = vand.u32 2147483647, %v7592_v49  ;;  %v7652_v35 = vpop.f32.mrf.mxu1 }
 0x336   : > { %v3541_v1 = vmul.f32 %v5085_v21, %v7588_v38  ;;  %v5087_v2 = vpop.eup %5086  ;;  %v3566_v37 = vand.u32 2147483648, %v7592_v49  ;;  %v7641_v44 = vadd.f32 1.0, %v5083_v30  ;;  %5092 = vpow2.f32 %v4593_v7 }
 0x337   : > { %v3473_v52 = vsel %vm3472_vm7, %v5079_v26, %v3469_v29  ;;  %vm7643_vm9 = vcmp.eq.f32.partialorder %v3549_v62, 8.507059e+37  ;;  %v3556_v55 = vmul.f32 %v5087_v2, %v7592_v49  ;;  %v3552_v40 = vor.u32 1.1754944e-38, %v3551_v3 }
 0x338   : > { %v3478_v50 = vsel %vm3475_vm6, %v3477_v43, %v3473_v52  ;;  %v3542_v61 = vsub.f32 1.0, %v3541_v1  ;;  %vm3560_vm10 = vweird.f32 %v7592_v49  ;;  %v3639_v39 = vand.u32 2147483647, %v7622_v28 }
 0x339   : > { %3855 = vst [vmem:[%s5891_s29 + $0x258] sm:$0xff] %v3478_v50  ;;  %5094 = vrcp.f32 %v7641_v44  ;;  %v5089_v48 = vpop.eup %5088  ;;  %vm3546_vm11 = vweird.f32 %v5085_v21  ;;  %v3557_v46 = vsub.f32 1.0, %v3556_v55  ;;  %vm7654_vm12 = vcmp.eq.f32.partialorder %v3564_v59, 8.507059e+37 }
 0x33a   : > { %v3543_v54 = vmul.f32 %v5085_v21, %v3542_v61  ;;  %v7658_v13 = vpop.f32.mrf.mxu0  ;;  %v5091_v26 = vpop.eup %5090  ;;  %v3567_v5 = vor.u32 1.1754944e-38, %v3566_v37  ;;  %v3641_v16 = vand.u32 2147483648, %v7622_v28  ;;  %v7661_v47 = vadd.f32 1.0, %v5089_v48  ;;  %vm3547_vm14 = vmor %vm3545_vm8, %vm3546_vm11 }
 0x33b   : > { %v1819_v53 = vadd.f32 %v7516_v23, %v7552_v63  ;;  %v3558_v51 = vmul.f32 %v5087_v2, %v3557_v46  ;;  %vm3561_vm13 = vweird.f32 %v5087_v2  ;;  %v3631_v19 = vmul.f32 %v5091_v26, %v7622_v28  ;;  %v7678_v63 = vpop.f32.mrf.mxu3 }
 0x33c   : > { %v3544_v33 = vadd.f32 %v5085_v21, %v3543_v54  ;;  %v5093_v11 = vpop.eup %5092  ;;  %vm3635_vm15 = vweird.f32 %v7622_v28  ;;  %vm7669_vm0 = vcmp.eq.f32.partialorder %v3639_v39, 8.507059e+37  ;;  %5096 = vrcp.f32 %v7661_v47  ;;  %vm3562_vm1 = vmor %vm3560_vm10, %vm3561_vm13  ;;  %v7688_v56 = vpop.f32.mrf.mxu2 }
 0x33d   : > { %v7676_v23 = vadd.f32 %v7523_v10, %v7521_v17  ;;  %v3559_v14 = vadd.f32 %v5087_v2, %v3558_v51  ;;  %v3632_v27 = vsub.f32 1.0, %v3631_v19  ;;  %v3654_v38 = vand.u32 2147483647, %v7641_v44  ;;  %v7712_v45 = vpop.f32.mrf.mxu1 }
 0x33e   : > { %v3548_v6 = vsel %vm3547_vm14, %v5085_v21, %v3544_v33  ;;  %v3642_v41 = vor.u32 1.1754944e-38, %v3641_v16  ;;  %v7686_v30 = vadd.f32 1.0, %v5093_v11  ;;  %v4504_v10 = vmul.f32 -1.442695, %v1819_v53 }
 0x33f   : > { %v5095_v8 = vpop.eup %5094  ;;  %v3553_v31 = vsel %vm7643_vm9, %v3552_v40, %v3548_v6  ;;  %v3563_v62 = vsel %vm3562_vm1, %v5087_v2, %v3559_v14  ;;  %v3633_v7 = vmul.f32 %v5091_v26, %v3632_v27  ;;  %vm3636_vm2 = vweird.f32 %v5091_v26 }
 0x340   : > { %3860 = vst [vmem:[%s5891_s29 + $0x280] sm:$0xff] %v3553_v31  ;;  %v3646_v21 = vmul.f32 %v5095_v8, %v7641_v44  ;;  %v3568_v29 = vsel %vm7654_vm12, %v3567_v5, %v3563_v62  ;;  %vm3650_vm3 = vweird.f32 %v7641_v44  ;;  %v3656_v49 = vand.u32 2147483648, %v7641_v44  ;;  %vm3637_vm5 = vmor %vm3635_vm15, %vm3636_vm2 }
 0x341   : > { %5098 = vrcp.f32 %v7686_v30  ;;  %3861 = vst [vmem:[%s5891_s29 + $0x288] sm:$0xff] %v3568_v29  ;;  %v3634_v3 = vadd.f32 %v5091_v26, %v3633_v7  ;;  %vm7698_vm4 = vcmp.eq.f32.partialorder %v3654_v38, 8.507059e+37  ;;  %v3729_v59 = vand.u32 2147483647, %v7661_v47 }
 0x342   : > { %v3647_v43 = vsub.f32 1.0, %v3646_v21  ;;  %v7703_v2 = vpop.f32.mrf.mxu0  ;;  %v5097_v52 = vpop.eup %5096  ;;  %v3731_v37 = vand.u32 2147483648, %v7661_v47  ;;  %5100 = vpow2.f32 %v4504_v10  ;;  %v1917_v50 = vadd.f32 %v7539_v20, %v7535_v15 }
 0x343   : > { %v1821_v61 = vadd.f32 %v7572_v60, %v7577_v57  ;;  %v3638_v55 = vsel %vm3637_vm5, %v5091_v26, %v3634_v3  ;;  %vm3651_vm6 = vweird.f32 %v5095_v8  ;;  %v3721_v39 = vmul.f32 %v5097_v52, %v7661_v47  ;;  %v7729_v16 = vpop.f32.mrf.mxu3 }
 0x344   : > { %v3648_v40 = vmul.f32 %v5095_v8, %v3647_v43  ;;  %v3643_v28 = vsel %vm7669_vm0, %v3642_v41, %v3638_v55  ;;  %v3657_v48 = vor.u32 1.1754944e-38, %v3656_v49  ;;  %vm3725_vm7 = vweird.f32 %v7661_v47  ;;  %vm3652_vm9 = vmor %vm3650_vm3, %vm3651_vm6  ;;  %v7734_v6 = vpop.f32.mrf.mxu2 }
 0x345   : > { %v4505_v54 = vmul.f32 -1.442695, %v1917_v50  ;;  %3866 = vst [vmem:[%s5891_s29 + $0x2b0] sm:$0xff] %v3643_v28  ;;  %v3722_v15 = vsub.f32 1.0, %v3721_v39  ;;  %vm7719_vm8 = vcmp.eq.f32.partialorder %v3729_v59, 8.507059e+37  ;;  %v3732_v34 = vor.u32 1.1754944e-38, %v3731_v37  ;;  %v7753_v62 = vpop.f32.mrf.mxu1 }
 0x346   : > { %v3649_v46 = vadd.f32 %v5095_v8, %v3648_v40  ;;  %v4510_v60 = vmul.f32 -1.442695, %v1821_v61  ;;  %v1919_v26 = vadd.f32 %v7590_v22, %v7558_v42  ;;  %v1824_v5 = vadd.f32 %v7620_v24, %v7618_v0 }
 0x347   : > { %v5099_v57 = vpop.eup %5098  ;;  %5102 = vpow2.f32 %v4505_v54  ;;  %v3723_v33 = vmul.f32 %v5097_v52, %v3722_v15  ;;  %vm3726_vm10 = vweird.f32 %v5097_v52  ;;  %v3744_v0 = vand.u32 2147483647, %v7686_v30 }
 0x348   : > { %v3653_v53 = vsel %vm3652_vm9, %v5095_v8, %v3649_v46  ;;  %v3736_v51 = vmul.f32 %v5099_v57, %v7686_v30  ;;  %v5101_v19 = vpop.eup %5100  ;;  %5104 = vpow2.f32 %v4510_v60  ;;  %v4511_v11 = vmul.f32 -1.442695, %v1919_v26  ;;  %vm3727_vm11 = vmor %vm3725_vm7, %vm3726_vm10 }
 0x349   : > { %v3658_v44 = vsel %vm7698_vm4, %v3657_v48, %v3653_v53  ;;  %v4516_v4 = vmul.f32 -1.442695, %v1824_v5  ;;  %v3724_v42 = vadd.f32 %v5097_v52, %v3723_v33  ;;  %v7738_v24 = vadd.f32 1.0, %v5101_v19 }
 0x34a   : > { %3867 = vst [vmem:[%s5891_s29 + $0x2b8] sm:$0xff] %v3658_v44  ;;  %v3737_v22 = vsub.f32 1.0, %v3736_v51  ;;  %v3746_v14 = vand.u32 2147483648, %v7686_v30  ;;  %5106 = vpow2.f32 %v4511_v11  ;;  %v1922_v27 = vadd.f32 %v7632_v32, %v7614_v18  ;;  %v7747_v8 = vpop.f32.mrf.mxu0 }
 0x34b   : > { %v1826_v38 = vadd.f32 %v7658_v13, %v7676_v23  ;;  %v3728_v31 = vsel %vm3727_vm11, %v5097_v52, %v3724_v42  ;;  %vm3741_vm12 = vweird.f32 %v5099_v57  ;;  %5108 = vrcp.f32 %v7738_v24  ;;  %v7773_v37 = vpop.f32.mrf.mxu3 }
 0x34c   : > { %v3738_v41 = vmul.f32 %v5099_v57, %v3737_v22  ;;  %v3733_v47 = vsel %vm7719_vm8, %v3732_v34, %v3728_v31  ;;  %vm3740_vm13 = vweird.f32 %v7686_v30  ;;  %5110 = vpow2.f32 %v4516_v4 }
 0x34d   : > { %v5103_v10 = vpop.eup %5102  ;;  %3872 = vst [vmem:[%s5891_s29 + $0x2e0] sm:$0xff] %v3733_v47  ;;  %v4517_v13 = vmul.f32 -1.442695, %v1922_v27  ;;  %v4522_v23 = vmul.f32 -1.442695, %v1826_v38  ;;  %v1875_v21 = vadd.f32 %v7537_v36, %v7479_v58  ;;  %vm3742_vm14 = vmor %vm3740_vm13, %vm3741_vm12  ;;  %v3747_v29 = vor.u32 1.1754944e-38, %v3746_v14  ;;  %v7819_v51 = vpop.f32.mrf.mxu1 }
 0x34e   : > { %v3739_v18 = vadd.f32 %v5099_v57, %v3738_v41  ;;  %v7756_v32 = vadd.f32 1.0, %v5103_v10  ;;  %v5105_v7 = vpop.eup %5104  ;;  %v7762_v49 = vadd.f32 %v7599_v12, %v7479_v58  ;;  %v7766_v30 = vadd.f32 %v7579_v9, %v7521_v17 }
 0x34f   : > { %vm3745_vm15 = vcmp.eq.f32.partialorder %v3744_v0, 8.507059e+37  ;;  %v2409_v43 = vand.u32 2147483647, %v7738_v24  ;;  %v2411_v36 = vand.u32 2147483648, %v7738_v24  ;;  %v7771_v52 = vadd.f32 1.0, %v5105_v7 }
 0x350   : > { %v3743_v3 = vsel %vm3742_vm14, %v5099_v57, %v3739_v18  ;;  %5112 = vrcp.f32 %v7756_v32  ;;  %v5107_v1 = vpop.eup %5106  ;;  %v7778_v9 = vadd.f32 %v7652_v35, %v7479_v58  ;;  %v7782_v50 = vadd.f32 %v7624_v25, %v7521_v17  ;;  %v7793_v35 = vpop.f32.mrf.mxu2 }
 0x351   : > { %v3748_v59 = vsel %vm3745_vm15, %v3747_v29, %v3743_v3  ;;  %5114 = vpow2.f32 %v4517_v13  ;;  %v5109_v12 = vpop.eup %5108  ;;  %v7784_v61 = vadd.f32 1.0, %v5107_v1  ;;  %v2424_v39 = vand.u32 2147483647, %v7756_v32 }
 0x352   : > { %3873 = vst [vmem:[%s5891_s29 + $0x2e8] sm:$0xff] %v3748_v59  ;;  %5116 = vpow2.f32 %v4522_v23  ;;  %v5111_v55 = vpop.eup %5110  ;;  %v2401_v40 = vmul.f32 %v5109_v12, %v7738_v24  ;;  %v7791_v28 = vadd.f32 %v7712_v45, %v7479_v58  ;;  %vm2405_vm0 = vweird.f32 %v7738_v24  ;;  %v7807_v45 = vpop.f32.mrf.mxu0 }
 0x353   : > { %5118 = vrcp.f32 %v7771_v52  ;;  %v2426_v25 = vand.u32 2147483648, %v7756_v32  ;;  %v7800_v48 = vadd.f32 %v7678_v63, %v7521_v17  ;;  %vm7802_vm1 = vcmp.eq.f32.partialorder %v2409_v43, 8.507059e+37  ;;  %v7839_v23 = vpop.f32.mrf.mxu3 }
 0x354   : > { %5120 = vrcp.f32 %v7784_v61  ;;  %v2402_v54 = vsub.f32 1.0, %v2401_v40  ;;  %v2412_v15 = vor.u32 1.1754944e-38, %v2411_v36  ;;  %vm2420_vm2 = vweird.f32 %v7756_v32 }
 0x355   : > { %v2499_v60 = vand.u32 2147483647, %v7771_v52  ;;  %v2501_v57 = vand.u32 2147483648, %v7771_v52  ;;  %v7811_v34 = vadd.f32 1.0, %v5111_v55  ;;  %v1924_v63 = vadd.f32 %v7688_v56, %v1875_v21 }
 0x356   : > { %v5113_v20 = vpop.eup %5112  ;;  %v2403_v5 = vmul.f32 %v5109_v12, %v2402_v54  ;;  %vm2406_vm3 = vweird.f32 %v5109_v12  ;;  %vm7815_vm4 = vcmp.eq.f32.partialorder %v2424_v39, 8.507059e+37  ;;  %v2427_v44 = vor.u32 1.1754944e-38, %v2426_v25 }
 0x357   : > { %v5115_v26 = vpop.eup %5114  ;;  %v2416_v53 = vmul.f32 %v5113_v20, %v7756_v32  ;;  %vm2495_vm5 = vweird.f32 %v7771_v52  ;;  %v2514_v11 = vand.u32 2147483647, %v7784_v61  ;;  %5122 = vrcp.f32 %v7811_v34  ;;  %vm2407_vm7 = vmor %vm2405_vm0, %vm2406_vm3 }
 0x358   : > { %v5117_v19 = vpop.eup %5116  ;;  %v2404_v4 = vadd.f32 %v5109_v12, %v2403_v5  ;;  %vm2510_vm6 = vweird.f32 %v7784_v61  ;;  %v2516_v22 = vand.u32 2147483648, %v7784_v61  ;;  %v7826_v0 = vadd.f32 1.0, %v5115_v26  ;;  %v7851_v59 = vpop.f32.mrf.mxu2 }
 0x359   : > { %v5119_v56 = vpop.eup %5118  ;;  %v2417_v42 = vsub.f32 1.0, %v2416_v53  ;;  %vm7832_vm8 = vcmp.eq.f32.partialorder %v2499_v60, 8.507059e+37  ;;  %v2502_v31 = vor.u32 1.1754944e-38, %v2501_v57  ;;  %v7836_v41 = vadd.f32 1.0, %v5117_v19 }
 0x35a   : > { %v5121_v14 = vpop.eup %5120  ;;  %v2491_v27 = vmul.f32 %v5119_v56, %v7771_v52  ;;  %v4523_v10 = vmul.f32 -1.442695, %v1924_v63  ;;  %v2408_v47 = vsel %vm2407_vm7, %v5109_v12, %v2404_v4  ;;  %vm2421_vm9 = vweird.f32 %v5113_v20  ;;  %v7857_v54 = vpop.f32.mrf.mxu0 }
 0x35b   : > { %v2418_v18 = vmul.f32 %v5113_v20, %v2417_v42  ;;  %v2506_v13 = vmul.f32 %v5121_v14, %v7784_v61  ;;  %v2413_v24 = vsel %vm7802_vm1, %v2412_v15, %v2408_v47  ;;  %v2589_v21 = vand.u32 2147483647, %v7811_v34  ;;  %vm2422_vm11 = vmor %vm2420_vm2, %vm2421_vm9  ;;  %v7870_v63 = vpop.f32.mrf.mxu1 }
 0x35c   : > { %v2492_v7 = vsub.f32 1.0, %v2491_v27  ;;  %5124 = vrcp.f32 %v7826_v0  ;;  %3784 = vst [vmem:[%s5891_s29 + $0x20] sm:$0xff] %v2413_v24  ;;  %vm7846_vm10 = vcmp.eq.f32.partialorder %v2514_v11, 8.507059e+37  ;;  %v2591_v1 = vand.u32 2147483648, %v7811_v34 }
 0x35d   : > { %v2419_v29 = vadd.f32 %v5113_v20, %v2418_v18  ;;  %v2507_v3 = vsub.f32 1.0, %v2506_v13  ;;  %v5123_v36 = vpop.eup %5122  ;;  %vm2496_vm12 = vweird.f32 %v5119_v56  ;;  %v2517_v55 = vor.u32 1.1754944e-38, %v2516_v22 }
 0x35e   : > { %v2493_v12 = vmul.f32 %v5119_v56, %v2492_v7  ;;  %5126 = vrcp.f32 %v7836_v41  ;;  %vm2511_vm13 = vweird.f32 %v5121_v14  ;;  %v2581_v25 = vmul.f32 %v5123_v36, %v7811_v34  ;;  %vm2497_vm0 = vmor %vm2495_vm5, %vm2496_vm12 }
 0x35f   : > { %v2423_v40 = vsel %vm2422_vm11, %v5113_v20, %v2419_v29  ;;  %v2508_v39 = vmul.f32 %v5121_v14, %v2507_v3  ;;  %vm2585_vm14 = vweird.f32 %v7811_v34  ;;  %vm7862_vm15 = vcmp.eq.f32.partialorder %v2589_v21, 8.507059e+37  ;;  %vm2512_vm2 = vmor %vm2510_vm6, %vm2511_vm13 }
 0x360   : > { %v2428_v46 = vsel %vm7815_vm4, %v2427_v44, %v2423_v40  ;;  %v2494_v15 = vadd.f32 %v5119_v56, %v2493_v12  ;;  %v2582_v60 = vsub.f32 1.0, %v2581_v25  ;;  %v2592_v57 = vor.u32 1.1754944e-38, %v2591_v1  ;;  %v7899_v24 = vpop.f32.mrf.mxu2 }
 0x361   : > { %3785 = vst [vmem:[%s5891_s29 + $0x28] sm:$0xff] %v2428_v46  ;;  %v2509_v20 = vadd.f32 %v5121_v14, %v2508_v39  ;;  %vm2600_vm1 = vweird.f32 %v7826_v0  ;;  %vm2586_vm3 = vweird.f32 %v5123_v36  ;;  %5128 = vpow2.f32 %v4523_v10 }
 0x362   : > { %v5125_v26 = vpop.eup %5124  ;;  %v2498_v5 = vsel %vm2497_vm0, %v5119_v56, %v2494_v15  ;;  %v1829_v52 = vadd.f32 %v7703_v2, %v7766_v30  ;;  %v2583_v19 = vmul.f32 %v5123_v36, %v2582_v60  ;;  %v2604_v61 = vand.u32 2147483647, %v7826_v0  ;;  %vm2587_vm5 = vmor %vm2585_vm14, %vm2586_vm3 }
 0x363   : > { %v2503_v53 = vsel %vm7832_vm8, %v2502_v31, %v2498_v5  ;;  %v2513_v33 = vsel %vm2512_vm2, %v5121_v14, %v2509_v20  ;;  %v2596_v44 = vmul.f32 %v5125_v26, %v7826_v0  ;;  %v2606_v4 = vand.u32 2147483648, %v7826_v0  ;;  %v7889_v14 = vpop.f32.mrf.mxu3 }
 0x364   : > { %v5127_v11 = vpop.eup %5126  ;;  %3790 = vst [vmem:[%s5891_s29 + $0x50] sm:$0xff] %v2503_v53  ;;  %v2518_v56 = vsel %vm7846_vm10, %v2517_v55, %v2513_v33  ;;  %vm2675_vm4 = vweird.f32 %v7836_v41  ;;  %v2584_v2 = vadd.f32 %v5123_v36, %v2583_v19  ;;  %v2679_v22 = vand.u32 2147483647, %v7836_v41  ;;  %v1892_v55 = vpop.f32.mrf.mxu1 }
 0x365   : > { %3791 = vst [vmem:[%s5891_s29 + $0x58] sm:$0xff] %v2518_v56  ;;  %v2597_v30 = vsub.f32 1.0, %v2596_v44  ;;  %v2671_v42 = vmul.f32 %v5127_v11, %v7836_v41  ;;  %v2681_v27 = vand.u32 2147483648, %v7836_v41  ;;  %v4528_v38 = vmul.f32 -1.442695, %v1829_v52 }
 0x366   : > { %v1927_v31 = vadd.f32 %v7734_v6, %v7762_v49  ;;  %v1831_v10 = vadd.f32 %v7747_v8, %v7782_v50  ;;  %v2588_v47 = vsel %vm2587_vm5, %v5123_v36, %v2584_v2  ;;  %vm2601_vm6 = vweird.f32 %v5125_v26  ;;  %v7906_v8 = vpop.f32.mrf.mxu0 }
 0x367   : > { %v2598_v18 = vmul.f32 %v5125_v26, %v2597_v30  ;;  %v2672_v13 = vsub.f32 1.0, %v2671_v42  ;;  %v5129_v7 = vpop.eup %5128  ;;  %v2593_v34 = vsel %vm7862_vm15, %v2592_v57, %v2588_v47  ;;  %5130 = vpow2.f32 %v4528_v38  ;;  %vm2602_vm8 = vmor %vm2600_vm1, %vm2601_vm6 }
 0x368   : > { %v4529_v21 = vmul.f32 -1.442695, %v1927_v31  ;;  %v4534_v29 = vmul.f32 -1.442695, %v1831_v10  ;;  %3796 = vst [vmem:[%s5891_s29 + $0x80] sm:$0xff] %v2593_v34  ;;  %vm2676_vm7 = vweird.f32 %v5127_v11  ;;  %v7904_v6 = vadd.f32 1.0, %v5129_v7  ;;  %v7949_v5 = vpop.f32.mrf.mxu2 }
 0x369   : > { %v2599_v3 = vadd.f32 %v5125_v26, %v2598_v18  ;;  %v2673_v43 = vmul.f32 %v5127_v11, %v2672_v13  ;;  %v2607_v49 = vor.u32 1.1754944e-38, %v2606_v4  ;;  %v1929_v50 = vadd.f32 %v7793_v35, %v7778_v9  ;;  %vm2677_vm10 = vmor %vm2675_vm4, %vm2676_vm7 }
 0x36a   : > { %5132 = vpow2.f32 %v4529_v21  ;;  %v1834_v1 = vadd.f32 %v7807_v45, %v7800_v48  ;;  %vm2605_vm9 = vcmp.eq.f32.partialorder %v2604_v61, 8.507059e+37  ;;  %v2682_v0 = vor.u32 1.1754944e-38, %v2681_v27 }
 0x36b   : > { %v2603_v36 = vsel %vm2602_vm8, %v5125_v26, %v2599_v3  ;;  %v2674_v12 = vadd.f32 %v5127_v11, %v2673_v43  ;;  %5134 = vrcp.f32 %v7904_v6  ;;  %v1787_v39 = vadd.f32 %v7729_v16, %v7521_v17  ;;  %v7932_v20 = vpop.f32.mrf.mxu3 }
 0x36c   : > { %v2608_v40 = vsel %vm2605_vm9, %v2607_v49, %v2603_v36  ;;  %5136 = vpow2.f32 %v4534_v29  ;;  %vm2680_vm11 = vcmp.eq.f32.partialorder %v2679_v22, 8.507059e+37  ;;  %v4535_v35 = vmul.f32 -1.442695, %v1929_v50  ;;  %v7974_v42 = vpop.f32.mrf.mxu1 }
 0x36d   : > { %3797 = vst [vmem:[%s5891_s29 + $0x88] sm:$0xff] %v2608_v40  ;;  %v2678_v9 = vsel %vm2677_vm10, %v5127_v11, %v2674_v12  ;;  %v4540_v48 = vmul.f32 -1.442695, %v1834_v1  ;;  %v5131_v45 = vpop.eup %5130  ;;  %v1885_v46 = vadd.f32 %v7753_v62, %v7479_v58  ;;  %v1932_v15 = vadd.f32 %v7851_v59, %v7791_v28 }
 0x36e   : > { %v2683_v25 = vsel %vm2680_vm11, %v2682_v0, %v2678_v9  ;;  %v7925_v41 = vadd.f32 1.0, %v5131_v45  ;;  %v7929_v16 = vadd.f32 %v7819_v51, %v7479_v58  ;;  %5138 = vpow2.f32 %v4535_v35  ;;  %v7964_v44 = vpop.f32.mrf.mxu0 }
 0x36f   : > { %3802 = vst [vmem:[%s5891_s29 + $0xb0] sm:$0xff] %v2683_v25  ;;  %v1836_v32 = vadd.f32 %v7857_v54, %v1787_v39  ;;  %v2694_v57 = vand.u32 2147483647, %v7904_v6  ;;  %v7937_v62 = vadd.f32 %v7773_v37, %v7521_v17  ;;  %5140 = vpow2.f32 %v4540_v48 }
 0x370   : > { %v5133_v60 = vpop.eup %5132  ;;  %v4541_v28 = vmul.f32 -1.442695, %v1932_v15  ;;  %v2696_v26 = vand.u32 2147483648, %v7904_v6  ;;  %5142 = vrcp.f32 %v7925_v41  ;;  %v7943_v51 = vadd.f32 %v7870_v63, %v7479_v58  ;;  %v8008_v0 = vpop.f32.mrf.mxu2 }
 0x371   : > { %v5135_v59 = vpop.eup %5134  ;;  %v7947_v54 = vadd.f32 %v7839_v23, %v7521_v17  ;;  %vm2690_vm12 = vweird.f32 %v7904_v6  ;;  %v7953_v53 = vadd.f32 1.0, %v5133_v60  ;;  %v7956_v33 = vadd.f32 %v1892_v55, %v7479_v58 }
 0x372   : > { %v5137_v52 = vpop.eup %5136  ;;  %v2686_v37 = vmul.f32 %v5135_v59, %v7904_v6  ;;  %v7962_v63 = vadd.f32 %v7889_v14, %v7521_v17  ;;  %5144 = vpow2.f32 %v4541_v28  ;;  %v4546_v23 = vmul.f32 -1.442695, %v1836_v32 }
 0x373   : > { %v7958_v19 = vadd.f32 1.0, %v5137_v52  ;;  %vm7966_vm13 = vcmp.eq.f32.partialorder %v2694_v57, 8.507059e+37  ;;  %v2769_v61 = vand.u32 2147483647, %v7925_v41  ;;  %5146 = vrcp.f32 %v7953_v53  ;;  %v7997_v43 = vpop.f32.mrf.mxu3 }
 0x374   : > { %v2687_v11 = vsub.f32 1.0, %v2686_v37  ;;  %v5139_v4 = vpop.eup %5138  ;;  %v2697_v2 = vor.u32 1.1754944e-38, %v2696_v26  ;;  %v2771_v30 = vand.u32 2147483648, %v7925_v41  ;;  %v7977_v22 = vadd.f32 %v7899_v24, %v1885_v46  ;;  %v8029_v37 = vpop.f32.mrf.mxu1 }
 0x375   : > { %5148 = vrcp.f32 %v7958_v19  ;;  %v5141_v14 = vpop.eup %5140  ;;  %vm2691_vm14 = vweird.f32 %v5135_v59  ;;  %vm2765_vm15 = vweird.f32 %v7925_v41  ;;  %v7980_v38 = vadd.f32 1.0, %v5139_v4 }
 0x376   : > { %v2688_v27 = vmul.f32 %v5135_v59, %v2687_v11  ;;  %v5143_v31 = vpop.eup %5142  ;;  %v2784_v10 = vand.u32 2147483647, %v7953_v53  ;;  %v2786_v47 = vand.u32 2147483648, %v7953_v53  ;;  %v7984_v18 = vadd.f32 1.0, %v5141_v14  ;;  %vm2692_vm1 = vmor %vm2690_vm12, %vm2691_vm14  ;;  %v8019_v32 = vpop.f32.mrf.mxu0 }
 0x377   : > { %5150 = vpow2.f32 %v4546_v23  ;;  %v2761_v7 = vmul.f32 %v5143_v31, %v7925_v41  ;;  %vm7987_vm0 = vcmp.eq.f32.partialorder %v2769_v61, 8.507059e+37  ;;  %v2859_v34 = vand.u32 2147483647, %v7958_v19 }
 0x378   : > { %v2689_v13 = vadd.f32 %v5135_v59, %v2688_v27  ;;  %v5145_v21 = vpop.eup %5144  ;;  %v2772_v29 = vor.u32 1.1754944e-38, %v2771_v30  ;;  %vm2780_vm2 = vweird.f32 %v7953_v53  ;;  %v2861_v3 = vand.u32 2147483648, %v7958_v19 }
 0x379   : > { %5152 = vrcp.f32 %v7980_v38  ;;  %v5147_v49 = vpop.eup %5146  ;;  %v2762_v1 = vsub.f32 1.0, %v2761_v7  ;;  %vm2855_vm3 = vweird.f32 %v7958_v19  ;;  %vm8004_vm4 = vcmp.eq.f32.partialorder %v2784_v10, 8.507059e+37 }
 0x37a   : > { %v2693_v50 = vsel %vm2692_vm1, %v5135_v59, %v2689_v13  ;;  %5154 = vrcp.f32 %v7984_v18  ;;  %v2776_v12 = vmul.f32 %v5147_v49, %v7953_v53  ;;  %v2787_v40 = vor.u32 1.1754944e-38, %v2786_v47 }
 0x37b   : > { %v5149_v36 = vpop.eup %5148  ;;  %v2698_v6 = vsel %vm7966_vm13, %v2697_v2, %v2693_v50  ;;  %v2763_v39 = vmul.f32 %v5143_v31, %v2762_v1  ;;  %vm2766_vm5 = vweird.f32 %v5143_v31  ;;  %vm8012_vm6 = vcmp.eq.f32.partialorder %v2859_v34, 8.507059e+37  ;;  %v8049_v24 = vpop.f32.mrf.mxu3 }
 0x37c   : > { %3803 = vst [vmem:[%s5891_s29 + $0xb8] sm:$0xff] %v2698_v6  ;;  %v2851_v9 = vmul.f32 %v5149_v36, %v7958_v19  ;;  %v2777_v45 = vsub.f32 1.0, %v2776_v12  ;;  %v2862_v25 = vor.u32 1.1754944e-38, %v2861_v3  ;;  %v2874_v46 = vand.u32 2147483647, %v7980_v38  ;;  %vm2767_vm8 = vmor %vm2765_vm15, %vm2766_vm5  ;;  %v1941_v50 = vpop.f32.mrf.mxu2 }
 0x37d   : > { %v5151_v48 = vpop.eup %5150  ;;  %v8017_v15 = vadd.f32 1.0, %v5145_v21  ;;  %v2764_v60 = vadd.f32 %v5143_v31, %v2763_v39  ;;  %vm2870_vm7 = vweird.f32 %v7980_v38  ;;  %v2876_v28 = vand.u32 2147483648, %v7980_v38 }
 0x37e   : > { %v2852_v57 = vsub.f32 1.0, %v2851_v9  ;;  %v2778_v26 = vmul.f32 %v5147_v49, %v2777_v45  ;;  %vm2781_vm9 = vweird.f32 %v5147_v49  ;;  %vm2945_vm10 = vweird.f32 %v7984_v18  ;;  %v8068_v39 = vpop.f32.mrf.mxu0 }
 0x37f   : > { %v5153_v59 = vpop.eup %5152  ;;  %5156 = vrcp.f32 %v8017_v15  ;;  %v8027_v52 = vadd.f32 1.0, %v5151_v48  ;;  %v2768_v11 = vsel %vm2767_vm8, %v5143_v31, %v2764_v60  ;;  %vm2856_vm11 = vweird.f32 %v5149_v36  ;;  %vm2782_vm13 = vmor %vm2780_vm2, %vm2781_vm9 }
 0x380   : > { %v5155_v23 = vpop.eup %5154  ;;  %v2853_v56 = vmul.f32 %v5149_v36, %v2852_v57  ;;  %v2866_v61 = vmul.f32 %v5153_v59, %v7980_v38  ;;  %v2773_v41 = vsel %vm7987_vm0, %v2772_v29, %v2768_v11  ;;  %v2779_v4 = vadd.f32 %v5147_v49, %v2778_v26  ;;  %vm2857_vm14 = vmor %vm2855_vm3, %vm2856_vm11 }
 0x381   : > { %vm8034_vm12 = vcmp.eq.f32.partialorder %v2874_v46, 8.507059e+37  ;;  %v2941_v30 = vmul.f32 %v5155_v23, %v7984_v18  ;;  %3808 = vst [vmem:[%s5891_s29 + $0xe0] sm:$0xff] %v2773_v41  ;;  %v2949_v31 = vand.u32 2147483647, %v7984_v18  ;;  %v2951_v10 = vand.u32 2147483648, %v7984_v18 }
 0x382   : > { %v2854_v14 = vadd.f32 %v5149_v36, %v2853_v56  ;;  %v2867_v27 = vsub.f32 1.0, %v2866_v61  ;;  %v2783_v47 = vsel %vm2782_vm13, %v5147_v49, %v2779_v4  ;;  %5158 = vrcp.f32 %v8027_v52 }
 0x383   : > { %v2942_v13 = vsub.f32 1.0, %v2941_v30  ;;  %v4547_v7 = vmul.f32 -1.442695, %v7977_v22  ;;  %v2788_v53 = vsel %vm8004_vm4, %v2787_v40, %v2783_v47  ;;  %vm2871_vm15 = vweird.f32 %v5153_v59 }
 0x384   : > { %v2858_v34 = vsel %vm2857_vm14, %v5149_v36, %v2854_v14  ;;  %v2868_v21 = vmul.f32 %v5153_v59, %v2867_v27  ;;  %3809 = vst [vmem:[%s5891_s29 + $0xe8] sm:$0xff] %v2788_v53  ;;  %vm2946_vm0 = vweird.f32 %v5155_v23  ;;  %v2964_v49 = vand.u32 2147483647, %v8017_v15  ;;  %vm2872_vm2 = vmor %vm2870_vm7, %vm2871_vm15 }
 0x385   : > { %v5157_v29 = vpop.eup %5156  ;;  %v2863_v19 = vsel %vm8012_vm6, %v2862_v25, %v2858_v34  ;;  %v2943_v3 = vmul.f32 %v5155_v23, %v2942_v13  ;;  %v2877_v1 = vor.u32 1.1754944e-38, %v2876_v28  ;;  %vm8058_vm1 = vcmp.eq.f32.partialorder %v2949_v31, 8.507059e+37  ;;  %vm2947_vm3 = vmor %vm2945_vm10, %vm2946_vm0 }
 0x386   : > { %3814 = vst [vmem:[%s5891_s29 + $0x110] sm:$0xff] %v2863_v19  ;;  %v2869_v22 = vadd.f32 %v5153_v59, %v2868_v21  ;;  %v2956_v36 = vmul.f32 %v5157_v29, %v8017_v15  ;;  %v2966_v55 = vand.u32 2147483648, %v8017_v15  ;;  %5160 = vpow2.f32 %v4547_v7 }
 0x387   : > { %v2944_v12 = vadd.f32 %v5155_v23, %v2943_v3  ;;  %v1839_v40 = vadd.f32 %v7906_v8, %v7937_v62  ;;  %v2952_v35 = vor.u32 1.1754944e-38, %v2951_v10  ;;  %vm2960_vm4 = vweird.f32 %v8017_v15  ;;  %v1899_v62 = vpop.f32.mrf.mxu1  ;;  %v8101_v10 = vpop.f32.mrf.mxu2 }
 0x388   : > { %v2873_v9 = vsel %vm2872_vm2, %v5153_v59, %v2869_v22  ;;  %v2957_v48 = vsub.f32 1.0, %v2956_v36  ;;  %v5159_v38 = vpop.eup %5158  ;;  %vm8076_vm5 = vcmp.eq.f32.partialorder %v2964_v49, 8.507059e+37  ;;  %vm2961_vm6 = vweird.f32 %v5157_v29 }
 0x389   : > { %v2878_v45 = vsel %vm8034_vm12, %v2877_v1, %v2873_v9  ;;  %v2948_v25 = vsel %vm2947_vm3, %v5155_v23, %v2944_v12  ;;  %v4552_v8 = vmul.f32 -1.442695, %v1839_v40  ;;  %v3031_v57 = vmul.f32 %v5159_v38, %v8027_v52  ;;  %vm2962_vm7 = vmor %vm2960_vm4, %vm2961_vm6 }
 0x38a   : > { %3815 = vst [vmem:[%s5891_s29 + $0x118] sm:$0xff] %v2878_v45  ;;  %v2953_v18 = vsel %vm8058_vm1, %v2952_v35, %v2948_v25  ;;  %v2958_v60 = vmul.f32 %v5157_v29, %v2957_v48  ;;  %v2967_v28 = vor.u32 1.1754944e-38, %v2966_v55  ;;  %v1937_v59 = vadd.f32 %v7949_v5, %v7929_v16 }
 0x38b   : > { %3820 = vst [vmem:[%s5891_s29 + $0x140] sm:$0xff] %v2953_v18  ;;  %5162 = vpow2.f32 %v4552_v8  ;;  %v1841_v26 = vadd.f32 %v7964_v44, %v7947_v54  ;;  %v3032_v11 = vsub.f32 1.0, %v3031_v57  ;;  %v3039_v56 = vand.u32 2147483647, %v8027_v52  ;;  %v1804_v54 = vpop.f32.mrf.mxu3 }
 0x38c   : > { %v2959_v23 = vadd.f32 %v5157_v29, %v2958_v60  ;;  %v3041_v61 = vand.u32 2147483648, %v8027_v52  ;;  %v5161_v41 = vpop.eup %5160  ;;  %v4553_v4 = vmul.f32 -1.442695, %v1937_v59  ;;  %v1939_v30 = vadd.f32 %v8008_v0, %v7943_v51 }
 0x38d   : > { %v4558_v2 = vmul.f32 -1.442695, %v1841_v26  ;;  %v1844_v16 = vadd.f32 %v8019_v32, %v7962_v63  ;;  %v3033_v44 = vmul.f32 %v5159_v38, %v3032_v11  ;;  %vm3036_vm8 = vweird.f32 %v5159_v38  ;;  %v1848_v32 = vpop.f32.mrf.mxu0 }
 0x38e   : > { %v2963_v5 = vsel %vm2962_vm7, %v5157_v29, %v2959_v23  ;;  %v8097_v14 = vadd.f32 1.0, %v5161_v41  ;;  %5164 = vpow2.f32 %v4553_v4  ;;  %v4559_v15 = vmul.f32 -1.442695, %v1939_v30 }
 0x38f   : > { %v2968_v27 = vsel %vm8076_vm5, %v2967_v28, %v2963_v5  ;;  %v4564_v31 = vmul.f32 -1.442695, %v1844_v16  ;;  %v3034_v47 = vadd.f32 %v5159_v38, %v3033_v44  ;;  %vm3035_vm9 = vweird.f32 %v8027_v52  ;;  %v1902_v21 = vpop.f32.mrf.mxu1  ;;  %v8153_v8 = vpop.f32.mrf.mxu2 }
 0x390   : > { %3821 = vst [vmem:[%s5891_s29 + $0x148] sm:$0xff] %v2968_v27  ;;  %5166 = vrcp.f32 %v8097_v14  ;;  %vm3037_vm10 = vmor %vm3035_vm9, %vm3036_vm8  ;;  %v3042_v63 = vor.u32 1.1754944e-38, %v3041_v61  ;;  %v1942_v0 = vadd.f32 %v1941_v50, %v7956_v33  ;;  %vm3040_vm11 = vcmp.eq.f32.partialorder %v3039_v56, 8.507059e+37 }
 0x391   : > { %v5163_v51 = vpop.eup %5162  ;;  %5168 = vpow2.f32 %v4558_v2  ;;  %v3038_v13 = vsel %vm3037_vm10, %v5159_v38, %v3034_v47  ;;  %v1895_v34 = vadd.f32 %v7974_v42, %v7479_v58  ;;  %v1797_v52 = vadd.f32 %v7932_v20, %v7521_v17 }
 0x392   : > { %v8107_v7 = vadd.f32 1.0, %v5163_v51  ;;  %5170 = vpow2.f32 %v4559_v15  ;;  %v3043_v53 = vsel %vm3040_vm11, %v3042_v63, %v3038_v13  ;;  %v3054_v29 = vand.u32 2147483647, %v8097_v14 }
 0x393   : > { %5172 = vpow2.f32 %v4564_v31  ;;  %3826 = vst [vmem:[%s5891_s29 + $0x170] sm:$0xff] %v3043_v53  ;;  %v3056_v33 = vand.u32 2147483648, %v8097_v14  ;;  %v8119_v19 = vadd.f32 %v8029_v37, %v7479_v58  ;;  %v1800_v42 = vadd.f32 %v7997_v43, %v7521_v17 }
 0x394   : > { %5174 = vrcp.f32 %v8107_v7  ;;  %v5165_v3 = vpop.eup %5164  ;;  %v8124_v49 = vadd.f32 %v1899_v62, %v7479_v58  ;;  %v4565_v20 = vmul.f32 -1.442695, %v1942_v0  ;;  %v1846_v50 = vadd.f32 %v8068_v39, %v1797_v52  ;;  %v1806_v39 = vpop.f32.mrf.mxu3 }
 0x395   : > { %vm3050_vm12 = vweird.f32 %v8097_v14  ;;  %v8128_v1 = vadd.f32 1.0, %v5165_v3  ;;  %v8132_v6 = vadd.f32 %v8049_v24, %v7521_v17  ;;  %v8135_v37 = vadd.f32 %v1902_v21, %v7479_v58  ;;  %v8167_v23 = vpop.f32.mrf.mxu0 }
 0x396   : > { %v5167_v22 = vpop.eup %5166  ;;  %v3129_v12 = vand.u32 2147483647, %v8107_v7  ;;  %v8140_v55 = vadd.f32 %v1804_v54, %v7521_v17  ;;  %v4570_v40 = vmul.f32 -1.442695, %v1846_v50  ;;  %vm8142_vm13 = vcmp.eq.f32.partialorder %v3054_v29, 8.507059e+37 }
 0x397   : > { %v5169_v36 = vpop.eup %5168  ;;  %v3046_v43 = vmul.f32 %v5167_v22, %v8097_v14  ;;  %v3057_v24 = vor.u32 1.1754944e-38, %v3056_v33  ;;  %v3131_v48 = vand.u32 2147483648, %v8107_v7  ;;  %5176 = vrcp.f32 %v8128_v1 }
 0x398   : > { %v5171_v9 = vpop.eup %5170  ;;  %vm3125_vm14 = vweird.f32 %v8107_v7  ;;  %v8149_v25 = vadd.f32 1.0, %v5169_v36  ;;  %5178 = vpow2.f32 %v4565_v20  ;;  %vm3051_vm15 = vweird.f32 %v5167_v22 }
 0x399   : > { %v5173_v38 = vpop.eup %5172  ;;  %v3047_v45 = vsub.f32 1.0, %v3046_v43  ;;  %v8151_v46 = vadd.f32 1.0, %v5171_v9  ;;  %5180 = vpow2.f32 %v4570_v40  ;;  %v8158_v60 = vadd.f32 %v1806_v39, %v7521_v17  ;;  %vm3052_vm2 = vmor %vm3050_vm12, %vm3051_vm15 }
 0x39a   : > { %v5175_v62 = vpop.eup %5174  ;;  %v8155_v18 = vadd.f32 1.0, %v5173_v38  ;;  %vm8161_vm0 = vcmp.eq.f32.partialorder %v3129_v12, 8.507059e+37  ;;  %v3144_v26 = vand.u32 2147483647, %v8128_v1  ;;  %5182 = vrcp.f32 %v8149_v25 }
 0x39b   : > { %v3048_v57 = vmul.f32 %v5167_v22, %v3047_v45  ;;  %v3121_v28 = vmul.f32 %v5175_v62, %v8107_v7  ;;  %v3132_v11 = vor.u32 1.1754944e-38, %v3131_v48  ;;  %v3146_v56 = vand.u32 2147483648, %v8128_v1  ;;  %v1948_v7 = vpop.f32.mrf.mxu2 }
 0x39c   : > { %5184 = vrcp.f32 %v8151_v46  ;;  %v1944_v17 = vadd.f32 %v8101_v10, %v1895_v34  ;;  %vm3140_vm1 = vweird.f32 %v8128_v1  ;;  %v8173_v4 = vadd.f32 %v1848_v32, %v1800_v42 }
 0x39d   : > { %v3049_v61 = vadd.f32 %v5167_v22, %v3048_v57  ;;  %v3122_v41 = vsub.f32 1.0, %v3121_v28  ;;  %v5177_v2 = vpop.eup %5176  ;;  %vm3126_vm3 = vweird.f32 %v5175_v62  ;;  %v3219_v30 = vand.u32 2147483647, %v8149_v25 }
 0x39e   : > { %v3221_v16 = vand.u32 2147483648, %v8149_v25  ;;  %5186 = vrcp.f32 %v8155_v18  ;;  %v5179_v54 = vpop.eup %5178  ;;  %v3136_v27 = vmul.f32 %v5177_v2, %v8128_v1  ;;  %vm8182_vm4 = vcmp.eq.f32.partialorder %v3144_v26, 8.507059e+37  ;;  %vm3127_vm7 = vmor %vm3125_vm14, %vm3126_vm3 }
 0x39f   : > { %v3053_v5 = vsel %vm3052_vm2, %v5167_v22, %v3049_v61  ;;  %v3123_v44 = vmul.f32 %v5175_v62, %v3122_v41  ;;  %v3234_v14 = vand.u32 2147483647, %v8151_v46  ;;  %v5181_v31 = vpop.eup %5180  ;;  %v3147_v47 = vor.u32 1.1754944e-38, %v3146_v56 }
 0x3a0   : > { %v3058_v10 = vsel %vm8142_vm13, %v3057_v24, %v3053_v5  ;;  %v3236_v51 = vand.u32 2147483648, %v8151_v46  ;;  %v4571_v63 = vmul.f32 -1.442695, %v1944_v17  ;;  %v5183_v0 = vpop.eup %5182  ;;  %v3137_v13 = vsub.f32 1.0, %v3136_v27  ;;  %v1853_v24 = vpop.f32.mrf.mxu0 }
 0x3a1   : > { %3827 = vst [vmem:[%s5891_s29 + $0x178] sm:$0xff] %v3058_v10  ;;  %v3124_v32 = vadd.f32 %v5175_v62, %v3123_v44  ;;  %vm3215_vm5 = vweird.f32 %v8149_v25  ;;  %vm3230_vm6 = vweird.f32 %v8151_v46  ;;  %vm3141_vm8 = vweird.f32 %v5177_v2 }
 0x3a2   : > { %v5185_v53 = vpop.eup %5184  ;;  %v3211_v34 = vmul.f32 %v5183_v0, %v8149_v25  ;;  %vm8197_vm9 = vcmp.eq.f32.partialorder %v3219_v30, 8.507059e+37  ;;  %v3222_v21 = vor.u32 1.1754944e-38, %v3221_v16  ;;  %v8201_v29 = vadd.f32 1.0, %v5179_v54  ;;  %vm3142_vm11 = vmor %vm3140_vm1, %vm3141_vm8 }
 0x3a3   : > { %v3128_v33 = vsel %vm3127_vm7, %v5175_v62, %v3124_v32  ;;  %v3138_v3 = vmul.f32 %v5177_v2, %v3137_v13  ;;  %v3226_v42 = vmul.f32 %v5185_v53, %v8151_v46  ;;  %vm8204_vm10 = vcmp.eq.f32.partialorder %v3234_v14, 8.507059e+37  ;;  %v1951_v15 = vpop.f32.mrf.mxu2 }
 0x3a4   : > { %v5187_v50 = vpop.eup %5186  ;;  %v3133_v22 = vsel %vm8161_vm0, %v3132_v11, %v3128_v33  ;;  %v3212_v36 = vsub.f32 1.0, %v3211_v34  ;;  %v3237_v43 = vor.u32 1.1754944e-38, %v3236_v51  ;;  %v8210_v12 = vadd.f32 1.0, %v5181_v31 }
 0x3a5   : > { %3832 = vst [vmem:[%s5891_s29 + $0x1a0] sm:$0xff] %v3133_v22  ;;  %v3139_v40 = vadd.f32 %v5177_v2, %v3138_v3  ;;  %v3227_v39 = vsub.f32 1.0, %v3226_v42  ;;  %v3301_v9 = vmul.f32 %v5187_v50, %v8155_v18  ;;  %v3309_v35 = vand.u32 2147483647, %v8155_v18 }
 0x3a6   : > { %v3213_v48 = vmul.f32 %v5183_v0, %v3212_v36  ;;  %vm3216_vm12 = vweird.f32 %v5183_v0  ;;  %v3311_v38 = vand.u32 2147483648, %v8155_v18  ;;  %5188 = vrcp.f32 %v8201_v29 }
 0x3a7   : > { %v3143_v45 = vsel %vm3142_vm11, %v5177_v2, %v3139_v40  ;;  %v3228_v62 = vmul.f32 %v5185_v53, %v3227_v39  ;;  %vm3231_vm13 = vweird.f32 %v5185_v53  ;;  %v3302_v57 = vsub.f32 1.0, %v3301_v9  ;;  %vm3217_vm15 = vmor %vm3215_vm5, %vm3216_vm12 }
 0x3a8   : > { %v3148_v28 = vsel %vm8182_vm4, %v3147_v47, %v3143_v45  ;;  %v3214_v59 = vadd.f32 %v5183_v0, %v3213_v48  ;;  %vm3305_vm14 = vweird.f32 %v8155_v18  ;;  %5190 = vrcp.f32 %v8210_v12  ;;  %vm3232_vm1 = vmor %vm3230_vm6, %vm3231_vm13 }
 0x3a9   : > { %3833 = vst [vmem:[%s5891_s29 + $0x1a8] sm:$0xff] %v3148_v28  ;;  %v3229_v1 = vadd.f32 %v5185_v53, %v3228_v62  ;;  %v3303_v26 = vmul.f32 %v5187_v50, %v3302_v57  ;;  %vm3306_vm0 = vweird.f32 %v5187_v50  ;;  %v3324_v11 = vand.u32 2147483647, %v8201_v29 }
 0x3aa   : > { %v3218_v56 = vsel %vm3217_vm15, %v5183_v0, %v3214_v59  ;;  %vm8230_vm2 = vcmp.eq.f32.partialorder %v3309_v35, 8.507059e+37  ;;  %v3312_v61 = vor.u32 1.1754944e-38, %v3311_v38  ;;  %5192 = vpow2.f32 %v4571_v63  ;;  %vm3307_vm3 = vmor %vm3305_vm14, %vm3306_vm0  ;;  %v1855_v0 = vpop.f32.mrf.mxu0 }
 0x3ab   : > { %v3223_v25 = vsel %vm8197_vm9, %v3222_v21, %v3218_v56  ;;  %v3233_v41 = vsel %vm3232_vm1, %v5185_v53, %v3229_v1  ;;  %v3304_v2 = vadd.f32 %v5187_v50, %v3303_v26  ;;  %v4576_v30 = vmul.f32 -1.442695, %v8173_v4  ;;  %v1953_v48 = vpop.f32.mrf.mxu2 }
 0x3ac   : > { %v5189_v16 = vpop.eup %5188  ;;  %3838 = vst [vmem:[%s5891_s29 + $0x1d0] sm:$0xff] %v3223_v25  ;;  %v3238_v46 = vsel %vm8204_vm10, %v3237_v43, %v3233_v41  ;;  %vm3320_vm4 = vweird.f32 %v8201_v29  ;;  %v3326_v54 = vand.u32 2147483648, %v8201_v29  ;;  %v1947_v5 = vadd.f32 %v8153_v8, %v8119_v19 }
 0x3ad   : > { %3839 = vst [vmem:[%s5891_s29 + $0x1d8] sm:$0xff] %v3238_v46  ;;  %v3308_v44 = vsel %vm3307_vm3, %v5187_v50, %v3304_v2  ;;  %v3316_v4 = vmul.f32 %v5189_v16, %v8201_v29  ;;  %vm8248_vm5 = vcmp.eq.f32.partialorder %v3324_v11, 8.507059e+37  ;;  %5194 = vpow2.f32 %v4576_v30 }
 0x3ae   : > { %v5191_v18 = vpop.eup %5190  ;;  %v3313_v14 = vsel %vm8230_vm2, %v3312_v61, %v3308_v44  ;;  %v4577_v31 = vmul.f32 -1.442695, %v1947_v5  ;;  %v1851_v10 = vadd.f32 %v8167_v23, %v8132_v6  ;;  %v1949_v19 = vadd.f32 %v1948_v7, %v8124_v49 }
 0x3af   : > { %3844 = vst [vmem:[%s5891_s29 + $0x200] sm:$0xff] %v3313_v14  ;;  %v3317_v8 = vsub.f32 1.0, %v3316_v4  ;;  %v3391_v47 = vmul.f32 %v5191_v18, %v8210_v12  ;;  %v3399_v51 = vand.u32 2147483647, %v8210_v12  ;;  %v1854_v63 = vadd.f32 %v1853_v24, %v8140_v55 }
 0x3b0   : > { %v5193_v32 = vpop.eup %5192  ;;  %5196 = vpow2.f32 %v4577_v31  ;;  %v4582_v13 = vmul.f32 -1.442695, %v1851_v10  ;;  %v4583_v53 = vmul.f32 -1.442695, %v1949_v19  ;;  %v1952_v34 = vadd.f32 %v1951_v15, %v8135_v37 }
 0x3b1   : > { %v3318_v52 = vmul.f32 %v5189_v16, %v3317_v8  ;;  %vm3321_vm6 = vweird.f32 %v5189_v16  ;;  %v3392_v6 = vsub.f32 1.0, %v3391_v47  ;;  %v8262_v23 = vadd.f32 1.0, %v5193_v32 }
 0x3b2   : > { %vm3396_vm7 = vweird.f32 %v5191_v18  ;;  %v3401_v49 = vand.u32 2147483648, %v8210_v12  ;;  %5198 = vpow2.f32 %v4582_v13  ;;  %v1856_v21 = vadd.f32 %v1855_v0, %v8158_v60  ;;  %vm3322_vm8 = vmor %vm3320_vm4, %vm3321_vm6  ;;  %v1904_v60 = vpop.f32.mrf.mxu1 }
 0x3b3   : > { %v5195_v33 = vpop.eup %5194  ;;  %v3319_v55 = vadd.f32 %v5189_v16, %v3318_v52  ;;  %v3393_v3 = vmul.f32 %v5191_v18, %v3392_v6  ;;  %5200 = vrcp.f32 %v8262_v23  ;;  %v4588_v42 = vmul.f32 -1.442695, %v1854_v63 }
 0x3b4   : > { %v3327_v37 = vor.u32 1.1754944e-38, %v3326_v54  ;;  %v8269_v20 = vadd.f32 1.0, %v5195_v33  ;;  %5202 = vpow2.f32 %v4583_v53  ;;  %v4589_v7 = vmul.f32 -1.442695, %v1952_v34 }
 0x3b5   : > { %v3323_v50 = vsel %vm3322_vm8, %v5189_v16, %v3319_v55  ;;  %v3394_v22 = vadd.f32 %v5191_v18, %v3393_v3  ;;  %vm3395_vm9 = vweird.f32 %v8210_v12  ;;  %v4594_v36 = vmul.f32 -1.442695, %v1856_v21 }
 0x3b6   : > { %v5197_v43 = vpop.eup %5196  ;;  %v3328_v40 = vsel %vm8248_vm5, %v3327_v37, %v3323_v50  ;;  %vm3397_vm10 = vmor %vm3395_vm9, %vm3396_vm7  ;;  %v3402_v29 = vor.u32 1.1754944e-38, %v3401_v49  ;;  %5204 = vrcp.f32 %v8269_v20  ;;  %vm3400_vm11 = vcmp.eq.f32.partialorder %v3399_v51, 8.507059e+37 }
 0x3b7   : > { %3845 = vst [vmem:[%s5891_s29 + $0x208] sm:$0xff] %v3328_v40  ;;  %v3398_v39 = vsel %vm3397_vm10, %v5191_v18, %v3394_v22  ;;  %5206 = vpow2.f32 %v4588_v42  ;;  %v1905_v12 = vadd.f32 %v1904_v60, %v7479_v58  ;;  %v8278_v24 = vadd.f32 1.0, %v5197_v43 }
 0x3b8   : > { %v5199_v9 = vpop.eup %5198  ;;  %v3403_v35 = vsel %vm3400_vm11, %v3402_v29, %v3398_v39  ;;  %5208 = vpow2.f32 %v4589_v7  ;;  %v3414_v45 = vand.u32 2147483647, %v8262_v23  ;;  %v3416_v62 = vand.u32 2147483648, %v8262_v23 }
 0x3b9   : > { %v5201_v38 = vpop.eup %5200  ;;  %3850 = vst [vmem:[%s5891_s29 + $0x230] sm:$0xff] %v3403_v35  ;;  %v8283_v57 = vadd.f32 1.0, %v5199_v9  ;;  %5210 = vpow2.f32 %v4594_v36  ;;  %v3489_v58 = vand.u32 2147483647, %v8269_v20  ;;  %v3491_v1 = vand.u32 2147483648, %v8269_v20 }
 0x3ba   : > { %v5203_v28 = vpop.eup %5202  ;;  %v3406_v59 = vmul.f32 %v5201_v38, %v8262_v23  ;;  %5212 = vrcp.f32 %v8278_v24  ;;  %v1954_v26 = vadd.f32 %v1953_v48, %v1905_v12  ;;  %vm3410_vm12 = vweird.f32 %v8262_v23 }
 0x3bb   : > { %5214 = vrcp.f32 %v8283_v57  ;;  %v8290_v17 = vadd.f32 1.0, %v5203_v28  ;;  %vm8293_vm13 = vcmp.eq.f32.partialorder %v3414_v45, 8.507059e+37  ;;  %v3417_v41 = vor.u32 1.1754944e-38, %v3416_v62 }
 0x3bc   : > { %v5205_v11 = vpop.eup %5204  ;;  %v3407_v56 = vsub.f32 1.0, %v3406_v59  ;;  %vm3411_vm14 = vweird.f32 %v5201_v38  ;;  %vm3485_vm15 = vweird.f32 %v8269_v20  ;;  %vm8300_vm0 = vcmp.eq.f32.partialorder %v3489_v58, 8.507059e+37 }
 0x3bd   : > { %v5207_v61 = vpop.eup %5206  ;;  %v3481_v2 = vmul.f32 %v5205_v11, %v8269_v20  ;;  %5216 = vrcp.f32 %v8290_v17  ;;  %v3492_v44 = vor.u32 1.1754944e-38, %v3491_v1  ;;  %v8304_v4 = vmul.f32 -1.442695, %v1954_v26  ;;  %vm3412_vm2 = vmor %vm3410_vm12, %vm3411_vm14 }
 0x3be   : > { %v5209_v30 = vpop.eup %5208  ;;  %v3408_v16 = vmul.f32 %v5201_v38, %v3407_v56  ;;  %vm3500_vm1 = vweird.f32 %v8278_v24  ;;  %v3504_v18 = vand.u32 2147483647, %v8278_v24  ;;  %v8308_v14 = vadd.f32 1.0, %v5207_v61 }
 0x3bf   : > { %v5211_v46 = vpop.eup %5210  ;;  %v3482_v54 = vsub.f32 1.0, %v3481_v2  ;;  %vm3486_vm3 = vweird.f32 %v5205_v11  ;;  %v3506_v8 = vand.u32 2147483648, %v8278_v24  ;;  %vm3575_vm4 = vweird.f32 %v8283_v57 }
 0x3c0   : > { %v5213_v27 = vpop.eup %5212  ;;  %v3409_v15 = vadd.f32 %v5201_v38, %v3408_v16  ;;  %v8316_v63 = vadd.f32 1.0, %v5209_v30  ;;  %5218 = vrcp.f32 %v8308_v14  ;;  %vm3487_vm5 = vmor %vm3485_vm15, %vm3486_vm3  ;;  %v3579_v52 = vand.u32 2147483647, %v8283_v57 }
 0x3c1   : > { %v5215_v31 = vpop.eup %5214  ;;  %v3483_v10 = vmul.f32 %v5205_v11, %v3482_v54  ;;  %v3496_v19 = vmul.f32 %v5213_v27, %v8278_v24  ;;  %v3581_v6 = vand.u32 2147483648, %v8283_v57  ;;  %v8326_v23 = vadd.f32 1.0, %v5211_v46 }
 0x3c2   : > { %v3413_v47 = vsel %vm3412_vm2, %v5201_v38, %v3409_v15  ;;  %v3571_v51 = vmul.f32 %v5215_v31, %v8283_v57  ;;  %vm3501_vm6 = vweird.f32 %v5213_v27  ;;  %vm8331_vm7 = vcmp.eq.f32.partialorder %v3504_v18, 8.507059e+37 }
 0x3c3   : > { %v3418_v0 = vsel %vm8293_vm13, %v3417_v41, %v3413_v47  ;;  %v3484_v32 = vadd.f32 %v5205_v11, %v3483_v10  ;;  %v3497_v13 = vsub.f32 1.0, %v3496_v19  ;;  %v5217_v53 = vpop.eup %5216  ;;  %vm3576_vm8 = vweird.f32 %v5215_v31  ;;  %vm3502_vm9 = vmor %vm3500_vm1, %vm3501_vm6 }
 0x3c4   : > { %3851 = vst [vmem:[%s5891_s29 + $0x238] sm:$0xff] %v3418_v0  ;;  %v3572_v34 = vsub.f32 1.0, %v3571_v51  ;;  %v3586_v33 = vmul.f32 %v5217_v53, %v8290_v17  ;;  %v3596_v7 = vand.u32 2147483648, %v8290_v17  ;;  %5220 = vrcp.f32 %v8316_v63  ;;  %vm3577_vm10 = vmor %vm3575_vm4, %vm3576_vm8 }
 0x3c5   : > { %v3488_v49 = vsel %vm3487_vm5, %v5205_v11, %v3484_v32  ;;  %v3498_v21 = vmul.f32 %v5213_v27, %v3497_v13  ;;  %v3507_v50 = vor.u32 1.1754944e-38, %v3506_v8  ;;  %v3582_v60 = vor.u32 1.1754944e-38, %v3581_v6 }
 0x3c6   : > { %v3493_v55 = vsel %vm8300_vm0, %v3492_v44, %v3488_v49  ;;  %v3573_v42 = vmul.f32 %v5215_v31, %v3572_v34  ;;  %v3587_v20 = vsub.f32 1.0, %v3586_v33  ;;  %5222 = vrcp.f32 %v8326_v23  ;;  %v5219_v36 = vpop.eup %5218 }
 0x3c7   : > { %3856 = vst [vmem:[%s5891_s29 + $0x260] sm:$0xff] %v3493_v55  ;;  %v3499_v37 = vadd.f32 %v5213_v27, %v3498_v21  ;;  %vm3591_vm11 = vweird.f32 %v5217_v53  ;;  %v3594_v29 = vand.u32 2147483647, %v8290_v17  ;;  %vm3580_vm12 = vcmp.eq.f32.partialorder %v3579_v52, 8.507059e+37 }
 0x3c8   : > { %v3574_v22 = vadd.f32 %v5215_v31, %v3573_v42  ;;  %v3588_v40 = vmul.f32 %v5217_v53, %v3587_v20  ;;  %v3661_v35 = vmul.f32 %v5219_v36, %v8308_v14  ;;  %vm3590_vm13 = vweird.f32 %v8290_v17 }
 0x3c9   : > { %v3503_v43 = vsel %vm3502_vm9, %v5213_v27, %v3499_v37  ;;  %v3597_v48 = vor.u32 1.1754944e-38, %v3596_v7  ;;  %vm3592_vm14 = vmor %vm3590_vm13, %vm3591_vm11  ;;  %v3669_v45 = vand.u32 2147483647, %v8308_v14  ;;  %v3671_v62 = vand.u32 2147483648, %v8308_v14 }
 0x3ca   : > { %v3508_v39 = vsel %vm8331_vm7, %v3507_v50, %v3503_v43  ;;  %v3578_v9 = vsel %vm3577_vm10, %v5215_v31, %v3574_v22  ;;  %v3589_v24 = vadd.f32 %v5217_v53, %v3588_v40  ;;  %v3662_v38 = vsub.f32 1.0, %v3661_v35  ;;  %v5221_v57 = vpop.eup %5220 }
 0x3cb   : > { %3857 = vst [vmem:[%s5891_s29 + $0x268] sm:$0xff] %v3508_v39  ;;  %v3583_v12 = vsel %vm3580_vm12, %v3582_v60, %v3578_v9  ;;  %5224 = vpow2.f32 %v8304_v4  ;;  %vm3595_vm15 = vcmp.eq.f32.partialorder %v3594_v29, 8.507059e+37  ;;  %vm3666_vm0 = vweird.f32 %v5219_v36 }
 0x3cc   : > { %3862 = vst [vmem:[%s5891_s29 + $0x290] sm:$0xff] %v3583_v12  ;;  %v3593_v28 = vsel %vm3592_vm14, %v5217_v53, %v3589_v24  ;;  %v5223_v59 = vpop.eup %5222  ;;  %v3663_v1 = vmul.f32 %v5219_v36, %v3662_v38  ;;  %v3676_v26 = vmul.f32 %v5221_v57, %v8316_v63  ;;  %vm3665_vm1 = vweird.f32 %v8308_v14 }
 0x3cd   : > { %v3598_v58 = vsel %vm3595_vm15, %v3597_v48, %v3593_v28  ;;  %v3751_v11 = vmul.f32 %v5223_v59, %v8326_v23  ;;  %vm3670_vm2 = vcmp.eq.f32.partialorder %v3669_v45, 8.507059e+37  ;;  %v3672_v17 = vor.u32 1.1754944e-38, %v3671_v62  ;;  %vm3667_vm3 = vmor %vm3665_vm1, %vm3666_vm0 }
 0x3ce   : > { %3863 = vst [vmem:[%s5891_s29 + $0x298] sm:$0xff] %v3598_v58  ;;  %v3664_v56 = vadd.f32 %v5219_v36, %v3663_v1  ;;  %v3677_v61 = vsub.f32 1.0, %v3676_v26  ;;  %v3684_v25 = vand.u32 2147483647, %v8316_v63  ;;  %v3686_v41 = vand.u32 2147483648, %v8316_v63 }
 0x3cf   : > { %v3752_v2 = vsub.f32 1.0, %v3751_v11  ;;  %v3759_v30 = vand.u32 2147483647, %v8326_v23  ;;  %vm3681_vm4 = vweird.f32 %v5221_v57  ;;  %v3761_v5 = vand.u32 2147483648, %v8326_v23 }
 0x3d0   : > { %v3668_v46 = vsel %vm3667_vm3, %v5219_v36, %v3664_v56  ;;  %v3678_v54 = vmul.f32 %v5221_v57, %v3677_v61  ;;  %vm3756_vm5 = vweird.f32 %v5223_v59  ;;  %vm3680_vm6 = vweird.f32 %v8316_v63 }
 0x3d1   : > { %v5225_v16 = vpop.eup %5224  ;;  %v3673_v44 = vsel %vm3670_vm2, %v3672_v17, %v3668_v46  ;;  %v3753_v4 = vmul.f32 %v5223_v59, %v3752_v2  ;;  %vm3682_vm7 = vmor %vm3680_vm6, %vm3681_vm4  ;;  %v3687_v18 = vor.u32 1.1754944e-38, %v3686_v41  ;;  %vm3755_vm8 = vweird.f32 %v8326_v23 }
 0x3d2   : > { %v2339_v27 = vadd.f32 1.0, %v5225_v16  ;;  %3868 = vst [vmem:[%s5891_s29 + $0x2c0] sm:$0xff] %v3673_v44  ;;  %v3679_v15 = vadd.f32 %v5221_v57, %v3678_v54  ;;  %vm3685_vm9 = vcmp.eq.f32.partialorder %v3684_v25, 8.507059e+37  ;;  %vm3757_vm10 = vmor %vm3755_vm8, %vm3756_vm5  ;;  %v3762_v10 = vor.u32 1.1754944e-38, %v3761_v5 }
 0x3d3   : > { %v3754_v14 = vadd.f32 %v5223_v59, %v3753_v4  ;;  %vm3760_vm11 = vcmp.eq.f32.partialorder %v3759_v30, 8.507059e+37 }
 0x3d4   : > { %5226 = vrcp.f32 %v2339_v27  ;;  %v3683_v31 = vsel %vm3682_vm7, %v5221_v57, %v3679_v15  ;;  %v3776_v32 = vand.u32 2147483648, %v2339_v27  ;;  %v3774_v53 = vand.u32 2147483647, %v2339_v27 }
 0x3d5   : > { %v3688_v19 = vsel %vm3685_vm9, %v3687_v18, %v3683_v31  ;;  %v3758_v8 = vsel %vm3757_vm10, %v5223_v59, %v3754_v14  ;;  %vm3770_vm13 = vweird.f32 %v2339_v27 }
 0x3d6   : > { %3869 = vst [vmem:[%s5891_s29 + $0x2c8] sm:$0xff] %v3688_v19  ;;  %v3763_v47 = vsel %vm3760_vm11, %v3762_v10, %v3758_v8  ;;  %v3777_v52 = vor.u32 1.1754944e-38, %v3776_v32  ;;  %vm3775_vm15 = vcmp.eq.f32.partialorder %v3774_v53, 8.507059e+37 }
 0x3d7   : > { %3874 = vst [vmem:[%s5891_s29 + $0x2f0] sm:$0xff] %v3763_v47 }
 0x3da   : > { %v5227_v51 = vpop.eup %5226 }
 0x3db   : > { %v3766_v63 = vmul.f32 %v5227_v51, %v2339_v27  ;;  %vm3771_vm12 = vweird.f32 %v5227_v51 }
 0x3dc   : > { %vm3772_vm14 = vmor %vm3770_vm13, %vm3771_vm12 }
 0x3dd   : > { %v3767_v0 = vsub.f32 1.0, %v3766_v63 }
 0x3df   : > { %v3768_v13 = vmul.f32 %v5227_v51, %v3767_v0 }
 0x3e1   : > { %v3769_v34 = vadd.f32 %v5227_v51, %v3768_v13 }
 0x3e3   : > { %v3773_v6 = vsel %vm3772_vm14, %v5227_v51, %v3769_v34 }
 0x3e4   : > { %v3778_v23 = vsel %vm3775_vm15, %v3777_v52, %v3773_v6 }
 0x3e5   : > { %3875 = vst [vmem:[%s5891_s29 + $0x2f8] sm:$0xff] %v3778_v23 }
 0x3e6   : > { %5407 = shalt.err (!%p5404_p10)
}
 0x3e7   : > { %s5466_s11 = smov 768   ;;  %s5467_s29 = smov 48  }
 0x3e8   : > { %4766 = dma.vmem_to_hbm [thread:$0]  (%p5595_p3), %s3891_s21, 12288, %s3893_s20, %s3877_s28, %s5466_s11, %s5466_s11, %s5467_s29  }
 0x3e9 PF: > { %s3907_s14 = sand.u32 1, %s5442_s24   ;;  %p8603_p12 = scmp.ge.s32.totalorder %s5454_s27, 2 }
 0x3ea   : > { %s3908_s17 = scalar_lea.sflag [#allocation4], %s3907_s14 }
 0x3eb   : > { %p4786_p13 = pnand %p8603_p12, %p5543_p6 }
 0x3ed   : > { %p4787_p0 = pneg %p4786_p13 }
 0x3ef   : > { %5437 = dma.done.wait (%p4787_p0), %s3908_s17, 12288  }
 0x3f0   : > { %5439 = vsyncadd (%p4787_p0), %s3908_s17, 4294955008  ;;  %p22_p5 = scmp.ge.s32.totalorder %s5585_s23, 4   ;;  %s8604_s24 = smov %s5446_s25 }
 0x3f1   : > { %s8605_s25 = smov %s5450_s26  ;;  %s8606_s26 = smov %s5601_s13 }
 0x3f2   : > { %s8607_s27 = smov %s5585_s23  ;;  %24 = sbr.rel (!%p22_p5) target bundleno = 9 (0x9), region = 109 }
 0x3f7   :  { %3914 = vsyncpa [#allocation3], 1 }
 0x3f8   :  { %3916 = vsyncpa [#allocation3 + $0x1], 1 }
 0x3f9   :  { %3917 = vsyncpa [#allocation6], 1 }
 0x3fa   :  { %3918 = vsyncpa [#allocation9], 1 }
 0x3fb   :  { %3919 = vsyncpa [#allocation4], 1 }
 0x3fc   :  { %3921 = vsyncpa [#allocation4 + $0x1], 1 }

</bundles_post_ra>
